<compile_context>
chip_gen: v7x
topology: tpu7x:2x2x1
jax: 0.10.0
libtpu: 0.0.40
codegen_flags: <defaults>
</compile_context>

<pallas_src>
import functools

import jax
import jax.numpy as jnp
import numpy as np
from jax import lax
from jax.experimental import pallas as pl
from jax.experimental.pallas import tpu as pltpu

EPS = 1e-5
LANE = 128


def _load_taps(x_ref, TH, Wp):
    """x_ref block: [1, 1, 4, TH+1, Wp+1] phase-decomposed zero-padded row tile.

    Returns the 9 taps of the 3x3 / stride-2 window, each [TH, Wp]:
      taps[3*kh + kw][oh, ow] == canvas[2*(oh_base + oh) + kh, 2*ow + kw].
    """
    planes = [x_ref[0, 0, p] for p in range(4)]         # [TH+1, Wp+1], p = 2*a + b
    taps = []
    for kh in range(3):
        a, i0 = kh & 1, kh >> 1
        for kw in range(3):
            b, j0 = kw & 1, kw >> 1
            taps.append(planes[2 * a + b][i0:i0 + TH, j0:j0 + Wp])
    return taps


def _conv_channel(taps, w_ref, base):
    """3x3 conv channel = 9 broadcast-FMAs (SMEM scalar weights), pairwise-tree summed."""
    p = [taps[k] * w_ref[base + k] for k in range(9)]
    return (((p[0] + p[1]) + (p[2] + p[3]))
            + ((p[4] + p[5]) + (p[6] + p[7]))) + p[8]


def _maxpool(taps, oh_base, *, H, W, Ho, Wo, TH, Wp):
    """3x3 stride-2 max-pool, padding=1; padded taps excluded from the max."""
    oh = lax.broadcasted_iota(jnp.int32, (TH, Wp), 0) + oh_base
    ow = lax.broadcasted_iota(jnp.int32, (TH, Wp), 1)
    pooled = None
    for kh in range(3):
        # A tap can fall outside the original image only at these borders.
        need_r = (kh == 0) or (2 * (Ho - 1) + kh - 1 >= H)
        for kw in range(3):
            t = taps[3 * kh + kw]
            need_c = (kw == 0) or (2 * (Wo - 1) + kw - 1 >= W)
            if need_r or need_c:
                valid = None
                if need_r:
                    r = 2 * oh + (kh - 1)                # original-image row
                    valid = (r >= 0) & (r < H)
                if need_c:
                    c = 2 * ow + (kw - 1)                # original-image col
                    vc = (c >= 0) & (c < W)
                    valid = vc if valid is None else (valid & vc)
                t = jnp.where(valid, t, jnp.float32(-jnp.inf))   # center tap never masked
            pooled = t if pooled is None else jnp.maximum(pooled, t)
    return pooled


def _stats_kernel(x_ref, w_ref, o_ref, *, H, W, Ho, Wo, TH, Wp, C_main):
    """Pass 1: per-(image, row-tile) channel sum & sum-of-squares, fully reduced in-kernel."""
    C_out = C_main + 1
    oh_base = pl.program_id(1) * TH
    taps = _load_taps(x_ref, TH, Wp)
    oh = lax.broadcasted_iota(jnp.int32, (TH, Wp), 0) + oh_base
    ow = lax.broadcasted_iota(jnp.int32, (TH, Wp), 1)
    valid = (oh < Ho) & (ow < Wo)            # exclude the Ho/Wo alignment padding
    col = lax.broadcasted_iota(jnp.int32, (1, 2 * C_out), 1)
    row = jnp.zeros((1, 2 * C_out), jnp.float32)
    zero = jnp.float32(0.0)
    for c in range(C_out):
        if c < C_main:
            y = _conv_channel(taps, w_ref, 9 * c)
        else:
            y = _maxpool(taps, oh_base, H=H, W=W, Ho=Ho, Wo=Wo, TH=TH, Wp=Wp)
        ym = jnp.where(valid, y, zero)
        s = jnp.sum(ym)
        sq = jnp.sum(ym * ym)
        row = row + jnp.where(col == c, s, zero) + jnp.where(col == (C_out + c), sq, zero)
    o_ref[0, 0, :, :] = row                  # single store per grid step


def _apply_kernel(x_ref, w_ref, scale_ref, shift_ref, o_ref,
                  *, H, W, Ho, Wo, TH, Wp, C_main):
    """Pass 2: recompute conv/pool, apply folded BN affine + ReLU; lane-dense NCHW store."""
    oh_base = pl.program_id(1) * TH
    taps = _load_taps(x_ref, TH, Wp)
    for c in range(C_main):
        # BN scale is already folded into the conv weights -> only add the shift.
        y = _conv_channel(taps, w_ref, 9 * c)
        o_ref[0, c, :, :] = jnp.maximum(y + shift_ref[c], 0.0)
    y = _maxpool(taps, oh_base, H=H, W=W, Ho=Ho, Wo=Wo, TH=TH, Wp=Wp)
    o_ref[0, C_main, :, :] = jnp.maximum(y * scale_ref[C_main] + shift_ref[C_main], 0.0)


def initial_block(x, conv_w, gamma, beta):
    """x: [N, 1, H, W] float32 (NCHW). Returns [N, C_out, Ho, Wo] float32."""
    N, C_in, H, W = x.shape
    C_main = conv_w.shape[0]
    C_out = C_main + C_in
    # BatchNorm2d(out_channels) only type-checks when (out_channels-1) + in_channels == out_channels.
    assert C_in == 1, "InitialBlock requires in_channels == 1"
    Ho = (H + 1) // 2
    Wo = (W + 1) // 2

    # --- tiling: lane-dense width, 8-aligned row tiles with a 1-row halo. ---
    Wp = pl.cdiv(Wo, LANE) * LANE                       # lane-dense output width
    TH = min(64, pl.cdiv(Ho, 8) * 8)                    # row-tile height (multiple of 8)
    n_tiles = pl.cdiv(Ho, TH)
    Ho_pad = n_tiles * TH

    # Zero-pad to an even canvas and space-to-depth into the four stride-2 phases:
    #   x_prep[n, 2*a + b, i, j] == canvas[n, 2*i + a, 2*j + b]
    Hc, Wc = 2 * (Ho_pad + 1), 2 * (Wp + 1)
    canvas = jnp.pad(x[:, 0].astype(jnp.float32),
                     ((0, 0), (1, Hc - 1 - H), (1, Wc - 1 - W)))
    x_prep = canvas.reshape(N, Ho_pad + 1, 2, Wp + 1, 2).transpose(0, 2, 4, 1, 3)
    x_prep = x_prep.reshape(N, 4, Ho_pad + 1, Wp + 1)
    # Overlapping row tiles (the 1-row halo is duplicated; negligible extra bytes).
    x_tiles = jnp.stack(
        [lax.slice_in_dim(x_prep, t * TH, t * TH + TH + 1, axis=2) for t in range(n_tiles)],
        axis=1)                                         # [N, n_tiles, 4, TH+1, Wp+1]

    w_flat = conv_w.astype(jnp.float32).reshape(C_main * 9)

    statics = dict(H=H, W=W, Ho=Ho, Wo=Wo, TH=TH, Wp=Wp, C_main=C_main)
    cparams = pltpu.CompilerParams(dimension_semantics=("parallel", "parallel"))
    x_spec = pl.BlockSpec((1, 1, 4, TH + 1, Wp + 1), lambda n, t: (n, t, 0, 0, 0))
    smem_spec = pl.BlockSpec(memory_space=pltpu.MemorySpace.SMEM)

    # ---- Pass 1: batch statistics (fully reduced per tile, finished in JAX). ----
    stats = pl.pallas_call(
        functools.partial(_stats_kernel, **statics),
        out_shape=jax.ShapeDtypeStruct((N, n_tiles, 1, 2 * C_out), jnp.float32),
        grid=(N, n_tiles),
        in_specs=[x_spec, smem_spec],
        out_specs=pl.BlockSpec((1, 1, 1, 2 * C_out), lambda n, t: (n, t, 0, 0)),
        compiler_params=cparams,
    )(x_tiles, w_flat)

    cnt = jnp.float32(N * Ho * Wo)
    ch_sum = jnp.sum(stats[..., :C_out], axis=(0, 1, 2))
    ch_sq = jnp.sum(stats[..., C_out:], axis=(0, 1, 2))
    mean = ch_sum / cnt
    var = jnp.maximum(ch_sq / cnt - mean * mean, 0.0)   # biased var; clamp (cancellation)
    scale = gamma.astype(jnp.float32) * lax.rsqrt(var + EPS)
    shift = beta.astype(jnp.float32) - mean * scale
    # Fold the BN scale into the conv weights so pass-2 main channels skip the multiply.
    w2_flat = (conv_w.astype(jnp.float32)
               * scale[:C_main, None, None, None]).reshape(C_main * 9)

    # ---- Pass 2: normalize + ReLU, lane-dense NCHW planes, cropped in the wrapper. ----
    out_full = pl.pallas_call(
        functools.partial(_apply_kernel, **statics),
        out_shape=jax.ShapeDtypeStruct((N, C_out, Ho_pad, Wp), jnp.float32),
        grid=(N, n_tiles),
        in_specs=[x_spec, smem_spec, smem_spec, smem_spec],
        out_specs=pl.BlockSpec((1, C_out, TH, Wp), lambda n, t: (n, 0, t, 0)),
        compiler_params=cparams,
    )(x_tiles, w2_flat, scale, shift)
    return out_full[:, :, :Ho, :Wo]


def reference(x, conv_w, gamma, beta):
    main = lax.conv_general_dilated(
        x, conv_w, window_strides=(2, 2), padding=((1, 1), (1, 1)),
        dimension_numbers=('NCHW', 'OIHW', 'NCHW'))
    ext = lax.reduce_window(
        x, -jnp.inf, lax.max, window_dimensions=(1, 1, 3, 3),
        window_strides=(1, 1, 2, 2), padding=((0, 0), (0, 0), (1, 1), (1, 1)))
    out = jnp.concatenate([main, ext], axis=1)
    mean = jnp.mean(out, axis=(0, 2, 3), keepdims=True)
    var = jnp.mean((out - mean) ** 2, axis=(0, 2, 3), keepdims=True)
    out = (out - mean) / jnp.sqrt(var + EPS)
    out = out * gamma.reshape(1, -1, 1, 1) + beta.reshape(1, -1, 1, 1)
    return jnp.maximum(out, 0.0)


def _run_case(key, N, H, W, C_out):
    k_x, k_w, k_g, k_b = jax.random.split(key, 4)
    x = jax.random.normal(k_x, (N, 1, H, W), dtype=jnp.float32)
    conv_w = jax.random.normal(k_w, (C_out - 1, 1, 3, 3), dtype=jnp.float32) * 0.1
    gamma = 1.0 + 0.1 * jax.random.normal(k_g, (C_out,), dtype=jnp.float32)
    beta = 0.1 * jax.random.normal(k_b, (C_out,), dtype=jnp.float32)

    out = jax.block_until_ready(jax.jit(initial_block)(x, conv_w, gamma, beta))
    ref = jax.block_until_ready(reference(x, conv_w, gamma, beta))
    np.testing.assert_allclose(np.asarray(out), np.asarray(ref), rtol=1e-4, atol=1e-4)


if __name__ == "__main__":
    key = jax.random.PRNGKey(0)
    k1, k2 = jax.random.split(key)
    # Primary small case: batch=2, in_channels=1 (required by the module), 16x16, C_out=8.
    _run_case(k1, N=2, H=16, W=16, C_out=8)
    # Odd-size multi-row-tile case: exercises halo tiles, border masking and the crop path.
    _run_case(k2, N=1, H=129, W=129, C_out=8)
    print("KERNEL_OK")
</pallas_src>

<mosaic_0001>
module attributes {stable_mosaic.version = 11 : i64} {
  func.func @_stats_kernel(%arg0: i32, %arg1: i32, %arg2: memref<1x1x4x9x129xf32, #tpu.memory_space<vmem>>, %arg3: memref<63xf32, #tpu.memory_space<smem>>, %arg4: memref<1x1x1x16xf32, #tpu.memory_space<vmem>>) attributes {dimension_semantics = [#tpu.dimension_semantics<parallel>, #tpu.dimension_semantics<parallel>], iteration_bounds = array<i64: 2, 1>, scalar_prefetch = 0 : i64, scratch_operands = 0 : i64, tpu.core_type = #tpu.core_type<tc>, window_params = [{transform_indices = @transform_0, window_bounds = array<i64: 1, 1, 4, 9, 129>}, {transform_indices = @transform_1, window_bounds = array<i64: 63>}, {transform_indices = @transform_2, window_bounds = array<i64: 1, 1, 1, 16>}]} {
    %c8_i32 = arith.constant 8 : i32
    %0 = arith.muli %arg1, %c8_i32 : i32
    %c0 = arith.constant 0 : index
    %c0_0 = arith.constant 0 : index
    %c0_1 = arith.constant 0 : index
    %c0_2 = arith.constant 0 : index
    %c0_3 = arith.constant 0 : index
    %1 = vector.load %arg2[%c0, %c0_0, %c0_1, %c0_2, %c0_3] : memref<1x1x4x9x129xf32, #tpu.memory_space<vmem>>, vector<1x1x1x9x129xf32>
    %2 = vector.shape_cast %1 : vector<1x1x1x9x129xf32> to vector<9x129xf32>
    %c0_4 = arith.constant 0 : index
    %c0_5 = arith.constant 0 : index
    %c1 = arith.constant 1 : index
    %c0_6 = arith.constant 0 : index
    %c0_7 = arith.constant 0 : index
    %3 = vector.load %arg2[%c0_4, %c0_5, %c1, %c0_6, %c0_7] : memref<1x1x4x9x129xf32, #tpu.memory_space<vmem>>, vector<1x1x1x9x129xf32>
    %4 = vector.shape_cast %3 : vector<1x1x1x9x129xf32> to vector<9x129xf32>
    %c0_8 = arith.constant 0 : index
    %c0_9 = arith.constant 0 : index
    %c2 = arith.constant 2 : index
    %c0_10 = arith.constant 0 : index
    %c0_11 = arith.constant 0 : index
    %5 = vector.load %arg2[%c0_8, %c0_9, %c2, %c0_10, %c0_11] : memref<1x1x4x9x129xf32, #tpu.memory_space<vmem>>, vector<1x1x1x9x129xf32>
    %6 = vector.shape_cast %5 : vector<1x1x1x9x129xf32> to vector<9x129xf32>
    %c0_12 = arith.constant 0 : index
    %c0_13 = arith.constant 0 : index
    %c3 = arith.constant 3 : index
    %c0_14 = arith.constant 0 : index
    %c0_15 = arith.constant 0 : index
    %7 = vector.load %arg2[%c0_12, %c0_13, %c3, %c0_14, %c0_15] : memref<1x1x4x9x129xf32, #tpu.memory_space<vmem>>, vector<1x1x1x9x129xf32>
    %8 = vector.shape_cast %7 : vector<1x1x1x9x129xf32> to vector<9x129xf32>
    %9 = vector.extract_strided_slice %2 {offsets = [0, 0], sizes = [8, 128], strides = [1, 1]} : vector<9x129xf32> to vector<8x128xf32>
    %10 = vector.extract_strided_slice %4 {offsets = [0, 0], sizes = [8, 128], strides = [1, 1]} : vector<9x129xf32> to vector<8x128xf32>
    %11 = vector.extract_strided_slice %2 {offsets = [0, 1], sizes = [8, 128], strides = [1, 1]} : vector<9x129xf32> to vector<8x128xf32>
    %12 = vector.extract_strided_slice %6 {offsets = [0, 0], sizes = [8, 128], strides = [1, 1]} : vector<9x129xf32> to vector<8x128xf32>
    %13 = vector.extract_strided_slice %8 {offsets = [0, 0], sizes = [8, 128], strides = [1, 1]} : vector<9x129xf32> to vector<8x128xf32>
    %14 = vector.extract_strided_slice %6 {offsets = [0, 1], sizes = [8, 128], strides = [1, 1]} : vector<9x129xf32> to vector<8x128xf32>
    %15 = vector.extract_strided_slice %2 {offsets = [1, 0], sizes = [8, 128], strides = [1, 1]} : vector<9x129xf32> to vector<8x128xf32>
    %16 = vector.extract_strided_slice %4 {offsets = [1, 0], sizes = [8, 128], strides = [1, 1]} : vector<9x129xf32> to vector<8x128xf32>
    %17 = vector.extract_strided_slice %2 {offsets = [1, 1], sizes = [8, 128], strides = [1, 1]} : vector<9x129xf32> to vector<8x128xf32>
    %18 = tpu.iota {dimensions = array<i32: 0>} : vector<8x128xi32>
    %19 = vector.broadcast %0 : i32 to vector<8x128xi32>
    %20 = arith.addi %18, %19 : vector<8x128xi32>
    %21 = tpu.iota {dimensions = array<i32: 1>} : vector<8x128xi32>
    %c8_i32_16 = arith.constant 8 : i32
    %22 = vector.broadcast %c8_i32_16 : i32 to vector<8x128xi32>
    %23 = arith.cmpi slt, %20, %22 : vector<8x128xi32>
    %c8_i32_17 = arith.constant 8 : i32
    %24 = vector.broadcast %c8_i32_17 : i32 to vector<8x128xi32>
    %25 = arith.cmpi slt, %21, %24 : vector<8x128xi32>
    %26 = arith.andi %23, %25 : vector<8x128xi1>
    %27 = tpu.iota {dimensions = array<i32: 1>} : vector<1x16xi32>
    %cst = arith.constant 0.000000e+00 : f32
    %28 = vector.broadcast %cst : f32 to vector<1x16xf32>
    %c0_18 = arith.constant 0 : index
    %29 = memref.load %arg3[%c0_18] : memref<63xf32, #tpu.memory_space<smem>>
    %30 = vector.broadcast %29 : f32 to vector<8x128xf32>
    %31 = arith.mulf %9, %30 : vector<8x128xf32>
    %c1_19 = arith.constant 1 : index
    %32 = memref.load %arg3[%c1_19] : memref<63xf32, #tpu.memory_space<smem>>
    %33 = vector.broadcast %32 : f32 to vector<8x128xf32>
    %34 = arith.mulf %10, %33 : vector<8x128xf32>
    %c2_20 = arith.constant 2 : index
    %35 = memref.load %arg3[%c2_20] : memref<63xf32, #tpu.memory_space<smem>>
    %36 = vector.broadcast %35 : f32 to vector<8x128xf32>
    %37 = arith.mulf %11, %36 : vector<8x128xf32>
    %c3_21 = arith.constant 3 : index
    %38 = memref.load %arg3[%c3_21] : memref<63xf32, #tpu.memory_space<smem>>
    %39 = vector.broadcast %38 : f32 to vector<8x128xf32>
    %40 = arith.mulf %12, %39 : vector<8x128xf32>
    %c4 = arith.constant 4 : index
    %41 = memref.load %arg3[%c4] : memref<63xf32, #tpu.memory_space<smem>>
    %42 = vector.broadcast %41 : f32 to vector<8x128xf32>
    %43 = arith.mulf %13, %42 : vector<8x128xf32>
    %c5 = arith.constant 5 : index
    %44 = memref.load %arg3[%c5] : memref<63xf32, #tpu.memory_space<smem>>
    %45 = vector.broadcast %44 : f32 to vector<8x128xf32>
    %46 = arith.mulf %14, %45 : vector<8x128xf32>
    %c6 = arith.constant 6 : index
    %47 = memref.load %arg3[%c6] : memref<63xf32, #tpu.memory_space<smem>>
    %48 = vector.broadcast %47 : f32 to vector<8x128xf32>
    %49 = arith.mulf %15, %48 : vector<8x128xf32>
    %c7 = arith.constant 7 : index
    %50 = memref.load %arg3[%c7] : memref<63xf32, #tpu.memory_space<smem>>
    %51 = vector.broadcast %50 : f32 to vector<8x128xf32>
    %52 = arith.mulf %16, %51 : vector<8x128xf32>
    %c8 = arith.constant 8 : index
    %53 = memref.load %arg3[%c8] : memref<63xf32, #tpu.memory_space<smem>>
    %54 = vector.broadcast %53 : f32 to vector<8x128xf32>
    %55 = arith.mulf %17, %54 : vector<8x128xf32>
    %56 = arith.addf %31, %34 : vector<8x128xf32>
    %57 = arith.addf %37, %40 : vector<8x128xf32>
    %58 = arith.addf %56, %57 : vector<8x128xf32>
    %59 = arith.addf %43, %46 : vector<8x128xf32>
    %60 = arith.addf %49, %52 : vector<8x128xf32>
    %61 = arith.addf %59, %60 : vector<8x128xf32>
    %62 = arith.addf %58, %61 : vector<8x128xf32>
    %63 = arith.addf %62, %55 : vector<8x128xf32>
    %cst_22 = arith.constant 0.000000e+00 : f32
    %64 = vector.broadcast %cst_22 : f32 to vector<8x128xf32>
    %65 = arith.select %26, %63, %64 : vector<8x128xi1>, vector<8x128xf32>
    %66 = vector.shape_cast %65 : vector<8x128xf32> to vector<1x8x128xf32>
    %cst_23 = arith.constant dense<0.000000e+00> : vector<1xf32>
    %67 = vector.multi_reduction <add>, %66, %cst_23 [1, 2] : vector<1x8x128xf32> to vector<1xf32>
    %68 = vector.shape_cast %67 : vector<1xf32> to vector<1x1x1xf32>
    %69 = vector.extract %68[0, 0, 0] : f32 from vector<1x1x1xf32>
    %70 = arith.mulf %65, %65 : vector<8x128xf32>
    %71 = vector.shape_cast %70 : vector<8x128xf32> to vector<1x8x128xf32>
    %cst_24 = arith.constant dense<0.000000e+00> : vector<1xf32>
    %72 = vector.multi_reduction <add>, %71, %cst_24 [1, 2] : vector<1x8x128xf32> to vector<1xf32>
    %73 = vector.shape_cast %72 : vector<1xf32> to vector<1x1x1xf32>
    %74 = vector.extract %73[0, 0, 0] : f32 from vector<1x1x1xf32>
    %c0_i32 = arith.constant 0 : i32
    %75 = vector.broadcast %c0_i32 : i32 to vector<1x16xi32>
    %76 = arith.cmpi eq, %27, %75 : vector<1x16xi32>
    %cst_25 = arith.constant 0.000000e+00 : f32
    %77 = vector.broadcast %69 : f32 to vector<1x16xf32>
    %78 = vector.broadcast %cst_25 : f32 to vector<1x16xf32>
    %79 = arith.select %76, %77, %78 : vector<1x16xi1>, vector<1x16xf32>
    %80 = arith.addf %28, %79 : vector<1x16xf32>
    %c8_i32_26 = arith.constant 8 : i32
    %81 = vector.broadcast %c8_i32_26 : i32 to vector<1x16xi32>
    %82 = arith.cmpi eq, %27, %81 : vector<1x16xi32>
    %cst_27 = arith.constant 0.000000e+00 : f32
    %83 = vector.broadcast %74 : f32 to vector<1x16xf32>
    %84 = vector.broadcast %cst_27 : f32 to vector<1x16xf32>
    %85 = arith.select %82, %83, %84 : vector<1x16xi1>, vector<1x16xf32>
    %86 = arith.addf %80, %85 : vector<1x16xf32>
    %c9 = arith.constant 9 : index
    %87 = memref.load %arg3[%c9] : memref<63xf32, #tpu.memory_space<smem>>
    %88 = vector.broadcast %87 : f32 to vector<8x128xf32>
    %89 = arith.mulf %9, %88 : vector<8x128xf32>
    %c10 = arith.constant 10 : index
    %90 = memref.load %arg3[%c10] : memref<63xf32, #tpu.memory_space<smem>>
    %91 = vector.broadcast %90 : f32 to vector<8x128xf32>
    %92 = arith.mulf %10, %91 : vector<8x128xf32>
    %c11 = arith.constant 11 : index
    %93 = memref.load %arg3[%c11] : memref<63xf32, #tpu.memory_space<smem>>
    %94 = vector.broadcast %93 : f32 to vector<8x128xf32>
    %95 = arith.mulf %11, %94 : vector<8x128xf32>
    %c12 = arith.constant 12 : index
    %96 = memref.load %arg3[%c12] : memref<63xf32, #tpu.memory_space<smem>>
    %97 = vector.broadcast %96 : f32 to vector<8x128xf32>
    %98 = arith.mulf %12, %97 : vector<8x128xf32>
    %c13 = arith.constant 13 : index
    %99 = memref.load %arg3[%c13] : memref<63xf32, #tpu.memory_space<smem>>
    %100 = vector.broadcast %99 : f32 to vector<8x128xf32>
    %101 = arith.mulf %13, %100 : vector<8x128xf32>
    %c14 = arith.constant 14 : index
    %102 = memref.load %arg3[%c14] : memref<63xf32, #tpu.memory_space<smem>>
    %103 = vector.broadcast %102 : f32 to vector<8x128xf32>
    %104 = arith.mulf %14, %103 : vector<8x128xf32>
    %c15 = arith.constant 15 : index
    %105 = memref.load %arg3[%c15] : memref<63xf32, #tpu.memory_space<smem>>
    %106 = vector.broadcast %105 : f32 to vector<8x128xf32>
    %107 = arith.mulf %15, %106 : vector<8x128xf32>
    %c16 = arith.constant 16 : index
    %108 = memref.load %arg3[%c16] : memref<63xf32, #tpu.memory_space<smem>>
    %109 = vector.broadcast %108 : f32 to vector<8x128xf32>
    %110 = arith.mulf %16, %109 : vector<8x128xf32>
    %c17 = arith.constant 17 : index
    %111 = memref.load %arg3[%c17] : memref<63xf32, #tpu.memory_space<smem>>
    %112 = vector.broadcast %111 : f32 to vector<8x128xf32>
    %113 = arith.mulf %17, %112 : vector<8x128xf32>
    %114 = arith.addf %89, %92 : vector<8x128xf32>
    %115 = arith.addf %95, %98 : vector<8x128xf32>
    %116 = arith.addf %114, %115 : vector<8x128xf32>
    %117 = arith.addf %101, %104 : vector<8x128xf32>
    %118 = arith.addf %107, %110 : vector<8x128xf32>
    %119 = arith.addf %117, %118 : vector<8x128xf32>
    %120 = arith.addf %116, %119 : vector<8x128xf32>
    %121 = arith.addf %120, %113 : vector<8x128xf32>
    %cst_28 = arith.constant 0.000000e+00 : f32
    %122 = vector.broadcast %cst_28 : f32 to vector<8x128xf32>
    %123 = arith.select %26, %121, %122 : vector<8x128xi1>, vector<8x128xf32>
    %124 = vector.shape_cast %123 : vector<8x128xf32> to vector<1x8x128xf32>
    %cst_29 = arith.constant dense<0.000000e+00> : vector<1xf32>
    %125 = vector.multi_reduction <add>, %124, %cst_29 [1, 2] : vector<1x8x128xf32> to vector<1xf32>
    %126 = vector.shape_cast %125 : vector<1xf32> to vector<1x1x1xf32>
    %127 = vector.extract %126[0, 0, 0] : f32 from vector<1x1x1xf32>
    %128 = arith.mulf %123, %123 : vector<8x128xf32>
    %129 = vector.shape_cast %128 : vector<8x128xf32> to vector<1x8x128xf32>
    %cst_30 = arith.constant dense<0.000000e+00> : vector<1xf32>
    %130 = vector.multi_reduction <add>, %129, %cst_30 [1, 2] : vector<1x8x128xf32> to vector<1xf32>
    %131 = vector.shape_cast %130 : vector<1xf32> to vector<1x1x1xf32>
    %132 = vector.extract %131[0, 0, 0] : f32 from vector<1x1x1xf32>
    %c1_i32 = arith.constant 1 : i32
    %133 = vector.broadcast %c1_i32 : i32 to vector<1x16xi32>
    %134 = arith.cmpi eq, %27, %133 : vector<1x16xi32>
    %cst_31 = arith.constant 0.000000e+00 : f32
    %135 = vector.broadcast %127 : f32 to vector<1x16xf32>
    %136 = vector.broadcast %cst_31 : f32 to vector<1x16xf32>
    %137 = arith.select %134, %135, %136 : vector<1x16xi1>, vector<1x16xf32>
    %138 = arith.addf %86, %137 : vector<1x16xf32>
    %c9_i32 = arith.constant 9 : i32
    %139 = vector.broadcast %c9_i32 : i32 to vector<1x16xi32>
    %140 = arith.cmpi eq, %27, %139 : vector<1x16xi32>
    %cst_32 = arith.constant 0.000000e+00 : f32
    %141 = vector.broadcast %132 : f32 to vector<1x16xf32>
    %142 = vector.broadcast %cst_32 : f32 to vector<1x16xf32>
    %143 = arith.select %140, %141, %142 : vector<1x16xi1>, vector<1x16xf32>
    %144 = arith.addf %138, %143 : vector<1x16xf32>
    %c18 = arith.constant 18 : index
    %145 = memref.load %arg3[%c18] : memref<63xf32, #tpu.memory_space<smem>>
    %146 = vector.broadcast %145 : f32 to vector<8x128xf32>
    %147 = arith.mulf %9, %146 : vector<8x128xf32>
    %c19 = arith.constant 19 : index
    %148 = memref.load %arg3[%c19] : memref<63xf32, #tpu.memory_space<smem>>
    %149 = vector.broadcast %148 : f32 to vector<8x128xf32>
    %150 = arith.mulf %10, %149 : vector<8x128xf32>
    %c20 = arith.constant 20 : index
    %151 = memref.load %arg3[%c20] : memref<63xf32, #tpu.memory_space<smem>>
    %152 = vector.broadcast %151 : f32 to vector<8x128xf32>
    %153 = arith.mulf %11, %152 : vector<8x128xf32>
    %c21 = arith.constant 21 : index
    %154 = memref.load %arg3[%c21] : memref<63xf32, #tpu.memory_space<smem>>
    %155 = vector.broadcast %154 : f32 to vector<8x128xf32>
    %156 = arith.mulf %12, %155 : vector<8x128xf32>
    %c22 = arith.constant 22 : index
    %157 = memref.load %arg3[%c22] : memref<63xf32, #tpu.memory_space<smem>>
    %158 = vector.broadcast %157 : f32 to vector<8x128xf32>
    %159 = arith.mulf %13, %158 : vector<8x128xf32>
    %c23 = arith.constant 23 : index
    %160 = memref.load %arg3[%c23] : memref<63xf32, #tpu.memory_space<smem>>
    %161 = vector.broadcast %160 : f32 to vector<8x128xf32>
    %162 = arith.mulf %14, %161 : vector<8x128xf32>
    %c24 = arith.constant 24 : index
    %163 = memref.load %arg3[%c24] : memref<63xf32, #tpu.memory_space<smem>>
    %164 = vector.broadcast %163 : f32 to vector<8x128xf32>
    %165 = arith.mulf %15, %164 : vector<8x128xf32>
    %c25 = arith.constant 25 : index
    %166 = memref.load %arg3[%c25] : memref<63xf32, #tpu.memory_space<smem>>
    %167 = vector.broadcast %166 : f32 to vector<8x128xf32>
    %168 = arith.mulf %16, %167 : vector<8x128xf32>
    %c26 = arith.constant 26 : index
    %169 = memref.load %arg3[%c26] : memref<63xf32, #tpu.memory_space<smem>>
    %170 = vector.broadcast %169 : f32 to vector<8x128xf32>
    %171 = arith.mulf %17, %170 : vector<8x128xf32>
    %172 = arith.addf %147, %150 : vector<8x128xf32>
    %173 = arith.addf %153, %156 : vector<8x128xf32>
    %174 = arith.addf %172, %173 : vector<8x128xf32>
    %175 = arith.addf %159, %162 : vector<8x128xf32>
    %176 = arith.addf %165, %168 : vector<8x128xf32>
    %177 = arith.addf %175, %176 : vector<8x128xf32>
    %178 = arith.addf %174, %177 : vector<8x128xf32>
    %179 = arith.addf %178, %171 : vector<8x128xf32>
    %cst_33 = arith.constant 0.000000e+00 : f32
    %180 = vector.broadcast %cst_33 : f32 to vector<8x128xf32>
    %181 = arith.select %26, %179, %180 : vector<8x128xi1>, vector<8x128xf32>
    %182 = vector.shape_cast %181 : vector<8x128xf32> to vector<1x8x128xf32>
    %cst_34 = arith.constant dense<0.000000e+00> : vector<1xf32>
    %183 = vector.multi_reduction <add>, %182, %cst_34 [1, 2] : vector<1x8x128xf32> to vector<1xf32>
    %184 = vector.shape_cast %183 : vector<1xf32> to vector<1x1x1xf32>
    %185 = vector.extract %184[0, 0, 0] : f32 from vector<1x1x1xf32>
    %186 = arith.mulf %181, %181 : vector<8x128xf32>
    %187 = vector.shape_cast %186 : vector<8x128xf32> to vector<1x8x128xf32>
    %cst_35 = arith.constant dense<0.000000e+00> : vector<1xf32>
    %188 = vector.multi_reduction <add>, %187, %cst_35 [1, 2] : vector<1x8x128xf32> to vector<1xf32>
    %189 = vector.shape_cast %188 : vector<1xf32> to vector<1x1x1xf32>
    %190 = vector.extract %189[0, 0, 0] : f32 from vector<1x1x1xf32>
    %c2_i32 = arith.constant 2 : i32
    %191 = vector.broadcast %c2_i32 : i32 to vector<1x16xi32>
    %192 = arith.cmpi eq, %27, %191 : vector<1x16xi32>
    %cst_36 = arith.constant 0.000000e+00 : f32
    %193 = vector.broadcast %185 : f32 to vector<1x16xf32>
    %194 = vector.broadcast %cst_36 : f32 to vector<1x16xf32>
    %195 = arith.select %192, %193, %194 : vector<1x16xi1>, vector<1x16xf32>
    %196 = arith.addf %144, %195 : vector<1x16xf32>
    %c10_i32 = arith.constant 10 : i32
    %197 = vector.broadcast %c10_i32 : i32 to vector<1x16xi32>
    %198 = arith.cmpi eq, %27, %197 : vector<1x16xi32>
    %cst_37 = arith.constant 0.000000e+00 : f32
    %199 = vector.broadcast %190 : f32 to vector<1x16xf32>
    %200 = vector.broadcast %cst_37 : f32 to vector<1x16xf32>
    %201 = arith.select %198, %199, %200 : vector<1x16xi1>, vector<1x16xf32>
    %202 = arith.addf %196, %201 : vector<1x16xf32>
    %c27 = arith.constant 27 : index
    %203 = memref.load %arg3[%c27] : memref<63xf32, #tpu.memory_space<smem>>
    %204 = vector.broadcast %203 : f32 to vector<8x128xf32>
    %205 = arith.mulf %9, %204 : vector<8x128xf32>
    %c28 = arith.constant 28 : index
    %206 = memref.load %arg3[%c28] : memref<63xf32, #tpu.memory_space<smem>>
    %207 = vector.broadcast %206 : f32 to vector<8x128xf32>
    %208 = arith.mulf %10, %207 : vector<8x128xf32>
    %c29 = arith.constant 29 : index
    %209 = memref.load %arg3[%c29] : memref<63xf32, #tpu.memory_space<smem>>
    %210 = vector.broadcast %209 : f32 to vector<8x128xf32>
    %211 = arith.mulf %11, %210 : vector<8x128xf32>
    %c30 = arith.constant 30 : index
    %212 = memref.load %arg3[%c30] : memref<63xf32, #tpu.memory_space<smem>>
    %213 = vector.broadcast %212 : f32 to vector<8x128xf32>
    %214 = arith.mulf %12, %213 : vector<8x128xf32>
    %c31 = arith.constant 31 : index
    %215 = memref.load %arg3[%c31] : memref<63xf32, #tpu.memory_space<smem>>
    %216 = vector.broadcast %215 : f32 to vector<8x128xf32>
    %217 = arith.mulf %13, %216 : vector<8x128xf32>
    %c32 = arith.constant 32 : index
    %218 = memref.load %arg3[%c32] : memref<63xf32, #tpu.memory_space<smem>>
    %219 = vector.broadcast %218 : f32 to vector<8x128xf32>
    %220 = arith.mulf %14, %219 : vector<8x128xf32>
    %c33 = arith.constant 33 : index
    %221 = memref.load %arg3[%c33] : memref<63xf32, #tpu.memory_space<smem>>
    %222 = vector.broadcast %221 : f32 to vector<8x128xf32>
    %223 = arith.mulf %15, %222 : vector<8x128xf32>
    %c34 = arith.constant 34 : index
    %224 = memref.load %arg3[%c34] : memref<63xf32, #tpu.memory_space<smem>>
    %225 = vector.broadcast %224 : f32 to vector<8x128xf32>
    %226 = arith.mulf %16, %225 : vector<8x128xf32>
    %c35 = arith.constant 35 : index
    %227 = memref.load %arg3[%c35] : memref<63xf32, #tpu.memory_space<smem>>
    %228 = vector.broadcast %227 : f32 to vector<8x128xf32>
    %229 = arith.mulf %17, %228 : vector<8x128xf32>
    %230 = arith.addf %205, %208 : vector<8x128xf32>
    %231 = arith.addf %211, %214 : vector<8x128xf32>
    %232 = arith.addf %230, %231 : vector<8x128xf32>
    %233 = arith.addf %217, %220 : vector<8x128xf32>
    %234 = arith.addf %223, %226 : vector<8x128xf32>
    %235 = arith.addf %233, %234 : vector<8x128xf32>
    %236 = arith.addf %232, %235 : vector<8x128xf32>
    %237 = arith.addf %236, %229 : vector<8x128xf32>
    %cst_38 = arith.constant 0.000000e+00 : f32
    %238 = vector.broadcast %cst_38 : f32 to vector<8x128xf32>
    %239 = arith.select %26, %237, %238 : vector<8x128xi1>, vector<8x128xf32>
    %240 = vector.shape_cast %239 : vector<8x128xf32> to vector<1x8x128xf32>
    %cst_39 = arith.constant dense<0.000000e+00> : vector<1xf32>
    %241 = vector.multi_reduction <add>, %240, %cst_39 [1, 2] : vector<1x8x128xf32> to vector<1xf32>
    %242 = vector.shape_cast %241 : vector<1xf32> to vector<1x1x1xf32>
    %243 = vector.extract %242[0, 0, 0] : f32 from vector<1x1x1xf32>
    %244 = arith.mulf %239, %239 : vector<8x128xf32>
    %245 = vector.shape_cast %244 : vector<8x128xf32> to vector<1x8x128xf32>
    %cst_40 = arith.constant dense<0.000000e+00> : vector<1xf32>
    %246 = vector.multi_reduction <add>, %245, %cst_40 [1, 2] : vector<1x8x128xf32> to vector<1xf32>
    %247 = vector.shape_cast %246 : vector<1xf32> to vector<1x1x1xf32>
    %248 = vector.extract %247[0, 0, 0] : f32 from vector<1x1x1xf32>
    %c3_i32 = arith.constant 3 : i32
    %249 = vector.broadcast %c3_i32 : i32 to vector<1x16xi32>
    %250 = arith.cmpi eq, %27, %249 : vector<1x16xi32>
    %cst_41 = arith.constant 0.000000e+00 : f32
    %251 = vector.broadcast %243 : f32 to vector<1x16xf32>
    %252 = vector.broadcast %cst_41 : f32 to vector<1x16xf32>
    %253 = arith.select %250, %251, %252 : vector<1x16xi1>, vector<1x16xf32>
    %254 = arith.addf %202, %253 : vector<1x16xf32>
    %c11_i32 = arith.constant 11 : i32
    %255 = vector.broadcast %c11_i32 : i32 to vector<1x16xi32>
    %256 = arith.cmpi eq, %27, %255 : vector<1x16xi32>
    %cst_42 = arith.constant 0.000000e+00 : f32
    %257 = vector.broadcast %248 : f32 to vector<1x16xf32>
    %258 = vector.broadcast %cst_42 : f32 to vector<1x16xf32>
    %259 = arith.select %256, %257, %258 : vector<1x16xi1>, vector<1x16xf32>
    %260 = arith.addf %254, %259 : vector<1x16xf32>
    %c36 = arith.constant 36 : index
    %261 = memref.load %arg3[%c36] : memref<63xf32, #tpu.memory_space<smem>>
    %262 = vector.broadcast %261 : f32 to vector<8x128xf32>
    %263 = arith.mulf %9, %262 : vector<8x128xf32>
    %c37 = arith.constant 37 : index
    %264 = memref.load %arg3[%c37] : memref<63xf32, #tpu.memory_space<smem>>
    %265 = vector.broadcast %264 : f32 to vector<8x128xf32>
    %266 = arith.mulf %10, %265 : vector<8x128xf32>
    %c38 = arith.constant 38 : index
    %267 = memref.load %arg3[%c38] : memref<63xf32, #tpu.memory_space<smem>>
    %268 = vector.broadcast %267 : f32 to vector<8x128xf32>
    %269 = arith.mulf %11, %268 : vector<8x128xf32>
    %c39 = arith.constant 39 : index
    %270 = memref.load %arg3[%c39] : memref<63xf32, #tpu.memory_space<smem>>
    %271 = vector.broadcast %270 : f32 to vector<8x128xf32>
    %272 = arith.mulf %12, %271 : vector<8x128xf32>
    %c40 = arith.constant 40 : index
    %273 = memref.load %arg3[%c40] : memref<63xf32, #tpu.memory_space<smem>>
    %274 = vector.broadcast %273 : f32 to vector<8x128xf32>
    %275 = arith.mulf %13, %274 : vector<8x128xf32>
    %c41 = arith.constant 41 : index
    %276 = memref.load %arg3[%c41] : memref<63xf32, #tpu.memory_space<smem>>
    %277 = vector.broadcast %276 : f32 to vector<8x128xf32>
    %278 = arith.mulf %14, %277 : vector<8x128xf32>
    %c42 = arith.constant 42 : index
    %279 = memref.load %arg3[%c42] : memref<63xf32, #tpu.memory_space<smem>>
    %280 = vector.broadcast %279 : f32 to vector<8x128xf32>
    %281 = arith.mulf %15, %280 : vector<8x128xf32>
    %c43 = arith.constant 43 : index
    %282 = memref.load %arg3[%c43] : memref<63xf32, #tpu.memory_space<smem>>
    %283 = vector.broadcast %282 : f32 to vector<8x128xf32>
    %284 = arith.mulf %16, %283 : vector<8x128xf32>
    %c44 = arith.constant 44 : index
    %285 = memref.load %arg3[%c44] : memref<63xf32, #tpu.memory_space<smem>>
    %286 = vector.broadcast %285 : f32 to vector<8x128xf32>
    %287 = arith.mulf %17, %286 : vector<8x128xf32>
    %288 = arith.addf %263, %266 : vector<8x128xf32>
    %289 = arith.addf %269, %272 : vector<8x128xf32>
    %290 = arith.addf %288, %289 : vector<8x128xf32>
    %291 = arith.addf %275, %278 : vector<8x128xf32>
    %292 = arith.addf %281, %284 : vector<8x128xf32>
    %293 = arith.addf %291, %292 : vector<8x128xf32>
    %294 = arith.addf %290, %293 : vector<8x128xf32>
    %295 = arith.addf %294, %287 : vector<8x128xf32>
    %cst_43 = arith.constant 0.000000e+00 : f32
    %296 = vector.broadcast %cst_43 : f32 to vector<8x128xf32>
    %297 = arith.select %26, %295, %296 : vector<8x128xi1>, vector<8x128xf32>
    %298 = vector.shape_cast %297 : vector<8x128xf32> to vector<1x8x128xf32>
    %cst_44 = arith.constant dense<0.000000e+00> : vector<1xf32>
    %299 = vector.multi_reduction <add>, %298, %cst_44 [1, 2] : vector<1x8x128xf32> to vector<1xf32>
    %300 = vector.shape_cast %299 : vector<1xf32> to vector<1x1x1xf32>
    %301 = vector.extract %300[0, 0, 0] : f32 from vector<1x1x1xf32>
    %302 = arith.mulf %297, %297 : vector<8x128xf32>
    %303 = vector.shape_cast %302 : vector<8x128xf32> to vector<1x8x128xf32>
    %cst_45 = arith.constant dense<0.000000e+00> : vector<1xf32>
    %304 = vector.multi_reduction <add>, %303, %cst_45 [1, 2] : vector<1x8x128xf32> to vector<1xf32>
    %305 = vector.shape_cast %304 : vector<1xf32> to vector<1x1x1xf32>
    %306 = vector.extract %305[0, 0, 0] : f32 from vector<1x1x1xf32>
    %c4_i32 = arith.constant 4 : i32
    %307 = vector.broadcast %c4_i32 : i32 to vector<1x16xi32>
    %308 = arith.cmpi eq, %27, %307 : vector<1x16xi32>
    %cst_46 = arith.constant 0.000000e+00 : f32
    %309 = vector.broadcast %301 : f32 to vector<1x16xf32>
    %310 = vector.broadcast %cst_46 : f32 to vector<1x16xf32>
    %311 = arith.select %308, %309, %310 : vector<1x16xi1>, vector<1x16xf32>
    %312 = arith.addf %260, %311 : vector<1x16xf32>
    %c12_i32 = arith.constant 12 : i32
    %313 = vector.broadcast %c12_i32 : i32 to vector<1x16xi32>
    %314 = arith.cmpi eq, %27, %313 : vector<1x16xi32>
    %cst_47 = arith.constant 0.000000e+00 : f32
    %315 = vector.broadcast %306 : f32 to vector<1x16xf32>
    %316 = vector.broadcast %cst_47 : f32 to vector<1x16xf32>
    %317 = arith.select %314, %315, %316 : vector<1x16xi1>, vector<1x16xf32>
    %318 = arith.addf %312, %317 : vector<1x16xf32>
    %c45 = arith.constant 45 : index
    %319 = memref.load %arg3[%c45] : memref<63xf32, #tpu.memory_space<smem>>
    %320 = vector.broadcast %319 : f32 to vector<8x128xf32>
    %321 = arith.mulf %9, %320 : vector<8x128xf32>
    %c46 = arith.constant 46 : index
    %322 = memref.load %arg3[%c46] : memref<63xf32, #tpu.memory_space<smem>>
    %323 = vector.broadcast %322 : f32 to vector<8x128xf32>
    %324 = arith.mulf %10, %323 : vector<8x128xf32>
    %c47 = arith.constant 47 : index
    %325 = memref.load %arg3[%c47] : memref<63xf32, #tpu.memory_space<smem>>
    %326 = vector.broadcast %325 : f32 to vector<8x128xf32>
    %327 = arith.mulf %11, %326 : vector<8x128xf32>
    %c48 = arith.constant 48 : index
    %328 = memref.load %arg3[%c48] : memref<63xf32, #tpu.memory_space<smem>>
    %329 = vector.broadcast %328 : f32 to vector<8x128xf32>
    %330 = arith.mulf %12, %329 : vector<8x128xf32>
    %c49 = arith.constant 49 : index
    %331 = memref.load %arg3[%c49] : memref<63xf32, #tpu.memory_space<smem>>
    %332 = vector.broadcast %331 : f32 to vector<8x128xf32>
    %333 = arith.mulf %13, %332 : vector<8x128xf32>
    %c50 = arith.constant 50 : index
    %334 = memref.load %arg3[%c50] : memref<63xf32, #tpu.memory_space<smem>>
    %335 = vector.broadcast %334 : f32 to vector<8x128xf32>
    %336 = arith.mulf %14, %335 : vector<8x128xf32>
    %c51 = arith.constant 51 : index
    %337 = memref.load %arg3[%c51] : memref<63xf32, #tpu.memory_space<smem>>
    %338 = vector.broadcast %337 : f32 to vector<8x128xf32>
    %339 = arith.mulf %15, %338 : vector<8x128xf32>
    %c52 = arith.constant 52 : index
    %340 = memref.load %arg3[%c52] : memref<63xf32, #tpu.memory_space<smem>>
    %341 = vector.broadcast %340 : f32 to vector<8x128xf32>
    %342 = arith.mulf %16, %341 : vector<8x128xf32>
    %c53 = arith.constant 53 : index
    %343 = memref.load %arg3[%c53] : memref<63xf32, #tpu.memory_space<smem>>
    %344 = vector.broadcast %343 : f32 to vector<8x128xf32>
    %345 = arith.mulf %17, %344 : vector<8x128xf32>
    %346 = arith.addf %321, %324 : vector<8x128xf32>
    %347 = arith.addf %327, %330 : vector<8x128xf32>
    %348 = arith.addf %346, %347 : vector<8x128xf32>
    %349 = arith.addf %333, %336 : vector<8x128xf32>
    %350 = arith.addf %339, %342 : vector<8x128xf32>
    %351 = arith.addf %349, %350 : vector<8x128xf32>
    %352 = arith.addf %348, %351 : vector<8x128xf32>
    %353 = arith.addf %352, %345 : vector<8x128xf32>
    %cst_48 = arith.constant 0.000000e+00 : f32
    %354 = vector.broadcast %cst_48 : f32 to vector<8x128xf32>
    %355 = arith.select %26, %353, %354 : vector<8x128xi1>, vector<8x128xf32>
    %356 = vector.shape_cast %355 : vector<8x128xf32> to vector<1x8x128xf32>
    %cst_49 = arith.constant dense<0.000000e+00> : vector<1xf32>
    %357 = vector.multi_reduction <add>, %356, %cst_49 [1, 2] : vector<1x8x128xf32> to vector<1xf32>
    %358 = vector.shape_cast %357 : vector<1xf32> to vector<1x1x1xf32>
    %359 = vector.extract %358[0, 0, 0] : f32 from vector<1x1x1xf32>
    %360 = arith.mulf %355, %355 : vector<8x128xf32>
    %361 = vector.shape_cast %360 : vector<8x128xf32> to vector<1x8x128xf32>
    %cst_50 = arith.constant dense<0.000000e+00> : vector<1xf32>
    %362 = vector.multi_reduction <add>, %361, %cst_50 [1, 2] : vector<1x8x128xf32> to vector<1xf32>
    %363 = vector.shape_cast %362 : vector<1xf32> to vector<1x1x1xf32>
    %364 = vector.extract %363[0, 0, 0] : f32 from vector<1x1x1xf32>
    %c5_i32 = arith.constant 5 : i32
    %365 = vector.broadcast %c5_i32 : i32 to vector<1x16xi32>
    %366 = arith.cmpi eq, %27, %365 : vector<1x16xi32>
    %cst_51 = arith.constant 0.000000e+00 : f32
    %367 = vector.broadcast %359 : f32 to vector<1x16xf32>
    %368 = vector.broadcast %cst_51 : f32 to vector<1x16xf32>
    %369 = arith.select %366, %367, %368 : vector<1x16xi1>, vector<1x16xf32>
    %370 = arith.addf %318, %369 : vector<1x16xf32>
    %c13_i32 = arith.constant 13 : i32
    %371 = vector.broadcast %c13_i32 : i32 to vector<1x16xi32>
    %372 = arith.cmpi eq, %27, %371 : vector<1x16xi32>
    %cst_52 = arith.constant 0.000000e+00 : f32
    %373 = vector.broadcast %364 : f32 to vector<1x16xf32>
    %374 = vector.broadcast %cst_52 : f32 to vector<1x16xf32>
    %375 = arith.select %372, %373, %374 : vector<1x16xi1>, vector<1x16xf32>
    %376 = arith.addf %370, %375 : vector<1x16xf32>
    %c54 = arith.constant 54 : index
    %377 = memref.load %arg3[%c54] : memref<63xf32, #tpu.memory_space<smem>>
    %378 = vector.broadcast %377 : f32 to vector<8x128xf32>
    %379 = arith.mulf %9, %378 : vector<8x128xf32>
    %c55 = arith.constant 55 : index
    %380 = memref.load %arg3[%c55] : memref<63xf32, #tpu.memory_space<smem>>
    %381 = vector.broadcast %380 : f32 to vector<8x128xf32>
    %382 = arith.mulf %10, %381 : vector<8x128xf32>
    %c56 = arith.constant 56 : index
    %383 = memref.load %arg3[%c56] : memref<63xf32, #tpu.memory_space<smem>>
    %384 = vector.broadcast %383 : f32 to vector<8x128xf32>
    %385 = arith.mulf %11, %384 : vector<8x128xf32>
    %c57 = arith.constant 57 : index
    %386 = memref.load %arg3[%c57] : memref<63xf32, #tpu.memory_space<smem>>
    %387 = vector.broadcast %386 : f32 to vector<8x128xf32>
    %388 = arith.mulf %12, %387 : vector<8x128xf32>
    %c58 = arith.constant 58 : index
    %389 = memref.load %arg3[%c58] : memref<63xf32, #tpu.memory_space<smem>>
    %390 = vector.broadcast %389 : f32 to vector<8x128xf32>
    %391 = arith.mulf %13, %390 : vector<8x128xf32>
    %c59 = arith.constant 59 : index
    %392 = memref.load %arg3[%c59] : memref<63xf32, #tpu.memory_space<smem>>
    %393 = vector.broadcast %392 : f32 to vector<8x128xf32>
    %394 = arith.mulf %14, %393 : vector<8x128xf32>
    %c60 = arith.constant 60 : index
    %395 = memref.load %arg3[%c60] : memref<63xf32, #tpu.memory_space<smem>>
    %396 = vector.broadcast %395 : f32 to vector<8x128xf32>
    %397 = arith.mulf %15, %396 : vector<8x128xf32>
    %c61 = arith.constant 61 : index
    %398 = memref.load %arg3[%c61] : memref<63xf32, #tpu.memory_space<smem>>
    %399 = vector.broadcast %398 : f32 to vector<8x128xf32>
    %400 = arith.mulf %16, %399 : vector<8x128xf32>
    %c62 = arith.constant 62 : index
    %401 = memref.load %arg3[%c62] : memref<63xf32, #tpu.memory_space<smem>>
    %402 = vector.broadcast %401 : f32 to vector<8x128xf32>
    %403 = arith.mulf %17, %402 : vector<8x128xf32>
    %404 = arith.addf %379, %382 : vector<8x128xf32>
    %405 = arith.addf %385, %388 : vector<8x128xf32>
    %406 = arith.addf %404, %405 : vector<8x128xf32>
    %407 = arith.addf %391, %394 : vector<8x128xf32>
    %408 = arith.addf %397, %400 : vector<8x128xf32>
    %409 = arith.addf %407, %408 : vector<8x128xf32>
    %410 = arith.addf %406, %409 : vector<8x128xf32>
    %411 = arith.addf %410, %403 : vector<8x128xf32>
    %cst_53 = arith.constant 0.000000e+00 : f32
    %412 = vector.broadcast %cst_53 : f32 to vector<8x128xf32>
    %413 = arith.select %26, %411, %412 : vector<8x128xi1>, vector<8x128xf32>
    %414 = vector.shape_cast %413 : vector<8x128xf32> to vector<1x8x128xf32>
    %cst_54 = arith.constant dense<0.000000e+00> : vector<1xf32>
    %415 = vector.multi_reduction <add>, %414, %cst_54 [1, 2] : vector<1x8x128xf32> to vector<1xf32>
    %416 = vector.shape_cast %415 : vector<1xf32> to vector<1x1x1xf32>
    %417 = vector.extract %416[0, 0, 0] : f32 from vector<1x1x1xf32>
    %418 = arith.mulf %413, %413 : vector<8x128xf32>
    %419 = vector.shape_cast %418 : vector<8x128xf32> to vector<1x8x128xf32>
    %cst_55 = arith.constant dense<0.000000e+00> : vector<1xf32>
    %420 = vector.multi_reduction <add>, %419, %cst_55 [1, 2] : vector<1x8x128xf32> to vector<1xf32>
    %421 = vector.shape_cast %420 : vector<1xf32> to vector<1x1x1xf32>
    %422 = vector.extract %421[0, 0, 0] : f32 from vector<1x1x1xf32>
    %c6_i32 = arith.constant 6 : i32
    %423 = vector.broadcast %c6_i32 : i32 to vector<1x16xi32>
    %424 = arith.cmpi eq, %27, %423 : vector<1x16xi32>
    %cst_56 = arith.constant 0.000000e+00 : f32
    %425 = vector.broadcast %417 : f32 to vector<1x16xf32>
    %426 = vector.broadcast %cst_56 : f32 to vector<1x16xf32>
    %427 = arith.select %424, %425, %426 : vector<1x16xi1>, vector<1x16xf32>
    %428 = arith.addf %376, %427 : vector<1x16xf32>
    %c14_i32 = arith.constant 14 : i32
    %429 = vector.broadcast %c14_i32 : i32 to vector<1x16xi32>
    %430 = arith.cmpi eq, %27, %429 : vector<1x16xi32>
    %cst_57 = arith.constant 0.000000e+00 : f32
    %431 = vector.broadcast %422 : f32 to vector<1x16xf32>
    %432 = vector.broadcast %cst_57 : f32 to vector<1x16xf32>
    %433 = arith.select %430, %431, %432 : vector<1x16xi1>, vector<1x16xf32>
    %434 = arith.addf %428, %433 : vector<1x16xf32>
    %435 = tpu.iota {dimensions = array<i32: 0>} : vector<8x128xi32>
    %436 = vector.broadcast %0 : i32 to vector<8x128xi32>
    %437 = arith.addi %435, %436 : vector<8x128xi32>
    %438 = tpu.iota {dimensions = array<i32: 1>} : vector<8x128xi32>
    %c2_i32_58 = arith.constant 2 : i32
    %439 = vector.broadcast %c2_i32_58 : i32 to vector<8x128xi32>
    %440 = arith.muli %439, %437 : vector<8x128xi32>
    %c-1_i32 = arith.constant -1 : i32
    %441 = vector.broadcast %c-1_i32 : i32 to vector<8x128xi32>
    %442 = arith.addi %440, %441 : vector<8x128xi32>
    %c0_i32_59 = arith.constant 0 : i32
    %443 = vector.broadcast %c0_i32_59 : i32 to vector<8x128xi32>
    %444 = arith.cmpi sge, %442, %443 : vector<8x128xi32>
    %c16_i32 = arith.constant 16 : i32
    %445 = vector.broadcast %c16_i32 : i32 to vector<8x128xi32>
    %446 = arith.cmpi slt, %442, %445 : vector<8x128xi32>
    %447 = arith.andi %444, %446 : vector<8x128xi1>
    %c2_i32_60 = arith.constant 2 : i32
    %448 = vector.broadcast %c2_i32_60 : i32 to vector<8x128xi32>
    %449 = arith.muli %448, %438 : vector<8x128xi32>
    %c-1_i32_61 = arith.constant -1 : i32
    %450 = vector.broadcast %c-1_i32_61 : i32 to vector<8x128xi32>
    %451 = arith.addi %449, %450 : vector<8x128xi32>
    %c0_i32_62 = arith.constant 0 : i32
    %452 = vector.broadcast %c0_i32_62 : i32 to vector<8x128xi32>
    %453 = arith.cmpi sge, %451, %452 : vector<8x128xi32>
    %c16_i32_63 = arith.constant 16 : i32
    %454 = vector.broadcast %c16_i32_63 : i32 to vector<8x128xi32>
    %455 = arith.cmpi slt, %451, %454 : vector<8x128xi32>
    %456 = arith.andi %453, %455 : vector<8x128xi1>
    %457 = arith.andi %447, %456 : vector<8x128xi1>
    %cst_64 = arith.constant 0xFF800000 : f32
    %458 = vector.broadcast %cst_64 : f32 to vector<8x128xf32>
    %459 = arith.select %457, %9, %458 : vector<8x128xi1>, vector<8x128xf32>
    %c2_i32_65 = arith.constant 2 : i32
    %460 = vector.broadcast %c2_i32_65 : i32 to vector<8x128xi32>
    %461 = arith.muli %460, %437 : vector<8x128xi32>
    %c-1_i32_66 = arith.constant -1 : i32
    %462 = vector.broadcast %c-1_i32_66 : i32 to vector<8x128xi32>
    %463 = arith.addi %461, %462 : vector<8x128xi32>
    %c0_i32_67 = arith.constant 0 : i32
    %464 = vector.broadcast %c0_i32_67 : i32 to vector<8x128xi32>
    %465 = arith.cmpi sge, %463, %464 : vector<8x128xi32>
    %c16_i32_68 = arith.constant 16 : i32
    %466 = vector.broadcast %c16_i32_68 : i32 to vector<8x128xi32>
    %467 = arith.cmpi slt, %463, %466 : vector<8x128xi32>
    %468 = arith.andi %465, %467 : vector<8x128xi1>
    %cst_69 = arith.constant 0xFF800000 : f32
    %469 = vector.broadcast %cst_69 : f32 to vector<8x128xf32>
    %470 = arith.select %468, %10, %469 : vector<8x128xi1>, vector<8x128xf32>
    %471 = arith.maximumf %459, %470 : vector<8x128xf32>
    %c2_i32_70 = arith.constant 2 : i32
    %472 = vector.broadcast %c2_i32_70 : i32 to vector<8x128xi32>
    %473 = arith.muli %472, %437 : vector<8x128xi32>
    %c-1_i32_71 = arith.constant -1 : i32
    %474 = vector.broadcast %c-1_i32_71 : i32 to vector<8x128xi32>
    %475 = arith.addi %473, %474 : vector<8x128xi32>
    %c0_i32_72 = arith.constant 0 : i32
    %476 = vector.broadcast %c0_i32_72 : i32 to vector<8x128xi32>
    %477 = arith.cmpi sge, %475, %476 : vector<8x128xi32>
    %c16_i32_73 = arith.constant 16 : i32
    %478 = vector.broadcast %c16_i32_73 : i32 to vector<8x128xi32>
    %479 = arith.cmpi slt, %475, %478 : vector<8x128xi32>
    %480 = arith.andi %477, %479 : vector<8x128xi1>
    %cst_74 = arith.constant 0xFF800000 : f32
    %481 = vector.broadcast %cst_74 : f32 to vector<8x128xf32>
    %482 = arith.select %480, %11, %481 : vector<8x128xi1>, vector<8x128xf32>
    %483 = arith.maximumf %471, %482 : vector<8x128xf32>
    %c2_i32_75 = arith.constant 2 : i32
    %484 = vector.broadcast %c2_i32_75 : i32 to vector<8x128xi32>
    %485 = arith.muli %484, %438 : vector<8x128xi32>
    %c-1_i32_76 = arith.constant -1 : i32
    %486 = vector.broadcast %c-1_i32_76 : i32 to vector<8x128xi32>
    %487 = arith.addi %485, %486 : vector<8x128xi32>
    %c0_i32_77 = arith.constant 0 : i32
    %488 = vector.broadcast %c0_i32_77 : i32 to vector<8x128xi32>
    %489 = arith.cmpi sge, %487, %488 : vector<8x128xi32>
    %c16_i32_78 = arith.constant 16 : i32
    %490 = vector.broadcast %c16_i32_78 : i32 to vector<8x128xi32>
    %491 = arith.cmpi slt, %487, %490 : vector<8x128xi32>
    %492 = arith.andi %489, %491 : vector<8x128xi1>
    %cst_79 = arith.constant 0xFF800000 : f32
    %493 = vector.broadcast %cst_79 : f32 to vector<8x128xf32>
    %494 = arith.select %492, %12, %493 : vector<8x128xi1>, vector<8x128xf32>
    %495 = arith.maximumf %483, %494 : vector<8x128xf32>
    %496 = arith.maximumf %495, %13 : vector<8x128xf32>
    %497 = arith.maximumf %496, %14 : vector<8x128xf32>
    %c2_i32_80 = arith.constant 2 : i32
    %498 = vector.broadcast %c2_i32_80 : i32 to vector<8x128xi32>
    %499 = arith.muli %498, %438 : vector<8x128xi32>
    %c-1_i32_81 = arith.constant -1 : i32
    %500 = vector.broadcast %c-1_i32_81 : i32 to vector<8x128xi32>
    %501 = arith.addi %499, %500 : vector<8x128xi32>
    %c0_i32_82 = arith.constant 0 : i32
    %502 = vector.broadcast %c0_i32_82 : i32 to vector<8x128xi32>
    %503 = arith.cmpi sge, %501, %502 : vector<8x128xi32>
    %c16_i32_83 = arith.constant 16 : i32
    %504 = vector.broadcast %c16_i32_83 : i32 to vector<8x128xi32>
    %505 = arith.cmpi slt, %501, %504 : vector<8x128xi32>
    %506 = arith.andi %503, %505 : vector<8x128xi1>
    %cst_84 = arith.constant 0xFF800000 : f32
    %507 = vector.broadcast %cst_84 : f32 to vector<8x128xf32>
    %508 = arith.select %506, %15, %507 : vector<8x128xi1>, vector<8x128xf32>
    %509 = arith.maximumf %497, %508 : vector<8x128xf32>
    %510 = arith.maximumf %509, %16 : vector<8x128xf32>
    %511 = arith.maximumf %510, %17 : vector<8x128xf32>
    %cst_85 = arith.constant 0.000000e+00 : f32
    %512 = vector.broadcast %cst_85 : f32 to vector<8x128xf32>
    %513 = arith.select %26, %511, %512 : vector<8x128xi1>, vector<8x128xf32>
    %514 = vector.shape_cast %513 : vector<8x128xf32> to vector<1x8x128xf32>
    %cst_86 = arith.constant dense<0.000000e+00> : vector<1xf32>
    %515 = vector.multi_reduction <add>, %514, %cst_86 [1, 2] : vector<1x8x128xf32> to vector<1xf32>
    %516 = vector.shape_cast %515 : vector<1xf32> to vector<1x1x1xf32>
    %517 = vector.extract %516[0, 0, 0] : f32 from vector<1x1x1xf32>
    %518 = arith.mulf %513, %513 : vector<8x128xf32>
    %519 = vector.shape_cast %518 : vector<8x128xf32> to vector<1x8x128xf32>
    %cst_87 = arith.constant dense<0.000000e+00> : vector<1xf32>
    %520 = vector.multi_reduction <add>, %519, %cst_87 [1, 2] : vector<1x8x128xf32> to vector<1xf32>
    %521 = vector.shape_cast %520 : vector<1xf32> to vector<1x1x1xf32>
    %522 = vector.extract %521[0, 0, 0] : f32 from vector<1x1x1xf32>
    %c7_i32 = arith.constant 7 : i32
    %523 = vector.broadcast %c7_i32 : i32 to vector<1x16xi32>
    %524 = arith.cmpi eq, %27, %523 : vector<1x16xi32>
    %cst_88 = arith.constant 0.000000e+00 : f32
    %525 = vector.broadcast %517 : f32 to vector<1x16xf32>
    %526 = vector.broadcast %cst_88 : f32 to vector<1x16xf32>
    %527 = arith.select %524, %525, %526 : vector<1x16xi1>, vector<1x16xf32>
    %528 = arith.addf %434, %527 : vector<1x16xf32>
    %c15_i32 = arith.constant 15 : i32
    %529 = vector.broadcast %c15_i32 : i32 to vector<1x16xi32>
    %530 = arith.cmpi eq, %27, %529 : vector<1x16xi32>
    %cst_89 = arith.constant 0.000000e+00 : f32
    %531 = vector.broadcast %522 : f32 to vector<1x16xf32>
    %532 = vector.broadcast %cst_89 : f32 to vector<1x16xf32>
    %533 = arith.select %530, %531, %532 : vector<1x16xi1>, vector<1x16xf32>
    %534 = arith.addf %528, %533 : vector<1x16xf32>
    %c0_90 = arith.constant 0 : index
    %c0_91 = arith.constant 0 : index
    %c0_92 = arith.constant 0 : index
    %c0_93 = arith.constant 0 : index
    %535 = vector.load %arg4[%c0_90, %c0_91, %c0_92, %c0_93] : memref<1x1x1x16xf32, #tpu.memory_space<vmem>>, vector<1x1x1x16xf32>
    %536 = vector.shape_cast %535 : vector<1x1x1x16xf32> to vector<1x16xf32>
    %537 = vector.shape_cast %534 : vector<1x16xf32> to vector<1x1x1x16xf32>
    tpu.vector_store %arg4[%c0_90, %c0_91, %c0_92, %c0_93], %537 {strides = array<i32>} : memref<1x1x1x16xf32, #tpu.memory_space<vmem>>, vector<1x1x1x16xf32>,
    return
  }
  func.func @transform_0(%arg0: i32, %arg1: i32) -> (i32, i32, i32, i32, i32) {
    %c0_i32 = arith.constant 0 : i32
    %c0_i32_0 = arith.constant 0 : i32
    %c0_i32_1 = arith.constant 0 : i32
    %c0_i32_2 = arith.constant 0 : i32
    return %arg0, %arg1, %c0_i32, %c0_i32_0, %c0_i32_1 : i32, i32, i32, i32, i32
  }
  func.func @transform_1(%arg0: i32, %arg1: i32) -> i32 {
    %c0_i32 = arith.constant 0 : i32
    %c0_i32_0 = arith.constant 0 : i32
    return %c0_i32 : i32
  }
  func.func @transform_2(%arg0: i32, %arg1: i32) -> (i32, i32, i32, i32) {
    %c0_i32 = arith.constant 0 : i32
    %c0_i32_0 = arith.constant 0 : i32
    %c0_i32_1 = arith.constant 0 : i32
    return %arg0, %arg1, %c0_i32, %c0_i32_0 : i32, i32, i32, i32
  }
}

module attributes {stable_mosaic.version = 11 : i64} {
  func.func @_apply_kernel(%arg0: i32, %arg1: i32, %arg2: memref<1x1x4x9x129xf32, #tpu.memory_space<vmem>>, %arg3: memref<63xf32, #tpu.memory_space<smem>>, %arg4: memref<8xf32, #tpu.memory_space<smem>>, %arg5: memref<8xf32, #tpu.memory_space<smem>>, %arg6: memref<1x8x8x128xf32, #tpu.memory_space<vmem>>) attributes {dimension_semantics = [#tpu.dimension_semantics<parallel>, #tpu.dimension_semantics<parallel>], iteration_bounds = array<i64: 2, 1>, scalar_prefetch = 0 : i64, scratch_operands = 0 : i64, tpu.core_type = #tpu.core_type<tc>, window_params = [{transform_indices = @transform_0, window_bounds = array<i64: 1, 1, 4, 9, 129>}, {transform_indices = @transform_1, window_bounds = array<i64: 63>}, {transform_indices = @transform_2, window_bounds = array<i64: 8>}, {transform_indices = @transform_3, window_bounds = array<i64: 8>}, {transform_indices = @transform_4, window_bounds = array<i64: 1, 8, 8, 128>}]} {
    %c8_i32 = arith.constant 8 : i32
    %0 = arith.muli %arg1, %c8_i32 : i32
    %c0 = arith.constant 0 : index
    %c0_0 = arith.constant 0 : index
    %c0_1 = arith.constant 0 : index
    %c0_2 = arith.constant 0 : index
    %c0_3 = arith.constant 0 : index
    %1 = vector.load %arg2[%c0, %c0_0, %c0_1, %c0_2, %c0_3] : memref<1x1x4x9x129xf32, #tpu.memory_space<vmem>>, vector<1x1x1x9x129xf32>
    %2 = vector.shape_cast %1 : vector<1x1x1x9x129xf32> to vector<9x129xf32>
    %c0_4 = arith.constant 0 : index
    %c0_5 = arith.constant 0 : index
    %c1 = arith.constant 1 : index
    %c0_6 = arith.constant 0 : index
    %c0_7 = arith.constant 0 : index
    %3 = vector.load %arg2[%c0_4, %c0_5, %c1, %c0_6, %c0_7] : memref<1x1x4x9x129xf32, #tpu.memory_space<vmem>>, vector<1x1x1x9x129xf32>
    %4 = vector.shape_cast %3 : vector<1x1x1x9x129xf32> to vector<9x129xf32>
    %c0_8 = arith.constant 0 : index
    %c0_9 = arith.constant 0 : index
    %c2 = arith.constant 2 : index
    %c0_10 = arith.constant 0 : index
    %c0_11 = arith.constant 0 : index
    %5 = vector.load %arg2[%c0_8, %c0_9, %c2, %c0_10, %c0_11] : memref<1x1x4x9x129xf32, #tpu.memory_space<vmem>>, vector<1x1x1x9x129xf32>
    %6 = vector.shape_cast %5 : vector<1x1x1x9x129xf32> to vector<9x129xf32>
    %c0_12 = arith.constant 0 : index
    %c0_13 = arith.constant 0 : index
    %c3 = arith.constant 3 : index
    %c0_14 = arith.constant 0 : index
    %c0_15 = arith.constant 0 : index
    %7 = vector.load %arg2[%c0_12, %c0_13, %c3, %c0_14, %c0_15] : memref<1x1x4x9x129xf32, #tpu.memory_space<vmem>>, vector<1x1x1x9x129xf32>
    %8 = vector.shape_cast %7 : vector<1x1x1x9x129xf32> to vector<9x129xf32>
    %9 = vector.extract_strided_slice %2 {offsets = [0, 0], sizes = [8, 128], strides = [1, 1]} : vector<9x129xf32> to vector<8x128xf32>
    %10 = vector.extract_strided_slice %4 {offsets = [0, 0], sizes = [8, 128], strides = [1, 1]} : vector<9x129xf32> to vector<8x128xf32>
    %11 = vector.extract_strided_slice %2 {offsets = [0, 1], sizes = [8, 128], strides = [1, 1]} : vector<9x129xf32> to vector<8x128xf32>
    %12 = vector.extract_strided_slice %6 {offsets = [0, 0], sizes = [8, 128], strides = [1, 1]} : vector<9x129xf32> to vector<8x128xf32>
    %13 = vector.extract_strided_slice %8 {offsets = [0, 0], sizes = [8, 128], strides = [1, 1]} : vector<9x129xf32> to vector<8x128xf32>
    %14 = vector.extract_strided_slice %6 {offsets = [0, 1], sizes = [8, 128], strides = [1, 1]} : vector<9x129xf32> to vector<8x128xf32>
    %15 = vector.extract_strided_slice %2 {offsets = [1, 0], sizes = [8, 128], strides = [1, 1]} : vector<9x129xf32> to vector<8x128xf32>
    %16 = vector.extract_strided_slice %4 {offsets = [1, 0], sizes = [8, 128], strides = [1, 1]} : vector<9x129xf32> to vector<8x128xf32>
    %17 = vector.extract_strided_slice %2 {offsets = [1, 1], sizes = [8, 128], strides = [1, 1]} : vector<9x129xf32> to vector<8x128xf32>
    %c0_16 = arith.constant 0 : index
    %18 = memref.load %arg3[%c0_16] : memref<63xf32, #tpu.memory_space<smem>>
    %19 = vector.broadcast %18 : f32 to vector<8x128xf32>
    %20 = arith.mulf %9, %19 : vector<8x128xf32>
    %c1_17 = arith.constant 1 : index
    %21 = memref.load %arg3[%c1_17] : memref<63xf32, #tpu.memory_space<smem>>
    %22 = vector.broadcast %21 : f32 to vector<8x128xf32>
    %23 = arith.mulf %10, %22 : vector<8x128xf32>
    %c2_18 = arith.constant 2 : index
    %24 = memref.load %arg3[%c2_18] : memref<63xf32, #tpu.memory_space<smem>>
    %25 = vector.broadcast %24 : f32 to vector<8x128xf32>
    %26 = arith.mulf %11, %25 : vector<8x128xf32>
    %c3_19 = arith.constant 3 : index
    %27 = memref.load %arg3[%c3_19] : memref<63xf32, #tpu.memory_space<smem>>
    %28 = vector.broadcast %27 : f32 to vector<8x128xf32>
    %29 = arith.mulf %12, %28 : vector<8x128xf32>
    %c4 = arith.constant 4 : index
    %30 = memref.load %arg3[%c4] : memref<63xf32, #tpu.memory_space<smem>>
    %31 = vector.broadcast %30 : f32 to vector<8x128xf32>
    %32 = arith.mulf %13, %31 : vector<8x128xf32>
    %c5 = arith.constant 5 : index
    %33 = memref.load %arg3[%c5] : memref<63xf32, #tpu.memory_space<smem>>
    %34 = vector.broadcast %33 : f32 to vector<8x128xf32>
    %35 = arith.mulf %14, %34 : vector<8x128xf32>
    %c6 = arith.constant 6 : index
    %36 = memref.load %arg3[%c6] : memref<63xf32, #tpu.memory_space<smem>>
    %37 = vector.broadcast %36 : f32 to vector<8x128xf32>
    %38 = arith.mulf %15, %37 : vector<8x128xf32>
    %c7 = arith.constant 7 : index
    %39 = memref.load %arg3[%c7] : memref<63xf32, #tpu.memory_space<smem>>
    %40 = vector.broadcast %39 : f32 to vector<8x128xf32>
    %41 = arith.mulf %16, %40 : vector<8x128xf32>
    %c8 = arith.constant 8 : index
    %42 = memref.load %arg3[%c8] : memref<63xf32, #tpu.memory_space<smem>>
    %43 = vector.broadcast %42 : f32 to vector<8x128xf32>
    %44 = arith.mulf %17, %43 : vector<8x128xf32>
    %45 = arith.addf %20, %23 : vector<8x128xf32>
    %46 = arith.addf %26, %29 : vector<8x128xf32>
    %47 = arith.addf %45, %46 : vector<8x128xf32>
    %48 = arith.addf %32, %35 : vector<8x128xf32>
    %49 = arith.addf %38, %41 : vector<8x128xf32>
    %50 = arith.addf %48, %49 : vector<8x128xf32>
    %51 = arith.addf %47, %50 : vector<8x128xf32>
    %52 = arith.addf %51, %44 : vector<8x128xf32>
    %c0_20 = arith.constant 0 : index
    %53 = memref.load %arg5[%c0_20] : memref<8xf32, #tpu.memory_space<smem>>
    %54 = vector.broadcast %53 : f32 to vector<8x128xf32>
    %55 = arith.addf %52, %54 : vector<8x128xf32>
    %cst = arith.constant 0.000000e+00 : f32
    %56 = vector.broadcast %cst : f32 to vector<8x128xf32>
    %57 = arith.maximumf %55, %56 : vector<8x128xf32>
    %c0_21 = arith.constant 0 : index
    %c0_22 = arith.constant 0 : index
    %c0_23 = arith.constant 0 : index
    %c0_24 = arith.constant 0 : index
    %58 = vector.load %arg6[%c0_21, %c0_22, %c0_23, %c0_24] : memref<1x8x8x128xf32, #tpu.memory_space<vmem>>, vector<1x1x8x128xf32>
    %59 = vector.shape_cast %58 : vector<1x1x8x128xf32> to vector<8x128xf32>
    %60 = vector.shape_cast %57 : vector<8x128xf32> to vector<1x1x8x128xf32>
    tpu.vector_store %arg6[%c0_21, %c0_22, %c0_23, %c0_24], %60 {strides = array<i32>} : memref<1x8x8x128xf32, #tpu.memory_space<vmem>>, vector<1x1x8x128xf32>,
    %c9 = arith.constant 9 : index
    %61 = memref.load %arg3[%c9] : memref<63xf32, #tpu.memory_space<smem>>
    %62 = vector.broadcast %61 : f32 to vector<8x128xf32>
    %63 = arith.mulf %9, %62 : vector<8x128xf32>
    %c10 = arith.constant 10 : index
    %64 = memref.load %arg3[%c10] : memref<63xf32, #tpu.memory_space<smem>>
    %65 = vector.broadcast %64 : f32 to vector<8x128xf32>
    %66 = arith.mulf %10, %65 : vector<8x128xf32>
    %c11 = arith.constant 11 : index
    %67 = memref.load %arg3[%c11] : memref<63xf32, #tpu.memory_space<smem>>
    %68 = vector.broadcast %67 : f32 to vector<8x128xf32>
    %69 = arith.mulf %11, %68 : vector<8x128xf32>
    %c12 = arith.constant 12 : index
    %70 = memref.load %arg3[%c12] : memref<63xf32, #tpu.memory_space<smem>>
    %71 = vector.broadcast %70 : f32 to vector<8x128xf32>
    %72 = arith.mulf %12, %71 : vector<8x128xf32>
    %c13 = arith.constant 13 : index
    %73 = memref.load %arg3[%c13] : memref<63xf32, #tpu.memory_space<smem>>
    %74 = vector.broadcast %73 : f32 to vector<8x128xf32>
    %75 = arith.mulf %13, %74 : vector<8x128xf32>
    %c14 = arith.constant 14 : index
    %76 = memref.load %arg3[%c14] : memref<63xf32, #tpu.memory_space<smem>>
    %77 = vector.broadcast %76 : f32 to vector<8x128xf32>
    %78 = arith.mulf %14, %77 : vector<8x128xf32>
    %c15 = arith.constant 15 : index
    %79 = memref.load %arg3[%c15] : memref<63xf32, #tpu.memory_space<smem>>
    %80 = vector.broadcast %79 : f32 to vector<8x128xf32>
    %81 = arith.mulf %15, %80 : vector<8x128xf32>
    %c16 = arith.constant 16 : index
    %82 = memref.load %arg3[%c16] : memref<63xf32, #tpu.memory_space<smem>>
    %83 = vector.broadcast %82 : f32 to vector<8x128xf32>
    %84 = arith.mulf %16, %83 : vector<8x128xf32>
    %c17 = arith.constant 17 : index
    %85 = memref.load %arg3[%c17] : memref<63xf32, #tpu.memory_space<smem>>
    %86 = vector.broadcast %85 : f32 to vector<8x128xf32>
    %87 = arith.mulf %17, %86 : vector<8x128xf32>
    %88 = arith.addf %63, %66 : vector<8x128xf32>
    %89 = arith.addf %69, %72 : vector<8x128xf32>
    %90 = arith.addf %88, %89 : vector<8x128xf32>
    %91 = arith.addf %75, %78 : vector<8x128xf32>
    %92 = arith.addf %81, %84 : vector<8x128xf32>
    %93 = arith.addf %91, %92 : vector<8x128xf32>
    %94 = arith.addf %90, %93 : vector<8x128xf32>
    %95 = arith.addf %94, %87 : vector<8x128xf32>
    %c1_25 = arith.constant 1 : index
    %96 = memref.load %arg5[%c1_25] : memref<8xf32, #tpu.memory_space<smem>>
    %97 = vector.broadcast %96 : f32 to vector<8x128xf32>
    %98 = arith.addf %95, %97 : vector<8x128xf32>
    %cst_26 = arith.constant 0.000000e+00 : f32
    %99 = vector.broadcast %cst_26 : f32 to vector<8x128xf32>
    %100 = arith.maximumf %98, %99 : vector<8x128xf32>
    %c0_27 = arith.constant 0 : index
    %c1_28 = arith.constant 1 : index
    %c0_29 = arith.constant 0 : index
    %c0_30 = arith.constant 0 : index
    %101 = vector.load %arg6[%c0_27, %c1_28, %c0_29, %c0_30] : memref<1x8x8x128xf32, #tpu.memory_space<vmem>>, vector<1x1x8x128xf32>
    %102 = vector.shape_cast %101 : vector<1x1x8x128xf32> to vector<8x128xf32>
    %103 = vector.shape_cast %100 : vector<8x128xf32> to vector<1x1x8x128xf32>
    tpu.vector_store %arg6[%c0_27, %c1_28, %c0_29, %c0_30], %103 {strides = array<i32>} : memref<1x8x8x128xf32, #tpu.memory_space<vmem>>, vector<1x1x8x128xf32>,
    %c18 = arith.constant 18 : index
    %104 = memref.load %arg3[%c18] : memref<63xf32, #tpu.memory_space<smem>>
    %105 = vector.broadcast %104 : f32 to vector<8x128xf32>
    %106 = arith.mulf %9, %105 : vector<8x128xf32>
    %c19 = arith.constant 19 : index
    %107 = memref.load %arg3[%c19] : memref<63xf32, #tpu.memory_space<smem>>
    %108 = vector.broadcast %107 : f32 to vector<8x128xf32>
    %109 = arith.mulf %10, %108 : vector<8x128xf32>
    %c20 = arith.constant 20 : index
    %110 = memref.load %arg3[%c20] : memref<63xf32, #tpu.memory_space<smem>>
    %111 = vector.broadcast %110 : f32 to vector<8x128xf32>
    %112 = arith.mulf %11, %111 : vector<8x128xf32>
    %c21 = arith.constant 21 : index
    %113 = memref.load %arg3[%c21] : memref<63xf32, #tpu.memory_space<smem>>
    %114 = vector.broadcast %113 : f32 to vector<8x128xf32>
    %115 = arith.mulf %12, %114 : vector<8x128xf32>
    %c22 = arith.constant 22 : index
    %116 = memref.load %arg3[%c22] : memref<63xf32, #tpu.memory_space<smem>>
    %117 = vector.broadcast %116 : f32 to vector<8x128xf32>
    %118 = arith.mulf %13, %117 : vector<8x128xf32>
    %c23 = arith.constant 23 : index
    %119 = memref.load %arg3[%c23] : memref<63xf32, #tpu.memory_space<smem>>
    %120 = vector.broadcast %119 : f32 to vector<8x128xf32>
    %121 = arith.mulf %14, %120 : vector<8x128xf32>
    %c24 = arith.constant 24 : index
    %122 = memref.load %arg3[%c24] : memref<63xf32, #tpu.memory_space<smem>>
    %123 = vector.broadcast %122 : f32 to vector<8x128xf32>
    %124 = arith.mulf %15, %123 : vector<8x128xf32>
    %c25 = arith.constant 25 : index
    %125 = memref.load %arg3[%c25] : memref<63xf32, #tpu.memory_space<smem>>
    %126 = vector.broadcast %125 : f32 to vector<8x128xf32>
    %127 = arith.mulf %16, %126 : vector<8x128xf32>
    %c26 = arith.constant 26 : index
    %128 = memref.load %arg3[%c26] : memref<63xf32, #tpu.memory_space<smem>>
    %129 = vector.broadcast %128 : f32 to vector<8x128xf32>
    %130 = arith.mulf %17, %129 : vector<8x128xf32>
    %131 = arith.addf %106, %109 : vector<8x128xf32>
    %132 = arith.addf %112, %115 : vector<8x128xf32>
    %133 = arith.addf %131, %132 : vector<8x128xf32>
    %134 = arith.addf %118, %121 : vector<8x128xf32>
    %135 = arith.addf %124, %127 : vector<8x128xf32>
    %136 = arith.addf %134, %135 : vector<8x128xf32>
    %137 = arith.addf %133, %136 : vector<8x128xf32>
    %138 = arith.addf %137, %130 : vector<8x128xf32>
    %c2_31 = arith.constant 2 : index
    %139 = memref.load %arg5[%c2_31] : memref<8xf32, #tpu.memory_space<smem>>
    %140 = vector.broadcast %139 : f32 to vector<8x128xf32>
    %141 = arith.addf %138, %140 : vector<8x128xf32>
    %cst_32 = arith.constant 0.000000e+00 : f32
    %142 = vector.broadcast %cst_32 : f32 to vector<8x128xf32>
    %143 = arith.maximumf %141, %142 : vector<8x128xf32>
    %c0_33 = arith.constant 0 : index
    %c2_34 = arith.constant 2 : index
    %c0_35 = arith.constant 0 : index
    %c0_36 = arith.constant 0 : index
    %144 = vector.load %arg6[%c0_33, %c2_34, %c0_35, %c0_36] : memref<1x8x8x128xf32, #tpu.memory_space<vmem>>, vector<1x1x8x128xf32>
    %145 = vector.shape_cast %144 : vector<1x1x8x128xf32> to vector<8x128xf32>
    %146 = vector.shape_cast %143 : vector<8x128xf32> to vector<1x1x8x128xf32>
    tpu.vector_store %arg6[%c0_33, %c2_34, %c0_35, %c0_36], %146 {strides = array<i32>} : memref<1x8x8x128xf32, #tpu.memory_space<vmem>>, vector<1x1x8x128xf32>,
    %c27 = arith.constant 27 : index
    %147 = memref.load %arg3[%c27] : memref<63xf32, #tpu.memory_space<smem>>
    %148 = vector.broadcast %147 : f32 to vector<8x128xf32>
    %149 = arith.mulf %9, %148 : vector<8x128xf32>
    %c28 = arith.constant 28 : index
    %150 = memref.load %arg3[%c28] : memref<63xf32, #tpu.memory_space<smem>>
    %151 = vector.broadcast %150 : f32 to vector<8x128xf32>
    %152 = arith.mulf %10, %151 : vector<8x128xf32>
    %c29 = arith.constant 29 : index
    %153 = memref.load %arg3[%c29] : memref<63xf32, #tpu.memory_space<smem>>
    %154 = vector.broadcast %153 : f32 to vector<8x128xf32>
    %155 = arith.mulf %11, %154 : vector<8x128xf32>
    %c30 = arith.constant 30 : index
    %156 = memref.load %arg3[%c30] : memref<63xf32, #tpu.memory_space<smem>>
    %157 = vector.broadcast %156 : f32 to vector<8x128xf32>
    %158 = arith.mulf %12, %157 : vector<8x128xf32>
    %c31 = arith.constant 31 : index
    %159 = memref.load %arg3[%c31] : memref<63xf32, #tpu.memory_space<smem>>
    %160 = vector.broadcast %159 : f32 to vector<8x128xf32>
    %161 = arith.mulf %13, %160 : vector<8x128xf32>
    %c32 = arith.constant 32 : index
    %162 = memref.load %arg3[%c32] : memref<63xf32, #tpu.memory_space<smem>>
    %163 = vector.broadcast %162 : f32 to vector<8x128xf32>
    %164 = arith.mulf %14, %163 : vector<8x128xf32>
    %c33 = arith.constant 33 : index
    %165 = memref.load %arg3[%c33] : memref<63xf32, #tpu.memory_space<smem>>
    %166 = vector.broadcast %165 : f32 to vector<8x128xf32>
    %167 = arith.mulf %15, %166 : vector<8x128xf32>
    %c34 = arith.constant 34 : index
    %168 = memref.load %arg3[%c34] : memref<63xf32, #tpu.memory_space<smem>>
    %169 = vector.broadcast %168 : f32 to vector<8x128xf32>
    %170 = arith.mulf %16, %169 : vector<8x128xf32>
    %c35 = arith.constant 35 : index
    %171 = memref.load %arg3[%c35] : memref<63xf32, #tpu.memory_space<smem>>
    %172 = vector.broadcast %171 : f32 to vector<8x128xf32>
    %173 = arith.mulf %17, %172 : vector<8x128xf32>
    %174 = arith.addf %149, %152 : vector<8x128xf32>
    %175 = arith.addf %155, %158 : vector<8x128xf32>
    %176 = arith.addf %174, %175 : vector<8x128xf32>
    %177 = arith.addf %161, %164 : vector<8x128xf32>
    %178 = arith.addf %167, %170 : vector<8x128xf32>
    %179 = arith.addf %177, %178 : vector<8x128xf32>
    %180 = arith.addf %176, %179 : vector<8x128xf32>
    %181 = arith.addf %180, %173 : vector<8x128xf32>
    %c3_37 = arith.constant 3 : index
    %182 = memref.load %arg5[%c3_37] : memref<8xf32, #tpu.memory_space<smem>>
    %183 = vector.broadcast %182 : f32 to vector<8x128xf32>
    %184 = arith.addf %181, %183 : vector<8x128xf32>
    %cst_38 = arith.constant 0.000000e+00 : f32
    %185 = vector.broadcast %cst_38 : f32 to vector<8x128xf32>
    %186 = arith.maximumf %184, %185 : vector<8x128xf32>
    %c0_39 = arith.constant 0 : index
    %c3_40 = arith.constant 3 : index
    %c0_41 = arith.constant 0 : index
    %c0_42 = arith.constant 0 : index
    %187 = vector.load %arg6[%c0_39, %c3_40, %c0_41, %c0_42] : memref<1x8x8x128xf32, #tpu.memory_space<vmem>>, vector<1x1x8x128xf32>
    %188 = vector.shape_cast %187 : vector<1x1x8x128xf32> to vector<8x128xf32>
    %189 = vector.shape_cast %186 : vector<8x128xf32> to vector<1x1x8x128xf32>
    tpu.vector_store %arg6[%c0_39, %c3_40, %c0_41, %c0_42], %189 {strides = array<i32>} : memref<1x8x8x128xf32, #tpu.memory_space<vmem>>, vector<1x1x8x128xf32>,
    %c36 = arith.constant 36 : index
    %190 = memref.load %arg3[%c36] : memref<63xf32, #tpu.memory_space<smem>>
    %191 = vector.broadcast %190 : f32 to vector<8x128xf32>
    %192 = arith.mulf %9, %191 : vector<8x128xf32>
    %c37 = arith.constant 37 : index
    %193 = memref.load %arg3[%c37] : memref<63xf32, #tpu.memory_space<smem>>
    %194 = vector.broadcast %193 : f32 to vector<8x128xf32>
    %195 = arith.mulf %10, %194 : vector<8x128xf32>
    %c38 = arith.constant 38 : index
    %196 = memref.load %arg3[%c38] : memref<63xf32, #tpu.memory_space<smem>>
    %197 = vector.broadcast %196 : f32 to vector<8x128xf32>
    %198 = arith.mulf %11, %197 : vector<8x128xf32>
    %c39 = arith.constant 39 : index
    %199 = memref.load %arg3[%c39] : memref<63xf32, #tpu.memory_space<smem>>
    %200 = vector.broadcast %199 : f32 to vector<8x128xf32>
    %201 = arith.mulf %12, %200 : vector<8x128xf32>
    %c40 = arith.constant 40 : index
    %202 = memref.load %arg3[%c40] : memref<63xf32, #tpu.memory_space<smem>>
    %203 = vector.broadcast %202 : f32 to vector<8x128xf32>
    %204 = arith.mulf %13, %203 : vector<8x128xf32>
    %c41 = arith.constant 41 : index
    %205 = memref.load %arg3[%c41] : memref<63xf32, #tpu.memory_space<smem>>
    %206 = vector.broadcast %205 : f32 to vector<8x128xf32>
    %207 = arith.mulf %14, %206 : vector<8x128xf32>
    %c42 = arith.constant 42 : index
    %208 = memref.load %arg3[%c42] : memref<63xf32, #tpu.memory_space<smem>>
    %209 = vector.broadcast %208 : f32 to vector<8x128xf32>
    %210 = arith.mulf %15, %209 : vector<8x128xf32>
    %c43 = arith.constant 43 : index
    %211 = memref.load %arg3[%c43] : memref<63xf32, #tpu.memory_space<smem>>
    %212 = vector.broadcast %211 : f32 to vector<8x128xf32>
    %213 = arith.mulf %16, %212 : vector<8x128xf32>
    %c44 = arith.constant 44 : index
    %214 = memref.load %arg3[%c44] : memref<63xf32, #tpu.memory_space<smem>>
    %215 = vector.broadcast %214 : f32 to vector<8x128xf32>
    %216 = arith.mulf %17, %215 : vector<8x128xf32>
    %217 = arith.addf %192, %195 : vector<8x128xf32>
    %218 = arith.addf %198, %201 : vector<8x128xf32>
    %219 = arith.addf %217, %218 : vector<8x128xf32>
    %220 = arith.addf %204, %207 : vector<8x128xf32>
    %221 = arith.addf %210, %213 : vector<8x128xf32>
    %222 = arith.addf %220, %221 : vector<8x128xf32>
    %223 = arith.addf %219, %222 : vector<8x128xf32>
    %224 = arith.addf %223, %216 : vector<8x128xf32>
    %c4_43 = arith.constant 4 : index
    %225 = memref.load %arg5[%c4_43] : memref<8xf32, #tpu.memory_space<smem>>
    %226 = vector.broadcast %225 : f32 to vector<8x128xf32>
    %227 = arith.addf %224, %226 : vector<8x128xf32>
    %cst_44 = arith.constant 0.000000e+00 : f32
    %228 = vector.broadcast %cst_44 : f32 to vector<8x128xf32>
    %229 = arith.maximumf %227, %228 : vector<8x128xf32>
    %c0_45 = arith.constant 0 : index
    %c4_46 = arith.constant 4 : index
    %c0_47 = arith.constant 0 : index
    %c0_48 = arith.constant 0 : index
    %230 = vector.load %arg6[%c0_45, %c4_46, %c0_47, %c0_48] : memref<1x8x8x128xf32, #tpu.memory_space<vmem>>, vector<1x1x8x128xf32>
    %231 = vector.shape_cast %230 : vector<1x1x8x128xf32> to vector<8x128xf32>
    %232 = vector.shape_cast %229 : vector<8x128xf32> to vector<1x1x8x128xf32>
    tpu.vector_store %arg6[%c0_45, %c4_46, %c0_47, %c0_48], %232 {strides = array<i32>} : memref<1x8x8x128xf32, #tpu.memory_space<vmem>>, vector<1x1x8x128xf32>,
    %c45 = arith.constant 45 : index
    %233 = memref.load %arg3[%c45] : memref<63xf32, #tpu.memory_space<smem>>
    %234 = vector.broadcast %233 : f32 to vector<8x128xf32>
    %235 = arith.mulf %9, %234 : vector<8x128xf32>
    %c46 = arith.constant 46 : index
    %236 = memref.load %arg3[%c46] : memref<63xf32, #tpu.memory_space<smem>>
    %237 = vector.broadcast %236 : f32 to vector<8x128xf32>
    %238 = arith.mulf %10, %237 : vector<8x128xf32>
    %c47 = arith.constant 47 : index
    %239 = memref.load %arg3[%c47] : memref<63xf32, #tpu.memory_space<smem>>
    %240 = vector.broadcast %239 : f32 to vector<8x128xf32>
    %241 = arith.mulf %11, %240 : vector<8x128xf32>
    %c48 = arith.constant 48 : index
    %242 = memref.load %arg3[%c48] : memref<63xf32, #tpu.memory_space<smem>>
    %243 = vector.broadcast %242 : f32 to vector<8x128xf32>
    %244 = arith.mulf %12, %243 : vector<8x128xf32>
    %c49 = arith.constant 49 : index
    %245 = memref.load %arg3[%c49] : memref<63xf32, #tpu.memory_space<smem>>
    %246 = vector.broadcast %245 : f32 to vector<8x128xf32>
    %247 = arith.mulf %13, %246 : vector<8x128xf32>
    %c50 = arith.constant 50 : index
    %248 = memref.load %arg3[%c50] : memref<63xf32, #tpu.memory_space<smem>>
    %249 = vector.broadcast %248 : f32 to vector<8x128xf32>
    %250 = arith.mulf %14, %249 : vector<8x128xf32>
    %c51 = arith.constant 51 : index
    %251 = memref.load %arg3[%c51] : memref<63xf32, #tpu.memory_space<smem>>
    %252 = vector.broadcast %251 : f32 to vector<8x128xf32>
    %253 = arith.mulf %15, %252 : vector<8x128xf32>
    %c52 = arith.constant 52 : index
    %254 = memref.load %arg3[%c52] : memref<63xf32, #tpu.memory_space<smem>>
    %255 = vector.broadcast %254 : f32 to vector<8x128xf32>
    %256 = arith.mulf %16, %255 : vector<8x128xf32>
    %c53 = arith.constant 53 : index
    %257 = memref.load %arg3[%c53] : memref<63xf32, #tpu.memory_space<smem>>
    %258 = vector.broadcast %257 : f32 to vector<8x128xf32>
    %259 = arith.mulf %17, %258 : vector<8x128xf32>
    %260 = arith.addf %235, %238 : vector<8x128xf32>
    %261 = arith.addf %241, %244 : vector<8x128xf32>
    %262 = arith.addf %260, %261 : vector<8x128xf32>
    %263 = arith.addf %247, %250 : vector<8x128xf32>
    %264 = arith.addf %253, %256 : vector<8x128xf32>
    %265 = arith.addf %263, %264 : vector<8x128xf32>
    %266 = arith.addf %262, %265 : vector<8x128xf32>
    %267 = arith.addf %266, %259 : vector<8x128xf32>
    %c5_49 = arith.constant 5 : index
    %268 = memref.load %arg5[%c5_49] : memref<8xf32, #tpu.memory_space<smem>>
    %269 = vector.broadcast %268 : f32 to vector<8x128xf32>
    %270 = arith.addf %267, %269 : vector<8x128xf32>
    %cst_50 = arith.constant 0.000000e+00 : f32
    %271 = vector.broadcast %cst_50 : f32 to vector<8x128xf32>
    %272 = arith.maximumf %270, %271 : vector<8x128xf32>
    %c0_51 = arith.constant 0 : index
    %c5_52 = arith.constant 5 : index
    %c0_53 = arith.constant 0 : index
    %c0_54 = arith.constant 0 : index
    %273 = vector.load %arg6[%c0_51, %c5_52, %c0_53, %c0_54] : memref<1x8x8x128xf32, #tpu.memory_space<vmem>>, vector<1x1x8x128xf32>
    %274 = vector.shape_cast %273 : vector<1x1x8x128xf32> to vector<8x128xf32>
    %275 = vector.shape_cast %272 : vector<8x128xf32> to vector<1x1x8x128xf32>
    tpu.vector_store %arg6[%c0_51, %c5_52, %c0_53, %c0_54], %275 {strides = array<i32>} : memref<1x8x8x128xf32, #tpu.memory_space<vmem>>, vector<1x1x8x128xf32>,
    %c54 = arith.constant 54 : index
    %276 = memref.load %arg3[%c54] : memref<63xf32, #tpu.memory_space<smem>>
    %277 = vector.broadcast %276 : f32 to vector<8x128xf32>
    %278 = arith.mulf %9, %277 : vector<8x128xf32>
    %c55 = arith.constant 55 : index
    %279 = memref.load %arg3[%c55] : memref<63xf32, #tpu.memory_space<smem>>
    %280 = vector.broadcast %279 : f32 to vector<8x128xf32>
    %281 = arith.mulf %10, %280 : vector<8x128xf32>
    %c56 = arith.constant 56 : index
    %282 = memref.load %arg3[%c56] : memref<63xf32, #tpu.memory_space<smem>>
    %283 = vector.broadcast %282 : f32 to vector<8x128xf32>
    %284 = arith.mulf %11, %283 : vector<8x128xf32>
    %c57 = arith.constant 57 : index
    %285 = memref.load %arg3[%c57] : memref<63xf32, #tpu.memory_space<smem>>
    %286 = vector.broadcast %285 : f32 to vector<8x128xf32>
    %287 = arith.mulf %12, %286 : vector<8x128xf32>
    %c58 = arith.constant 58 : index
    %288 = memref.load %arg3[%c58] : memref<63xf32, #tpu.memory_space<smem>>
    %289 = vector.broadcast %288 : f32 to vector<8x128xf32>
    %290 = arith.mulf %13, %289 : vector<8x128xf32>
    %c59 = arith.constant 59 : index
    %291 = memref.load %arg3[%c59] : memref<63xf32, #tpu.memory_space<smem>>
    %292 = vector.broadcast %291 : f32 to vector<8x128xf32>
    %293 = arith.mulf %14, %292 : vector<8x128xf32>
    %c60 = arith.constant 60 : index
    %294 = memref.load %arg3[%c60] : memref<63xf32, #tpu.memory_space<smem>>
    %295 = vector.broadcast %294 : f32 to vector<8x128xf32>
    %296 = arith.mulf %15, %295 : vector<8x128xf32>
    %c61 = arith.constant 61 : index
    %297 = memref.load %arg3[%c61] : memref<63xf32, #tpu.memory_space<smem>>
    %298 = vector.broadcast %297 : f32 to vector<8x128xf32>
    %299 = arith.mulf %16, %298 : vector<8x128xf32>
    %c62 = arith.constant 62 : index
    %300 = memref.load %arg3[%c62] : memref<63xf32, #tpu.memory_space<smem>>
    %301 = vector.broadcast %300 : f32 to vector<8x128xf32>
    %302 = arith.mulf %17, %301 : vector<8x128xf32>
    %303 = arith.addf %278, %281 : vector<8x128xf32>
    %304 = arith.addf %284, %287 : vector<8x128xf32>
    %305 = arith.addf %303, %304 : vector<8x128xf32>
    %306 = arith.addf %290, %293 : vector<8x128xf32>
    %307 = arith.addf %296, %299 : vector<8x128xf32>
    %308 = arith.addf %306, %307 : vector<8x128xf32>
    %309 = arith.addf %305, %308 : vector<8x128xf32>
    %310 = arith.addf %309, %302 : vector<8x128xf32>
    %c6_55 = arith.constant 6 : index
    %311 = memref.load %arg5[%c6_55] : memref<8xf32, #tpu.memory_space<smem>>
    %312 = vector.broadcast %311 : f32 to vector<8x128xf32>
    %313 = arith.addf %310, %312 : vector<8x128xf32>
    %cst_56 = arith.constant 0.000000e+00 : f32
    %314 = vector.broadcast %cst_56 : f32 to vector<8x128xf32>
    %315 = arith.maximumf %313, %314 : vector<8x128xf32>
    %c0_57 = arith.constant 0 : index
    %c6_58 = arith.constant 6 : index
    %c0_59 = arith.constant 0 : index
    %c0_60 = arith.constant 0 : index
    %316 = vector.load %arg6[%c0_57, %c6_58, %c0_59, %c0_60] : memref<1x8x8x128xf32, #tpu.memory_space<vmem>>, vector<1x1x8x128xf32>
    %317 = vector.shape_cast %316 : vector<1x1x8x128xf32> to vector<8x128xf32>
    %318 = vector.shape_cast %315 : vector<8x128xf32> to vector<1x1x8x128xf32>
    tpu.vector_store %arg6[%c0_57, %c6_58, %c0_59, %c0_60], %318 {strides = array<i32>} : memref<1x8x8x128xf32, #tpu.memory_space<vmem>>, vector<1x1x8x128xf32>,
    %319 = tpu.iota {dimensions = array<i32: 0>} : vector<8x128xi32>
    %320 = vector.broadcast %0 : i32 to vector<8x128xi32>
    %321 = arith.addi %319, %320 : vector<8x128xi32>
    %322 = tpu.iota {dimensions = array<i32: 1>} : vector<8x128xi32>
    %c2_i32 = arith.constant 2 : i32
    %323 = vector.broadcast %c2_i32 : i32 to vector<8x128xi32>
    %324 = arith.muli %323, %321 : vector<8x128xi32>
    %c-1_i32 = arith.constant -1 : i32
    %325 = vector.broadcast %c-1_i32 : i32 to vector<8x128xi32>
    %326 = arith.addi %324, %325 : vector<8x128xi32>
    %c0_i32 = arith.constant 0 : i32
    %327 = vector.broadcast %c0_i32 : i32 to vector<8x128xi32>
    %328 = arith.cmpi sge, %326, %327 : vector<8x128xi32>
    %c16_i32 = arith.constant 16 : i32
    %329 = vector.broadcast %c16_i32 : i32 to vector<8x128xi32>
    %330 = arith.cmpi slt, %326, %329 : vector<8x128xi32>
    %331 = arith.andi %328, %330 : vector<8x128xi1>
    %c2_i32_61 = arith.constant 2 : i32
    %332 = vector.broadcast %c2_i32_61 : i32 to vector<8x128xi32>
    %333 = arith.muli %332, %322 : vector<8x128xi32>
    %c-1_i32_62 = arith.constant -1 : i32
    %334 = vector.broadcast %c-1_i32_62 : i32 to vector<8x128xi32>
    %335 = arith.addi %333, %334 : vector<8x128xi32>
    %c0_i32_63 = arith.constant 0 : i32
    %336 = vector.broadcast %c0_i32_63 : i32 to vector<8x128xi32>
    %337 = arith.cmpi sge, %335, %336 : vector<8x128xi32>
    %c16_i32_64 = arith.constant 16 : i32
    %338 = vector.broadcast %c16_i32_64 : i32 to vector<8x128xi32>
    %339 = arith.cmpi slt, %335, %338 : vector<8x128xi32>
    %340 = arith.andi %337, %339 : vector<8x128xi1>
    %341 = arith.andi %331, %340 : vector<8x128xi1>
    %cst_65 = arith.constant 0xFF800000 : f32
    %342 = vector.broadcast %cst_65 : f32 to vector<8x128xf32>
    %343 = arith.select %341, %9, %342 : vector<8x128xi1>, vector<8x128xf32>
    %c2_i32_66 = arith.constant 2 : i32
    %344 = vector.broadcast %c2_i32_66 : i32 to vector<8x128xi32>
    %345 = arith.muli %344, %321 : vector<8x128xi32>
    %c-1_i32_67 = arith.constant -1 : i32
    %346 = vector.broadcast %c-1_i32_67 : i32 to vector<8x128xi32>
    %347 = arith.addi %345, %346 : vector<8x128xi32>
    %c0_i32_68 = arith.constant 0 : i32
    %348 = vector.broadcast %c0_i32_68 : i32 to vector<8x128xi32>
    %349 = arith.cmpi sge, %347, %348 : vector<8x128xi32>
    %c16_i32_69 = arith.constant 16 : i32
    %350 = vector.broadcast %c16_i32_69 : i32 to vector<8x128xi32>
    %351 = arith.cmpi slt, %347, %350 : vector<8x128xi32>
    %352 = arith.andi %349, %351 : vector<8x128xi1>
    %cst_70 = arith.constant 0xFF800000 : f32
    %353 = vector.broadcast %cst_70 : f32 to vector<8x128xf32>
    %354 = arith.select %352, %10, %353 : vector<8x128xi1>, vector<8x128xf32>
    %355 = arith.maximumf %343, %354 : vector<8x128xf32>
    %c2_i32_71 = arith.constant 2 : i32
    %356 = vector.broadcast %c2_i32_71 : i32 to vector<8x128xi32>
    %357 = arith.muli %356, %321 : vector<8x128xi32>
    %c-1_i32_72 = arith.constant -1 : i32
    %358 = vector.broadcast %c-1_i32_72 : i32 to vector<8x128xi32>
    %359 = arith.addi %357, %358 : vector<8x128xi32>
    %c0_i32_73 = arith.constant 0 : i32
    %360 = vector.broadcast %c0_i32_73 : i32 to vector<8x128xi32>
    %361 = arith.cmpi sge, %359, %360 : vector<8x128xi32>
    %c16_i32_74 = arith.constant 16 : i32
    %362 = vector.broadcast %c16_i32_74 : i32 to vector<8x128xi32>
    %363 = arith.cmpi slt, %359, %362 : vector<8x128xi32>
    %364 = arith.andi %361, %363 : vector<8x128xi1>
    %cst_75 = arith.constant 0xFF800000 : f32
    %365 = vector.broadcast %cst_75 : f32 to vector<8x128xf32>
    %366 = arith.select %364, %11, %365 : vector<8x128xi1>, vector<8x128xf32>
    %367 = arith.maximumf %355, %366 : vector<8x128xf32>
    %c2_i32_76 = arith.constant 2 : i32
    %368 = vector.broadcast %c2_i32_76 : i32 to vector<8x128xi32>
    %369 = arith.muli %368, %322 : vector<8x128xi32>
    %c-1_i32_77 = arith.constant -1 : i32
    %370 = vector.broadcast %c-1_i32_77 : i32 to vector<8x128xi32>
    %371 = arith.addi %369, %370 : vector<8x128xi32>
    %c0_i32_78 = arith.constant 0 : i32
    %372 = vector.broadcast %c0_i32_78 : i32 to vector<8x128xi32>
    %373 = arith.cmpi sge, %371, %372 : vector<8x128xi32>
    %c16_i32_79 = arith.constant 16 : i32
    %374 = vector.broadcast %c16_i32_79 : i32 to vector<8x128xi32>
    %375 = arith.cmpi slt, %371, %374 : vector<8x128xi32>
    %376 = arith.andi %373, %375 : vector<8x128xi1>
    %cst_80 = arith.constant 0xFF800000 : f32
    %377 = vector.broadcast %cst_80 : f32 to vector<8x128xf32>
    %378 = arith.select %376, %12, %377 : vector<8x128xi1>, vector<8x128xf32>
    %379 = arith.maximumf %367, %378 : vector<8x128xf32>
    %380 = arith.maximumf %379, %13 : vector<8x128xf32>
    %381 = arith.maximumf %380, %14 : vector<8x128xf32>
    %c2_i32_81 = arith.constant 2 : i32
    %382 = vector.broadcast %c2_i32_81 : i32 to vector<8x128xi32>
    %383 = arith.muli %382, %322 : vector<8x128xi32>
    %c-1_i32_82 = arith.constant -1 : i32
    %384 = vector.broadcast %c-1_i32_82 : i32 to vector<8x128xi32>
    %385 = arith.addi %383, %384 : vector<8x128xi32>
    %c0_i32_83 = arith.constant 0 : i32
    %386 = vector.broadcast %c0_i32_83 : i32 to vector<8x128xi32>
    %387 = arith.cmpi sge, %385, %386 : vector<8x128xi32>
    %c16_i32_84 = arith.constant 16 : i32
    %388 = vector.broadcast %c16_i32_84 : i32 to vector<8x128xi32>
    %389 = arith.cmpi slt, %385, %388 : vector<8x128xi32>
    %390 = arith.andi %387, %389 : vector<8x128xi1>
    %cst_85 = arith.constant 0xFF800000 : f32
    %391 = vector.broadcast %cst_85 : f32 to vector<8x128xf32>
    %392 = arith.select %390, %15, %391 : vector<8x128xi1>, vector<8x128xf32>
    %393 = arith.maximumf %381, %392 : vector<8x128xf32>
    %394 = arith.maximumf %393, %16 : vector<8x128xf32>
    %395 = arith.maximumf %394, %17 : vector<8x128xf32>
    %c7_86 = arith.constant 7 : index
    %396 = memref.load %arg4[%c7_86] : memref<8xf32, #tpu.memory_space<smem>>
    %397 = vector.broadcast %396 : f32 to vector<8x128xf32>
    %398 = arith.mulf %395, %397 : vector<8x128xf32>
    %c7_87 = arith.constant 7 : index
    %399 = memref.load %arg5[%c7_87] : memref<8xf32, #tpu.memory_space<smem>>
    %400 = vector.broadcast %399 : f32 to vector<8x128xf32>
    %401 = arith.addf %398, %400 : vector<8x128xf32>
    %cst_88 = arith.constant 0.000000e+00 : f32
    %402 = vector.broadcast %cst_88 : f32 to vector<8x128xf32>
    %403 = arith.maximumf %401, %402 : vector<8x128xf32>
    %c0_89 = arith.constant 0 : index
    %c7_90 = arith.constant 7 : index
    %c0_91 = arith.constant 0 : index
    %c0_92 = arith.constant 0 : index
    %404 = vector.load %arg6[%c0_89, %c7_90, %c0_91, %c0_92] : memref<1x8x8x128xf32, #tpu.memory_space<vmem>>, vector<1x1x8x128xf32>
    %405 = vector.shape_cast %404 : vector<1x1x8x128xf32> to vector<8x128xf32>
    %406 = vector.shape_cast %403 : vector<8x128xf32> to vector<1x1x8x128xf32>
    tpu.vector_store %arg6[%c0_89, %c7_90, %c0_91, %c0_92], %406 {strides = array<i32>} : memref<1x8x8x128xf32, #tpu.memory_space<vmem>>, vector<1x1x8x128xf32>,
    return
  }
  func.func @transform_0(%arg0: i32, %arg1: i32) -> (i32, i32, i32, i32, i32) {
    %c0_i32 = arith.constant 0 : i32
    %c0_i32_0 = arith.constant 0 : i32
    %c0_i32_1 = arith.constant 0 : i32
    %c0_i32_2 = arith.constant 0 : i32
    return %arg0, %arg1, %c0_i32, %c0_i32_0, %c0_i32_1 : i32, i32, i32, i32, i32
  }
  func.func @transform_1(%arg0: i32, %arg1: i32) -> i32 {
    %c0_i32 = arith.constant 0 : i32
    %c0_i32_0 = arith.constant 0 : i32
    return %c0_i32 : i32
  }
  func.func @transform_2(%arg0: i32, %arg1: i32) -> i32 {
    %c0_i32 = arith.constant 0 : i32
    %c0_i32_0 = arith.constant 0 : i32
    return %c0_i32 : i32
  }
  func.func @transform_3(%arg0: i32, %arg1: i32) -> i32 {
    %c0_i32 = arith.constant 0 : i32
    %c0_i32_0 = arith.constant 0 : i32
    return %c0_i32 : i32
  }
  func.func @transform_4(%arg0: i32, %arg1: i32) -> (i32, i32, i32, i32) {
    %c0_i32 = arith.constant 0 : i32
    %c0_i32_0 = arith.constant 0 : i32
    %c0_i32_1 = arith.constant 0 : i32
    return %arg0, %c0_i32, %arg1, %c0_i32_0 : i32, i32, i32, i32
  }
}

</mosaic_0001>

<bundles_post_ra>
// kernel: initial_block.3
= control target key start
LH: loop header
LB: loop body
LE: loop exit
PB: predicated region body
PF: predicated region fallthrough
CT: control target
= control target key end

     0   :  { %9 = vsyncpa [#allocation4], 0  ;;  %s2247_s0 = inlined_call_operand.vmem [shape: f32[2,1,4,9,129], index: 0, kind: input, shape index: {}]   ;;  %s2248_s1 = inlined_call_operand.vmem [shape: f32[63], index: 1, kind: input, shape index: {}]   ;;  %s2249_s2 = inlined_call_operand.vmem [shape: f32[8], index: 2, kind: input, shape index: {}]   ;;  %s2250_s3 = inlined_call_operand.vmem [shape: f32[8], index: 3, kind: input, shape index: {}]   ;;  %s2251_s4 = inlined_call_operand.hbm [shape: f32[2,8,8,128], index: 4, kind: output, shape index: {}]  }
   0x1   :  { %10 = vsyncpa [#allocation6], 0 }
   0x2   :  { %11 = vsyncpa [#allocation3], 0 }
   0x3   :  { %13 = vsyncpa [#allocation3 + $0x1], 0  ;;  %s1493_s15 = smov 0   ;;  %s1495_s16 = smov 0  }
   0x4   :  { %s1497_s17 = smov 0   ;;  %s1499_s18 = smov 0  }
   0x5   :  { %s1501_s19 = smov 0   ;;  %s1503_s20 = smov 0  }
   0x6 LB: > { %s1133_s21 = sadd.s32 4294967295, %s1458_s20   ;;  %s1134_s22 = sadd.s32 4294967294, %s1458_s20   ;;  %s1458_s20 = sphi %s1503_s20, %s19_s20   ;;  %s1454_s19 = sphi %s1501_s19, %s2273_s19   ;;  %s1450_s18 = sphi %s1499_s18, %s2272_s18   ;;  %s1446_s17 = sphi %s1497_s17, %s2271_s17   ;;  %s1442_s16 = sphi %s1495_s16, %s2270_s16   ;;  %s1438_s15 = sphi %s1493_s15, %s2269_s15  }
   0x7   : > { %s31_s23 = sadd.s32 1, %s1454_s19  ;;  %s131_s24 = sadd.s32 1, %s1446_s17 }
   0x8   : > { %p33_p0 = scmp.ge.s32.totalorder %s31_s23, 2  ;;  %p141_p1 = scmp.ne.s32.totalorder %s1446_s17, %s1442_s16 }
   0x9   : > { %p142_p2 = scmp.eq.s32.totalorder %s1133_s21, 1  ;;  %p147_p3 = scmp.ne.s32.totalorder %s1442_s16, %s1438_s15 }
   0xa   : > { %s2275_s23 = smov (%p33_p0, %s31_s23), 0  ;;  %p148_p5 = scmp.eq.s32.totalorder %s1134_s22, 1 }
   0xb   : > { %p1533_p4 = por %p142_p2, %p141_p1  ;;  %s126_s26 = ssub.s32 %s1454_s19, %s2275_s23 }
   0xc   : > { %p1135_p6 = scmp.ge.s32.totalorder %s1458_s20, 1  ;;  %p129_p7 = scmp.eq.s32.totalorder %s126_s26, 0 }
   0xd   : > { %s2256_s25 = scalar_select %p1533_p4, 1, 0 }
   0xe   : > { %p1540_p8 = por %p148_p5, %p147_p3  ;;  %p155_p9 = scmp.lt.s32.totalorder %s1458_s20, 3 }
   0xf   : > { %s1546_s28 = scalar_select %p129_p7, %s1446_s17, %s131_s24  }
  0x10   : > { %s2257_s27 = scalar_select %p1540_p8, 1, 0 }
  0x11   : > { %p1548_p10 = pnand %p1135_p6, %p155_p9  ;;  %p1552_p11 = scmp.eq.s32.totalorder %s1133_s21, 0 }
  0x12   : > { %s179_s7 = sshll.u32 %s2249_s2, 4  ;;  %s168_s10 = sshll.u32 %s2248_s1, 4  ;;  %s180_s7 = int_to_ptr.vmem [resolvable:$true] %s179_s7  ;;  %s169_s10 = int_to_ptr.vmem [resolvable:$true] %s168_s10 }
  0x13   : > { %s2258_s29 = scalar_select %p1548_p10, 1, 0 }
  0x14   : > { %s2259_s30 = scalar_select %p1552_p11, 1, 0 }
  0x15   : > { %p1250_p12 = pneg %p1548_p10  ;;  %s190_s14 = sshll.u32 %s2250_s3, 4  ;;  %s191_s14 = int_to_ptr.vmem [resolvable:$true] %s190_s14 }
  0x16   : > { %s1327_s21 = scalar_lea.vmem %s180_s7, 16  ;;  %p1335_p5 = scmp.lt.s32.totalorder %s180_s7, %s180_s7 }
  0x17   : > { %p1566_p13 = pnand %p1552_p11, %p1250_p12  ;;  %p1328_p0 = scmp.ne.s32.totalorder %s180_s7, %s1327_s21 }
  0x18   : > { %p1336_p6 = scmp.lt.s32.totalorder %s1327_s21, %s1327_s21 }
  0x19   : > { %p1329_p1 = pneg %p1566_p13 }
  0x1a   : > { %p1337_p7 = por %p1336_p6, %p1335_p5 }
  0x1b   : > { %p1330_p2 = pnand %p1329_p1, %p1328_p0 }
  0x1d   : > { %p1331_p3 = pneg %p1330_p2 }
  0x1f   : > { %p1338_p9 = pnand %p1337_p7, %p1331_p3 }
  0x21   : > { %1341 = shalt.err (!%p1338_p9)
}
  0x22   : > { %s1460_s22 = smov [#allocation5]   ;;  %s1342_s24 = scalar_lea.vmem %s169_s10, 16 }
  0x23   : > { %1256 = dma.vmem_to_smem (!%p1566_p13), %s180_s7, 16, %s1460_s22, [#allocation6]  }
  0x24   : > { %p1343_p12 = scmp.ne.s32.totalorder %s169_s10, %s1342_s24  ;;  %p1350_p11 = scmp.lt.s32.totalorder %s169_s10, %s169_s10 }
  0x25   : > { %p1351_p10 = scmp.lt.s32.totalorder %s1342_s24, %s1342_s24 }
  0x26   : > { %p1345_p8 = pnand %p1343_p12, %p1329_p1 }
  0x27   : > { %p1352_p0 = por %p1351_p10, %p1350_p11 }
  0x28   : > { %p1346_p4 = pneg %p1345_p8 }
  0x2a   : > { %p1353_p2 = pnand %p1352_p0, %p1346_p4 }
  0x2c   : > { %1356 = shalt.err (!%p1353_p2)
}
  0x2d   : > { %s1461_s26 = smov [#allocation2]   ;;  %s1357_s5 = scalar_lea.vmem %s191_s14, 16 }
  0x2e   : > { %1253 = dma.vmem_to_smem (!%p1566_p13), %s169_s10, 16, %s1461_s26, [#allocation4]  }
  0x2f   : > { %p1358_p3 = scmp.ne.s32.totalorder %s191_s14, %s1357_s5  ;;  %p1365_p7 = scmp.lt.s32.totalorder %s191_s14, %s191_s14 }
  0x30   : > { %p1366_p9 = scmp.lt.s32.totalorder %s1357_s5, %s1357_s5 }
  0x31   : > { %p1360_p5 = pnand %p1358_p3, %p1329_p1 }
  0x32   : > { %p1367_p8 = por %p1366_p9, %p1365_p7 }
  0x33   : > { %p1361_p6 = pneg %p1360_p5 }
  0x35   : > { %p1368_p12 = pnand %p1367_p8, %p1361_p6 }
  0x37   : > { %1371 = shalt.err (!%p1368_p12)
}
  0x38   : > { %s1462_s6 = smov [#allocation7]   ;;  %p2261_p4 = scmp.ne.s32.totalorder %s2258_s29, 0 }
  0x39   : > { %1259 = dma.vmem_to_smem (!%p1566_p13), %s191_s14, 16, %s1462_s6, [#allocation6]  }
  0x3a   : > { %215 = sbr.rel (%p2261_p4) target bundleno = 361 (0x169), region = 36  ;;  %p2262_p10 = scmp.ne.s32.totalorder (!%p2261_p4), %s2259_s30, 0 }
  0x41   : > { %1425 = dma.done.wait (%p2262_p10), [#allocation4], 16  }
  0x42   : > { %1427 = vsyncadd (%p2262_p10), [#allocation4], 4294967280 }
  0x43   : > { %1429 = dma.done.wait (%p2262_p10), [#allocation6], 32  }
  0x44   : > { %1431 = vsyncadd (%p2262_p10), [#allocation6], 4294967264 }
  0x45   : > { %229 = sfence }
  0x46   : > { %p254_p11 = scmp.lt.s32.totalorder %s1450_s18, 1  ;;  %s1154_s7 = sld [smem:[#allocation2 + $0x3]]  ;;  %v921_v4 = vlaneseq  ;;  %vm340_vm0 = vcmask 1046528   ;;  %vm323_vm8 = vcmask 1039360  }
  0x47   : > { %s1163_s8 = sld [smem:[#allocation2 + $0xc]]  ;;  %s1174_s9 = sld [smem:[#allocation2 + $0x15]] }
  0x48   : > { %s255_s29 = scalar_select %p254_p11, %s1450_s18, 1  ;;  %v922_v10 = vshrl.u32 %v921_v4, 7 }
  0x49   : > { %s1185_s10 = sld [smem:[#allocation2 + $0x1e]]  ;;  %s1196_s12 = sld [smem:[#allocation2 + $0x27]] }
  0x4a   : > { %s1234_s11 = sshll.u32 %s255_s29, 7  ;;  %s1607_s22 = sld [smem:[#allocation2 + $0x30]]  ;;  %v927_v20 = vmul.u32 2, %v922_v10 }
  0x4b   : > { %s1605_s21 = scalar_lea.vmem %s2247_s0, %s1234_s11  ;;  %s1218_s30 = sld [smem:[#allocation2 + $0x39]] }
  0x4c   : > { %v1610_v0 = vld [vmem:[%s1605_s21 + $0x40] sm:$0xff]  ;;  %v287_v1 = vstv %s1154_s7  ;;  %s1159_s24 = sld [smem:[#allocation2 + $0x8]]  ;;  %s1463_s26 = smov 1   ;;  %v1628_v17 = vld [vmem:[%s1605_s21 + $0x10] sm:$0x1]  ;;  %v1631_v18 = vld [vmem:[%s1605_s21 + $0x8] sm:$0xff] }
  0x4d   : > { %v288_v2 = vmul.f32 %v1610_v0, %v287_v1  ;;  %v380_v3 = vstv %s1163_s8  ;;  %v472_v6 = vstv %s1174_s9  ;;  %s1615_s5 = sld [smem:[#allocation2 + $0x5]]  ;;  %v1625_v14 = vld [vmem:[%s1605_s21] sm:$0xff]  ;;  %v1634_v19 = vld [vmem:[%s1605_s21 + $0x18] sm:$0x1]  ;;  %v928_v29 = vadd.s32 4294967295, %v927_v20  ;;  %s1652_s6 = sld [smem:[#allocation2 + $0xe]] }
  0x4e   : > { %v381_v5 = vmul.f32 %v1610_v0, %v380_v3  ;;  %v473_v8 = vmul.f32 %v1610_v0, %v472_v6  ;;  %v1644_v26 = vld [vmem:[%s1605_s21 + $0x48] sm:$0xff]  ;;  %s1168_s7 = sld [smem:[#allocation2 + $0x11]]  ;;  %s1654_s8 = sld [smem:[#allocation2 + $0x17]]  ;;  %v987_v39 = vrot.slane %v1631_v18, 1  ;;  %v988_v42 = vrot.slane %v1634_v19, 1 }
  0x4f   : > { %312 = vrot.lane.b32.xlu0 %v288_v2, %s1463_s26  ;;  %v564_v7 = vstv %s1185_s10  ;;  %v656_v9 = vstv %s1196_s12  ;;  %vm929_vm1 = vcmp.ge.s32.totalorder %v928_v29, 0  ;;  %vm930_vm2 = vcmp.lt.s32.totalorder %v928_v29, 16  ;;  %s1464_s29 = smov 127   ;;  %s1179_s9 = sld [smem:[#allocation2 + $0x1a]] }
  0x50   : > { %497 = vrot.lane.b32.xlu1 %v473_v8, %s1463_s26  ;;  %v565_v11 = vmul.f32 %v1610_v0, %v564_v7  ;;  %v657_v12 = vmul.f32 %v1610_v0, %v656_v9  ;;  %v748_v13 = vstv %s1607_s22  ;;  %s1659_s10 = sld [smem:[#allocation2 + $0x20]]  ;;  %vm1662_vm3 = vmand %vm929_vm1, %vm930_vm2  ;;  %s1666_s11 = sld [smem:[#allocation2 + $0x29]]  ;;  %v984_v46 = vrot.slane %v1625_v14, 1 }
  0x51   : > { %v840_v15 = vstv %s1218_s30  ;;  %v749_v21 = vmul.f32 %v1610_v0, %v748_v13  ;;  %s1668_s12 = sld [smem:[#allocation2 + $0x32]]  ;;  %v941_v40 = vsel %vm1662_vm3, %v1625_v14, -inf  ;;  %s1677_s13 = sld [smem:[#allocation2 + $0x3b]]  ;;  %v942_v44 = vsel %vm1662_vm3, %v1631_v18, -inf }
  0x52   : > { %v305_v16 = vstv %s1159_s24  ;;  %v841_v22 = vmul.f32 %v1610_v0, %v840_v15  ;;  %s1689_s14 = sld [smem:[#allocation2 + $0x23]]  ;;  %v1695_v53 = vsel %vm340_vm0, %v987_v39, %v988_v42  ;;  %v985_v54 = vrot.slane %v1628_v17, 1  ;;  %s1698_s22 = sld [smem:[#allocation2 + $0x6]] }
  0x53   : > { %405 = vrot.lane.b32.xlu0 %v381_v5, %s1463_s26  ;;  %v293_v23 = vstv %s1615_s5  ;;  %v306_v24 = vmul.f32 %v305_v16, %v1625_v14  ;;  %v308_v25 = vmul.f32 %v305_v16, %v1628_v17  ;;  %v307_v27 = vmul.f32 %v305_v16, %v1631_v18  ;;  %s1700_s30 = sld [smem:[#allocation2 + $0x7]]  ;;  %s1710_s24 = sld [smem:[#allocation2 + $0x3e]] }
  0x54   : > { %589 = vrot.lane.b32.xlu1 %v565_v11, %s1463_s26  ;;  %v309_v28 = vmul.f32 %v305_v16, %v1634_v19  ;;  %v294_v30 = vmul.f32 %v1610_v0, %v293_v23  ;;  %v295_v31 = vmul.f32 %v1644_v26, %v293_v23  ;;  %v386_v41 = vstv %s1652_s6  ;;  %s1761_s5 = sld [smem:[#allocation2 + $0x10]]  ;;  %p2267_p1 = scmp.ne.s32.totalorder %s2256_s25, 0 }
  0x55   : > { %v351_v32 = vrot.slane %v306_v24, 1  ;;  %v352_v33 = vrot.slane %v308_v25, 1  ;;  %v354_v34 = vrot.slane %v307_v27, 1  ;;  %v398_v43 = vstv %s1168_s7  ;;  %s1792_s6 = sld [smem:[#allocation2 + $0x18]]  ;;  %s1794_s7 = sld [smem:[#allocation2 + $0x19]] }
  0x56   : > { %v355_v35 = vrot.slane %v309_v28, 1  ;;  %v478_v45 = vstv %s1654_s8  ;;  %v387_v47 = vmul.f32 %v1610_v0, %v386_v41  ;;  %v400_v48 = vmul.f32 %v398_v43, %v1631_v18  ;;  %s1809_s8 = sld [smem:[#allocation2 + $0x21]] }
  0x57   : > { %681 = vrot.lane.b32.xlu0 %v657_v12, %s1463_s26  ;;  %v353_v36 = vsel %vm340_vm0, %v351_v32, %v352_v33  ;;  %v402_v49 = vmul.f32 %v398_v43, %v1634_v19  ;;  %v490_v50 = vstv %s1179_s9  ;;  %v388_v51 = vmul.f32 %v1644_v26, %v386_v41  ;;  %s1811_s9 = sld [smem:[#allocation2 + $0x22]] }
  0x58   : > { %773 = vrot.lane.b32.xlu1 %v749_v21, %s1463_s26  ;;  %v356_v37 = vsel %vm340_vm0, %v354_v34, %v355_v35  ;;  %v570_v52 = vstv %s1659_s10  ;;  %v480_v55 = vmul.f32 %v1644_v26, %v478_v45  ;;  %v662_v56 = vstv %s1666_s11  ;;  %v1742_v21 = vld [vmem:[%s1605_s21 + $0x20] sm:$0xff]  ;;  %s1821_s10 = sld [smem:[#allocation2 + $0x2c]]  ;;  %s1831_s11 = sld [smem:[#allocation2 + $0x2a]] }
  0x59   : > { %v399_v57 = vmul.f32 %v398_v43, %v1625_v14  ;;  %v401_v58 = vmul.f32 %v398_v43, %v1628_v17  ;;  %v479_v59 = vmul.f32 %v1610_v0, %v478_v45  ;;  %v754_v60 = vstv %s1668_s12  ;;  %s1852_s12 = sld [smem:[#allocation2 + $0x2b]] }
  0x5a   : > { %v492_v61 = vmul.f32 %v490_v50, %v1631_v18  ;;  %v494_v62 = vmul.f32 %v490_v50, %v1634_v19  ;;  %v1714_v63 = vmul.f32 %v1644_v26, %v570_v52  ;;  %v445_v1 = vrot.slane %v400_v48, 1 }
  0x5b   : > { %865 = vrot.lane.b32.xlu0 %v841_v22, %s1463_s26  ;;  %v446_v2 = vrot.slane %v402_v49, 1  ;;  %v1717_v3 = vmul.f32 %v490_v50, %v1625_v14  ;;  %v571_v5 = vmul.f32 %v1610_v0, %v570_v52  ;;  %v1723_v6 = vmul.f32 %v1644_v26, %v662_v56  ;;  %v1745_v22 = vld [vmem:[%s1605_s21 + $0x30] sm:$0x1]  ;;  %s1759_s26 = sld [smem:[#allocation2 + $0xf]] }
  0x5c   : > { %329 = vrot.lane.b32.xlu1 %v294_v30, %s1464_s29  ;;  %v846_v7 = vstv %s1677_s13  ;;  %v1727_v8 = vmul.f32 %v490_v50, %v1628_v17  ;;  %v1730_v9 = vmul.f32 %v1610_v0, %v662_v56  ;;  %v1733_v10 = vmul.f32 %v1644_v26, %v754_v60  ;;  %s1862_s13 = sld [smem:[#allocation2 + $0x33]] }
  0x5d   : > { %v442_v11 = vrot.slane %v399_v57, 1  ;;  %v443_v12 = vrot.slane %v401_v58, 1  ;;  %v1736_v13 = vmul.f32 %v1610_v0, %v754_v60  ;;  %v1739_v15 = vsel %vm340_vm0, %v984_v46, %v985_v54 }
  0x5e   : > { %v537_v16 = vrot.slane %v492_v61, 1  ;;  %v538_v20 = vrot.slane %v494_v62, 1  ;;  %v1750_v23 = vmul.f32 %v1644_v26, %v846_v7  ;;  %v1753_v24 = vmul.f32 %v1610_v0, %v846_v7 }
  0x5f   : > { %331 = vrot.lane.b32.xlu0 %v295_v31, %s1464_s29  ;;  %v1756_v25 = vsel %vm340_vm0, %v445_v1, %v446_v2  ;;  %v534_v27 = vrot.slane %v1717_v3, 1  ;;  %v535_v28 = vrot.slane %v1727_v8, 1  ;;  %v1766_v29 = vstv %s1689_s14  ;;  %s1884_s14 = sld [smem:[#allocation2 + $0x34]] }
  0x60   : > { %357 = vrot.lane.b32.xlu1 %v353_v36, %s1464_s29  ;;  %v301_v30 = vstv %s1700_s30  ;;  %v1771_v31 = vsel %vm340_vm0, %v442_v11, %v443_v12  ;;  %v1777_v35 = vsel %vm340_vm0, %v537_v16, %v538_v20  ;;  %v926_v39 = vand.u32 127, %v921_v4  ;;  %s1896_s30 = sld [smem:[#allocation2 + $0x3d]] }
  0x61   : > { %v302_v34 = vmul.f32 %v1742_v21, %v301_v30  ;;  %v303_v36 = vmul.f32 %v1745_v22, %v301_v30  ;;  %v939_v57 = vsel %vm1662_vm3, %v1742_v21, -inf  ;;  %v390_v58 = vstv %s1759_s26  ;;  %s1153_s26 = sld [smem:[#allocation2 + $0x2]] }
  0x62   : > { %v932_v4 = vmul.u32 2, %v926_v39  ;;  %v392_v1 = vmul.f32 %v390_v58, %v1628_v17  ;;  %v391_v3 = vmul.f32 %v390_v58, %v1625_v14  ;;  %v486_v30 = vstv %s1794_s7  ;;  %s1184_s7 = sld [smem:[#allocation2 + $0x1d]] }
  0x63   : > { %359 = vrot.lane.b32.xlu0 %v356_v37, %s1464_s29  ;;  %v858_v37 = vstv %s1710_s24  ;;  %v488_v39 = vmul.f32 %v1745_v22, %v486_v30  ;;  %s1915_s24 = sld [smem:[#allocation2 + $0x35]] }
  0x64   : > { %945 = vrot.lane.b32.xlu1 %v941_v40, %s1464_s29  ;;  %v860_v41 = vmul.f32 %v858_v37, %v1631_v18  ;;  %v862_v42 = vmul.f32 %v858_v37, %v1634_v19  ;;  %v859_v43 = vmul.f32 %v858_v37, %v1625_v14  ;;  %v861_v46 = vmul.f32 %v858_v37, %v1628_v17 }
  0x65   : > { %v487_v37 = vmul.f32 %v1742_v21, %v486_v30 }
  0x66   : > { %v905_v48 = vrot.slane %v860_v41, 1  ;;  %v906_v49 = vrot.slane %v862_v42, 1  ;;  %v902_v50 = vrot.slane %v859_v43, 1  ;;  %v903_v54 = vrot.slane %v861_v46, 1 }
  0x67   : > { %947 = vrot.lane.b32.xlu0 %v942_v44, %s1464_s29  ;;  %v1789_v44 = vmul.f32 %v1766_v29, %v1631_v18  ;;  %v574_v42 = vstv %s1809_s8  ;;  %v578_v43 = vstv %s1811_s9  ;;  %s1983_s8 = sld [smem:[#allocation2 + $0x26]]  ;;  %s1987_s9 = sld [smem:[#allocation2 + $0x2f]] }
  0x68   : > { %421 = vrot.lane.b32.xlu1 %v387_v47, %s1464_s29  ;;  %v1802_v56 = vsel %vm340_vm0, %v905_v48, %v906_v49  ;;  %v1819_v61 = vsel %vm340_vm0, %v902_v50, %v903_v54  ;;  %v580_v48 = vmul.f32 %v1745_v22, %v578_v43  ;;  %v666_v49 = vstv %s1831_s11  ;;  %s1998_s11 = sld [smem:[#allocation2 + $0x38]] }
  0x69   : > { %v629_v50 = vrot.slane %v1789_v44, 1  ;;  %v668_v58 = vmul.f32 %v666_v49, %v1628_v17 }
  0x6b   : > { %957 = vrot.lane.b32.xlu0 %v1610_v0, %s1464_s29 }
  0x6c   : > { %959 = vrot.lane.b32.xlu1 %v1644_v26, %s1464_s29  ;;  %v297_v26 = vstv %s1698_s22  ;;  %s1886_s22 = sld [smem:[#allocation2 + $0x3c]] }
  0x6d   : > { %v298_v32 = vmul.f32 %v297_v26, %v1625_v14  ;;  %v299_v33 = vmul.f32 %v297_v26, %v1628_v17  ;;  %v482_v26 = vstv %s1792_s6  ;;  %s1173_s6 = sld [smem:[#allocation2 + $0x14]] }
  0x6f   : > { %423 = vrot.lane.b32.xlu0 %v388_v51, %s1464_s29  ;;  %v336_v40 = vadd.f32 %v302_v34, %v298_v32  ;;  %v337_v45 = vadd.f32 %v303_v36, %v299_v33  ;;  %v1798_v51 = vmul.f32 %v1766_v29, %v1634_v19  ;;  %v484_v34 = vmul.f32 %v482_v26, %v1628_v17 }
  0x70   : > { %513 = vrot.lane.b32.xlu1 %v479_v59, %s1464_s29  ;;  %v394_v59 = vstv %s1761_s5  ;;  %v1866_v36 = vmul.f32 %v1766_v29, %v1625_v14  ;;  %s1162_s5 = sld [smem:[#allocation2 + $0xb]] }
  0x71   : > { %v341_v47 = vrot.slane %v336_v40, 1  ;;  %v342_v52 = vrot.slane %v337_v45, 1  ;;  %v395_v2 = vmul.f32 %v1742_v21, %v394_v59  ;;  %v1877_v40 = vmul.f32 %v1766_v29, %v1628_v17 }
  0x72   : > { %v521_v46 = vadd.f32 %v488_v39, %v484_v34  ;;  %v576_v29 = vmul.f32 %v574_v42, %v1628_v17 }
  0x73   : > { %515 = vrot.lane.b32.xlu0 %v480_v55, %s1464_s29  ;;  %v933_v55 = vadd.s32 4294967295, %v932_v4  ;;  %v1816_v60 = vsel %vm340_vm0, %v341_v47, %v342_v52  ;;  %v428_v38 = vadd.f32 %v395_v2, %v391_v3  ;;  %v674_v4 = vstv %s1821_s10  ;;  %s1155_s10 = sld [smem:[#allocation2 + $0x4]] }
  0x74   : > { %605 = vrot.lane.b32.xlu1 %v571_v5, %s1464_s29  ;;  %v1834_v5 = vsel %vm340_vm0, %v534_v27, %v535_v28  ;;  %v579_v47 = vmul.f32 %v1742_v21, %v578_v43  ;;  %v525_v54 = vrot.slane %v521_v46, 1  ;;  %v627_v34 = vrot.slane %v1877_v40, 1 }
  0x75   : > { %vm934_vm4 = vcmp.ge.s32.totalorder %v933_v55, 0  ;;  %vm935_vm5 = vcmp.lt.s32.totalorder %v933_v55, 16  ;;  %v432_v33 = vrot.slane %v428_v38, 1  ;;  %v626_v38 = vrot.slane %v1866_v36, 1 }
  0x76   : > { %vm1823_vm6 = vmand %vm934_vm4, %vm935_vm5  ;;  %v975_v46 = vrot.slane %v1742_v21, 1 }
  0x77   : > { %607 = vrot.lane.b32.xlu0 %v1714_v63, %s1464_s29  ;;  %v396_v63 = vmul.f32 %v1745_v22, %v394_v59  ;;  %vm937_vm7 = vmand %vm1662_vm3, %vm1823_vm6  ;;  %v952_v7 = vsel %vm1823_vm6, %v1610_v0, -inf  ;;  %v964_v8 = vsel %vm1823_vm6, %v1625_v14, -inf  ;;  %v965_v11 = vsel %vm1823_vm6, %v1628_v17, -inf }
  0x78   : > { %697 = vrot.lane.b32.xlu1 %v1730_v9, %s1464_s29  ;;  %v938_v12 = vsel %vm937_vm7, %v1625_v14, -inf  ;;  %v968_v20 = vrot.slane %v964_v8, 1  ;;  %v969_v28 = vrot.slane %v965_v11, 1  ;;  %v483_v9 = vmul.f32 %v482_v26, %v1625_v14 }
  0x79   : > { %v429_v16 = vadd.f32 %v396_v63, %v392_v1  ;;  %v1856_v27 = vmax.f32 %v938_v12, %v939_v57  ;;  %v613_v57 = vadd.f32 %v580_v48, %v576_v29  ;;  %v670_v59 = vstv %s1852_s12  ;;  %s1164_s12 = sld [smem:[#allocation2 + $0xd]] }
  0x7a   : > { %v520_v45 = vadd.f32 %v487_v37, %v483_v9  ;;  %v630_v1 = vrot.slane %v1798_v51, 1  ;;  %v671_v2 = vmul.f32 %v1742_v21, %v670_v59  ;;  %v672_v63 = vmul.f32 %v1745_v22, %v670_v59 }
  0x7b   : > { %699 = vrot.lane.b32.xlu0 %v1723_v6, %s1464_s29  ;;  %v433_v32 = vrot.slane %v429_v16, 1  ;;  %v1869_v6 = vsel %vm340_vm0, %v968_v20, %v969_v28  ;;  %v617_v8 = vrot.slane %v613_v57, 1  ;;  %v758_v11 = vstv %s1862_s13  ;;  %s1175_s13 = sld [smem:[#allocation2 + $0x16]] }
  0x7c   : > { %789 = vrot.lane.b32.xlu1 %v1736_v13, %s1464_s29  ;;  %v575_v13 = vmul.f32 %v574_v42, %v1625_v14  ;;  %v524_v52 = vrot.slane %v520_v45, 1  ;;  %v705_v12 = vadd.f32 %v672_v63, %v668_v58  ;;  %v759_v51 = vmul.f32 %v758_v11, %v1625_v14 }
  0x7d   : > { %v1880_v41 = vsel %vm340_vm0, %v432_v33, %v433_v32  ;;  %v760_v16 = vmul.f32 %v758_v11, %v1628_v17  ;;  %v762_v28 = vstv %s1884_s14  ;;  %v850_v26 = vstv %s1886_s22  ;;  %s1186_s14 = sld [smem:[#allocation2 + $0x1f]]  ;;  %s1197_s22 = sld [smem:[#allocation2 + $0x28]] }
  0x7e   : > { %v612_v55 = vadd.f32 %v579_v47, %v575_v13  ;;  %v1908_v44 = vsel %vm340_vm0, %v524_v52, %v525_v54  ;;  %v709_v32 = vrot.slane %v705_v12, 1  ;;  %v763_v33 = vmul.f32 %v1742_v21, %v762_v28 }
  0x7f   : > { %791 = vrot.lane.b32.xlu0 %v1733_v10, %s1464_s29  ;;  %v667_v10 = vmul.f32 %v666_v49, %v1625_v14  ;;  %v764_v9 = vmul.f32 %v1745_v22, %v762_v28  ;;  %v852_v36 = vmul.f32 %v850_v26, %v1628_v17  ;;  %v854_v37 = vstv %s1896_s30  ;;  %s1208_s30 = sld [smem:[#allocation2 + $0x31]] }
  0x80   : > { %881 = vrot.lane.b32.xlu1 %v1753_v24, %s1464_s29  ;;  %v1913_v24 = vmul.f32 %v674_v4, %v1631_v18  ;;  %v616_v3 = vrot.slane %v612_v55, 1  ;;  %v796_v42 = vadd.f32 %v763_v33, %v759_v51  ;;  %v675_v45 = vmul.f32 %v674_v4, %v1625_v14 }
  0x81   : > { %v797_v43 = vadd.f32 %v764_v9, %v760_v16  ;;  %v856_v40 = vmul.f32 %v1745_v22, %v854_v37  ;;  %v976_v13 = vrot.slane %v1745_v22, 1  ;;  %v677_v29 = vmul.f32 %v674_v4, %v1628_v17 }
  0x82   : > { %v1924_v20 = vsel %vm340_vm0, %v616_v3, %v617_v8  ;;  %v800_v47 = vrot.slane %v796_v42, 1  ;;  %v678_v52 = vmul.f32 %v674_v4, %v1634_v19  ;;  %v766_v54 = vstv %s1915_s24  ;;  %s1226_s24 = sld [smem:[#allocation5 + $0x7]] }
  0x83   : > { %883 = vrot.lane.b32.xlu0 %v1750_v23, %s1464_s29  ;;  %v704_v23 = vadd.f32 %v671_v2, %v667_v10  ;;  %v801_v48 = vrot.slane %v797_v43, 1  ;;  %v1952_v10 = vsel %vm340_vm0, %v975_v46, %v976_v13  ;;  %v631_v22 = vsel %vm340_vm0, %v629_v50, %v630_v1 }
  0x84   : > { %990 = vrot.lane.b32.xlu1 %v1739_v15, %s1464_s29  ;;  %v851_v15 = vmul.f32 %v850_v26, %v1625_v14  ;;  %v721_v58 = vrot.slane %v1913_v24, 1  ;;  %v718_v4 = vrot.slane %v675_v45, 1  ;;  %v719_v2 = vrot.slane %v677_v29, 1 }
  0x85   : > { %v708_v30 = vrot.slane %v704_v23, 1  ;;  %v1955_v55 = vsel %vm340_vm0, %v800_v47, %v801_v48  ;;  %v767_v63 = vmul.f32 %v766_v54, %v1625_v14  ;;  %v769_v3 = vmul.f32 %v766_v54, %v1628_v17 }
  0x86   : > { %v722_v8 = vrot.slane %v678_v52, 1  ;;  %v768_v11 = vmul.f32 %v766_v54, %v1631_v18  ;;  %v283_v16 = vstv %s1153_s26  ;;  %v376_v26 = vstv %s1162_s5  ;;  %s1227_s26 = sld [smem:[#allocation7 + $0x7]]  ;;  %s251_s5 = sand.u32 1, %s1442_s16  }
  0x87   : > { %992 = vrot.lane.b32.xlu0 %v1695_v53, %s1464_s29  ;;  %v1937_v39 = vsel %vm340_vm0, %v708_v30, %v709_v32  ;;  %v855_v53 = vmul.f32 %v1742_v21, %v854_v37  ;;  %v810_v1 = vrot.slane %v767_v63, 1  ;;  %v811_v24 = vrot.slane %v769_v3, 1 }
  0x88   : > { %448 = vrot.lane.b32.xlu1 %v1771_v31, %s1464_s29  ;;  %v889_v31 = vadd.f32 %v856_v40, %v852_v36  ;;  %v723_v23 = vsel %vm340_vm0, %v721_v58, %v722_v8  ;;  %v813_v12 = vrot.slane %v768_v11, 1  ;;  %v285_v28 = vmul.f32 %v283_v16, %v1631_v18 }
  0x89   : > { %v888_v49 = vadd.f32 %v855_v53, %v851_v15  ;;  %v468_v32 = vstv %s1173_s6  ;;  %v378_v15 = vmul.f32 %v376_v26, %v1631_v18  ;;  %v560_v43 = vstv %s1184_s7  ;;  %s1144_s6 = sshll.u32 %s251_s5, 6 }
  0x8a   : > { %v893_v59 = vrot.slane %v889_v31, 1  ;;  %v469_v37 = vmul.f32 %v468_v32, %v1625_v14  ;;  %v470_v42 = vmul.f32 %v468_v32, %v1631_v18  ;;  %v561_v46 = vmul.f32 %v560_v43, %v1625_v14  ;;  %s2077_s7 = scalar_lea.vmem [#allocation8], %s1144_s6  ;;  %s2116_s6 = sld [smem:[#allocation2 + $0x2d]] }
  0x8b   : > { %450 = vrot.lane.b32.xlu0 %v1756_v25, %s1464_s29  ;;  %v892_v57 = vrot.slane %v888_v49, 1  ;;  %v628_v25 = vsel %vm340_vm0, %v626_v38, %v627_v34  ;;  %v284_v38 = vmul.f32 %v283_v16, %v1625_v14  ;;  %v377_v34 = vmul.f32 %v376_v26, %v1625_v14 }
  0x8c   : > { %540 = vrot.lane.b32.xlu1 %v1834_v5, %s1464_s29  ;;  %v770_v5 = vmul.f32 %v766_v54, %v1634_v19  ;;  %v812_v19 = vsel %vm340_vm0, %v810_v1, %v811_v24  ;;  %v562_v48 = vmul.f32 %v560_v43, %v1631_v18  ;;  %v652_v49 = vstv %s1983_s8  ;;  %s276_s8 = sld [smem:[#allocation2]] }
  0x8d   : > { %v1969_v50 = vsel %vm340_vm0, %v892_v57, %v893_v59  ;;  %v653_v54 = vmul.f32 %v652_v49, %v1625_v14  ;;  %v744_v31 = vstv %s1987_s9  ;;  %v2006_v59 = vld [vmem:[%s1605_s21 + $0x60] sm:$0xff]  ;;  %s1152_s9 = sld [smem:[#allocation2 + $0x1]] }
  0x8e   : > { %v814_v17 = vrot.slane %v770_v5, 1  ;;  %v745_v63 = vmul.f32 %v744_v31, %v1625_v14  ;;  %v746_v5 = vmul.f32 %v744_v31, %v1631_v18 }
  0x8f   : > { %542 = vrot.lane.b32.xlu0 %v1777_v35, %s1464_s29  ;;  %v720_v35 = vsel %vm340_vm0, %v718_v4, %v719_v2  ;;  %v290_v4 = vstv %s1155_s10  ;;  %s1160_s10 = sld [smem:[#allocation2 + $0x9]] }
  0x90   : > { %632 = vrot.lane.b32.xlu1 %v628_v25, %s1464_s29  ;;  %v815_v51 = vsel %vm340_vm0, %v813_v12, %v814_v17  ;;  %v654_v25 = vmul.f32 %v652_v49, %v1631_v18  ;;  %v291_v3 = vmul.f32 %v2006_v59, %v290_v4 }
  0x93   : > { %634 = vrot.lane.b32.xlu0 %v631_v22, %s1464_s29 }
  0x94   : > { %724 = vrot.lane.b32.xlu1 %v720_v35, %s1464_s29  ;;  %v836_v35 = vstv %s1998_s11  ;;  %s1161_s11 = sld [smem:[#allocation2 + $0xa]] }
  0x95   : > { %v837_v12 = vmul.f32 %v836_v35, %v1625_v14  ;;  %v838_v16 = vmul.f32 %v836_v35, %v1631_v18 }
  0x97   : > { %726 = vrot.lane.b32.xlu0 %v723_v23, %s1464_s29 }
  0x98   : > { %816 = vrot.lane.b32.xlu1 %v812_v19, %s1464_s29 }
  0x9b   : > { %818 = vrot.lane.b32.xlu0 %v815_v51, %s1464_s29 }
  0xc1   : > { %v313_v30 = vpop.permute.xlu0 %312 }
  0xc2   : > { %v315_v33 = vadd.f32 %v313_v30, %v284_v38  ;;  %v316_v9 = vadd.f32 %v313_v30, %v285_v28  ;;  %v498_v36 = vpop.permute.xlu1 %497 }
  0xc3   : > { %v500_v13 = vadd.f32 %v498_v36, %v469_v37  ;;  %v501_v29 = vadd.f32 %v498_v36, %v470_v42  ;;  %v383_v36 = vstv %s1164_s12  ;;  %s1171_s12 = sld [smem:[#allocation2 + $0x12]] }
  0xc4   : > { %321 = vrot.lane.b32.xlu0 %v316_v9, %s1464_s29  ;;  %319 = vrot.lane.b32.xlu1 %v315_v33, %s1464_s29  ;;  %v384_v43 = vmul.f32 %v2006_v59, %v383_v36 }
  0xc5   : > { %v406_v53 = vpop.permute.xlu0 %405 }
  0xc6   : > { %v408_v45 = vadd.f32 %v406_v53, %v377_v34  ;;  %v409_v40 = vadd.f32 %v406_v53, %v378_v15  ;;  %v590_v47 = vpop.permute.xlu1 %589 }
  0xc7   : > { %v592_v57 = vadd.f32 %v590_v47, %v561_v46  ;;  %v593_v22 = vadd.f32 %v590_v47, %v562_v48  ;;  %v567_v48 = vstv %s1186_s14  ;;  %s2096_s14 = sld [smem:[#allocation2 + $0x1b]] }
  0xc8   : > { %414 = vrot.lane.b32.xlu0 %v409_v40, %s1464_s29  ;;  %412 = vrot.lane.b32.xlu1 %v408_v45, %s1464_s29  ;;  %v475_v45 = vstv %s1175_s13  ;;  %v568_v31 = vmul.f32 %v2006_v59, %v567_v48  ;;  %s1172_s13 = sld [smem:[#allocation2 + $0x13]] }
  0xc9   : > { %v682_v52 = vpop.permute.xlu0 %681 }
  0xca   : > { %v774_v58 = vpop.permute.xlu1 %773  ;;  %v684_v8 = vadd.f32 %v682_v52, %v653_v54  ;;  %v685_v11 = vadd.f32 %v682_v52, %v654_v25 }
  0xcb   : > { %v776_v19 = vadd.f32 %v774_v58, %v745_v63  ;;  %v777_v51 = vadd.f32 %v774_v58, %v746_v5  ;;  %v751_v63 = vstv %s1208_s30  ;;  %s2104_s30 = sld [smem:[#allocation7]] }
  0xcc   : > { %506 = vrot.lane.b32.xlu0 %v501_v29, %s1464_s29  ;;  %504 = vrot.lane.b32.xlu1 %v500_v13, %s1464_s29  ;;  %v476_v13 = vmul.f32 %v2006_v59, %v475_v45  ;;  %v752_v5 = vmul.f32 %v2006_v59, %v751_v63  ;;  %v277_v45 = vstv %s276_s8  ;;  %s2120_s8 = sld [smem:[#allocation2 + $0x2e]] }
  0xcd   : > { %v866_v2 = vpop.permute.xlu0 %865 }
  0xce   : > { %v330_v1 = vpop.permute.xlu1 %329  ;;  %v868_v32 = vadd.f32 %v866_v2, %v837_v12  ;;  %v869_v33 = vadd.f32 %v866_v2, %v838_v16 }
  0xd0   : > { %598 = vrot.lane.b32.xlu0 %v593_v22, %s1464_s29  ;;  %596 = vrot.lane.b32.xlu1 %v592_v57, %s1464_s29  ;;  %v659_v22 = vstv %s1197_s22  ;;  %s1183_s22 = sld [smem:[#allocation2 + $0x1c]] }
  0xd1   : > { %v332_v24 = vpop.permute.xlu0 %331  ;;  %v365_v63 = vstv %s2104_s30  ;;  %s1021_s30 = sshll.u32 %s2077_s7, 4  ;;  %s2196_s30 = int_to_ptr.vmem [resolvable:$true] %s1021_s30 }
  0xd2   : > { %v333_v23 = vsel %vm323_vm8, %v330_v1, %v332_v24  ;;  %v358_v38 = vpop.permute.xlu1 %357 }
  0xd3   : > { %v335_v17 = vadd.f32 %v333_v23, %v291_v3 }
  0xd4   : > { %690 = vrot.lane.b32.xlu0 %v685_v11, %s1464_s29  ;;  %688 = vrot.lane.b32.xlu1 %v684_v8, %s1464_s29 }
  0xd5   : > { %v2020_v28 = vadd.f32 %v1816_v60, %v335_v17  ;;  %v360_v26 = vpop.permute.xlu0 %359 }
  0xd6   : > { %v2023_v30 = vsel %vm323_vm8, %v358_v38, %v360_v26  ;;  %v946_v9 = vpop.permute.xlu1 %945 }
  0xd8   : > { %782 = vrot.lane.b32.xlu0 %v777_v51, %s1464_s29  ;;  %780 = vrot.lane.b32.xlu1 %v776_v19, %s1464_s29 }
  0xd9   : > { %v948_v34 = vpop.permute.xlu0 %947 }
  0xda   : > { %v949_v18 = vsel %vm323_vm8, %v946_v9, %v948_v34  ;;  %v422_v60 = vpop.permute.xlu1 %421 }
  0xdb   : > { %v951_v15 = vmax.f32 %v1856_v27, %v949_v18 }
  0xdc   : > { %874 = vrot.lane.b32.xlu0 %v869_v33, %s1464_s29  ;;  %872 = vrot.lane.b32.xlu1 %v868_v32, %s1464_s29  ;;  %v998_v33 = vstv %s1226_s24  ;;  %s2110_s24 = sld [smem:[#allocation2 + $0x25]] }
  0xdd   : > { %v953_v37 = vmax.f32 %v951_v15, %v952_v7  ;;  %v958_v42 = vpop.permute.xlu0 %957 }
  0xde   : > { %v960_v27 = vpop.permute.xlu1 %959 }
  0xdf   : > { %v954_v53 = vmax.f32 %v953_v37, %v2006_v59  ;;  %v961_v62 = vsel %vm323_vm8, %v958_v42, %v960_v27 }
  0xe0   : > { %910 = vrot.lane.b32.xlu0 %v1802_v56, %s1464_s29  ;;  %908 = vrot.lane.b32.xlu1 %v1819_v61, %s1464_s29  ;;  %s1219_s29 = sld [smem:[#allocation2 + $0x3a]] }
  0xe1   : > { %v424_v40 = vpop.permute.xlu0 %423  ;;  %v963_v7 = vmax.f32 %v954_v53, %v961_v62 }
  0xe2   : > { %v425_v0 = vsel %vm323_vm8, %v422_v60, %v424_v40  ;;  %v514_v47 = vpop.permute.xlu1 %513  ;;  %v280_v40 = vstv %s1152_s9  ;;  %s2124_s9 = sld [smem:[#allocation7 + $0x2]] }
  0xe3   : > { %v427_v46 = vadd.f32 %v425_v0, %v384_v43  ;;  %v972_v29 = vmax.f32 %v963_v7, %v1869_v6  ;;  %v281_v7 = vmul.f32 %v1742_v21, %v280_v40 }
  0xe5   : > { %v2046_v56 = vadd.f32 %v1880_v41, %v427_v46  ;;  %v516_v61 = vpop.permute.xlu0 %515  ;;  %v979_v52 = vmax.f32 %v972_v29, %v1952_v10  ;;  %v660_v41 = vmul.f32 %v2006_v59, %v659_v22  ;;  %v278_v46 = vmul.f32 %v277_v45, %v1625_v14 }
  0xe6   : > { %v517_v49 = vsel %vm323_vm8, %v514_v47, %v516_v61  ;;  %v606_v57 = vpop.permute.xlu1 %605  ;;  %v373_v29 = vstv %s1161_s11  ;;  %s2135_s11 = sld [smem:[#allocation2 + $0x37]] }
  0xe7   : > { %v519_v54 = vadd.f32 %v517_v49, %v476_v13  ;;  %v370_v13 = vstv %s1160_s10  ;;  %v374_v48 = vmul.f32 %v1742_v21, %v373_v29  ;;  %v310_v61 = vadd.f32 %v281_v7, %v278_v46  ;;  %s2132_s10 = sld [smem:[#allocation2 + $0x36]]  ;;  %v1326_v29 = vld [vmem:[%s1605_s21] sm:$0xff]  ;;  %s2168_s21 = sld [smem:[#allocation7 + $0x5]] }
  0xe8   : > { %v371_v47 = vmul.f32 %v370_v13, %v1625_v14  ;;  %v462_v49 = vstv %s1171_s12  ;;  %s2138_s12 = sld [smem:[#allocation7 + $0x3]] }
  0xe9   : > { %v2052_v25 = vadd.f32 %v1908_v44, %v519_v54  ;;  %v608_v6 = vpop.permute.xlu0 %607  ;;  %v843_v44 = vstv %s1219_s29  ;;  %s2108_s29 = sld [smem:[#allocation2 + $0x24]] }
  0xea   : > { %v609_v58 = vsel %vm323_vm8, %v606_v57, %v608_v6  ;;  %v698_v2 = vpop.permute.xlu1 %697  ;;  %v403_v22 = vadd.f32 %v374_v48, %v371_v47  ;;  %v554_v6 = vstv %s2096_s14  ;;  %s1224_s14 = sld [smem:[#allocation7 + $0x6]] }
  0xeb   : > { %v611_v4 = vadd.f32 %v609_v58, %v568_v31 }
  0xed   : > { %v2057_v3 = vadd.f32 %v1924_v20, %v611_v4  ;;  %v700_v10 = vpop.permute.xlu0 %699  ;;  %v844_v20 = vmul.f32 %v2006_v59, %v843_v44  ;;  %v1001_v59 = vstv %s1227_s26  ;;  %s2112_s26 = sld [smem:[#allocation7 + $0x1]]  ;;  %v463_v4 = vmul.f32 %v462_v49, %v1625_v14 }
  0xee   : > { %v701_v8 = vsel %vm323_vm8, %v698_v2, %v700_v10  ;;  %v790_v35 = vpop.permute.xlu1 %789  ;;  %v557_v2 = vstv %s1183_s22  ;;  %s1235_s22 = sshll.u32 %s1450_s18, 10  ;;  %s1465_s18 = smov [#allocation8]  }
  0xef   : > { %v703_v11 = vadd.f32 %v701_v8, %v660_v41  ;;  %v558_v44 = vmul.f32 %v1742_v21, %v557_v2 }
  0xf1   : > { %v2062_v1 = vadd.f32 %v1937_v39, %v703_v11  ;;  %v792_v24 = vpop.permute.xlu0 %791 }
  0xf2   : > { %v793_v23 = vsel %vm323_vm8, %v790_v35, %v792_v24  ;;  %v882_v17 = vpop.permute.xlu1 %881  ;;  %v646_v24 = vstv %s2108_s29 }
  0xf3   : > { %v795_v12 = vadd.f32 %v793_v23, %v752_v5  ;;  %v555_v5 = vmul.f32 %v554_v6, %v1625_v14  ;;  %v649_v23 = vstv %s2110_s24 }
  0xf5   : > { %v2067_v19 = vadd.f32 %v1955_v55, %v795_v12  ;;  %v884_v51 = vpop.permute.xlu0 %883 }
  0xf6   : > { %v885_v16 = vsel %vm323_vm8, %v882_v17, %v884_v51  ;;  %v991_v39 = vpop.permute.xlu1 %990 }
  0xf7   : > { %v887_v38 = vadd.f32 %v885_v16, %v844_v20 }
  0xf9   : > { %v2071_v26 = vadd.f32 %v1969_v50, %v887_v38  ;;  %v993_v32 = vpop.permute.xlu0 %992 }
  0xfa   : > { %v994_v9 = vsel %vm323_vm8, %v991_v39, %v993_v32  ;;  %v2082_v50 = vpop.permute.xlu1 %448  ;;  %v650_v32 = vmul.f32 %v1742_v21, %v649_v23 }
  0xfb   : > { %v996_v34 = vmax.f32 %v979_v52, %v994_v9  ;;  %v465_v52 = vstv %s1172_s13  ;;  %s2155_s13 = sld [smem:[#allocation7 + $0x4]] }
  0xfc   : > { %v466_v41 = vmul.f32 %v1742_v21, %v465_v52 }
  0xfd   : > { %v999_v18 = vmul.f32 %v998_v33, %v996_v34  ;;  %v2080_v60 = vpop.permute.xlu0 %450  ;;  %v587_v34 = vadd.f32 %v558_v44, %v555_v5 }
  0xfe   : > { %v2086_v37 = vpop.permute.xlu1 %540  ;;  %v495_v17 = vadd.f32 %v466_v41, %v463_v4  ;;  %v452_v33 = vsel %vm323_vm8, %v2082_v50, %v2080_v60 }
  0xff   : > { %v1002_v55 = vadd.f32 %v1001_v59, %v999_v18  ;;  %v738_v59 = vstv %s2116_s6  ;;  %s2201_s6 = scalar_lea.sflag [#allocation3], %s251_s5 }
 0x100   : > { %v739_v47 = vmul.f32 %v1326_v29, %v738_v59 }
 0x101   : > { %v1003_v15 = vmax.f32 %v1002_v55, 0.0  ;;  %v2084_v36 = vpop.permute.xlu0 %542 }
 0x102   : > { %v2090_v43 = vpop.permute.xlu1 %632  ;;  %v544_v46 = vsel %vm323_vm8, %v2086_v37, %v2084_v36 }
 0x103   : > { %1228 = vst [vmem:[%s2077_s7 + $0x38] sm:$0xff] %v1003_v15  ;;  %v741_v15 = vstv %s2120_s8  ;;  %s1372_s8 = scalar_lea.vmem %s2196_s30, 1024 }
 0x104   : > { %v742_v48 = vmul.f32 %v1742_v21, %v741_v15  ;;  %p1373_p13 = scmp.ne.s32.totalorder %s2196_s30, %s1372_s8 }
 0x105   : > { %v2088_v42 = vpop.permute.xlu0 %634 }
 0x106   : > { %v2094_v27 = vpop.permute.xlu1 %724  ;;  %v636_v6 = vsel %vm323_vm8, %v2090_v43, %v2088_v42  ;;  %v771_v4 = vadd.f32 %v742_v48, %v739_v47  ;;  %v732_v43 = vstv %s2155_s13  ;;  %p1374_p0 = pnand %p1373_p13, %p2267_p1 }
 0x108   : > { %p1375_p2 = pneg %p1374_p0 }
 0x109   : > { %v2092_v53 = vpop.permute.xlu0 %726 }
 0x10a   : > { %v2100_v0 = vpop.permute.xlu1 %816  ;;  %v728_v42 = vsel %vm323_vm8, %v2094_v27, %v2092_v53  ;;  %v824_v27 = vstv %s2168_s21 }
 0x10d   : > { %v2098_v62 = vpop.permute.xlu0 %818 }
 0x10e   : > { %v820_v53 = vsel %vm323_vm8, %v2100_v0, %v2098_v62 }
 0x136   : > { %v322_v54 = vpop.permute.xlu0 %321  ;;  %v320_v31 = vpop.permute.xlu1 %319 }
 0x137   : > { %v324_v57 = vsel %vm323_vm8, %v320_v31, %v322_v54  ;;  %v833_v54 = vstv %s2135_s11 }
 0x138   : > { %v326_v58 = vadd.f32 %v324_v57, %v310_v61  ;;  %v640_v57 = vstv %s2138_s12 }
 0x13a   : > { %v346_v10 = vadd.f32 %v2020_v28, %v326_v58  ;;  %v415_v8 = vpop.permute.xlu0 %414  ;;  %v413_v11 = vpop.permute.xlu1 %412  ;;  %v456_v28 = vstv %s2112_s26  ;;  %s2194_s26 = scalar_lea.hbm %s2251_s4, %s1235_s22 }
 0x13b   : > { %v416_v35 = vsel %vm323_vm8, %v413_v11, %v415_v8  ;;  %v834_v8 = vmul.f32 %v1742_v21, %v833_v54 }
 0x13c   : > { %v363_v12 = vadd.f32 %v2023_v30, %v346_v10  ;;  %v418_v20 = vadd.f32 %v416_v35, %v403_v22  ;;  %v647_v30 = vmul.f32 %v646_v24, %v1625_v14  ;;  %v548_v14 = vstv %s2124_s9  ;;  %s1376_s9 = sshll.u32 %s1465_s18, 4  ;;  %s1377_s9 = int_to_ptr.vmem [resolvable:$false] %s1376_s9 }
 0x13d   : > { %p1379_p3 = scmp.lt.s32.totalorder %s2196_s30, %s1377_s9 }
 0x13e   : > { %v366_v51 = vadd.f32 %v365_v63, %v363_v12  ;;  %v437_v16 = vadd.f32 %v2046_v56, %v418_v20  ;;  %v507_v38 = vpop.permute.xlu0 %506  ;;  %v505_v39 = vpop.permute.xlu1 %504  ;;  %v679_v50 = vadd.f32 %v650_v32, %v647_v30 }
 0x13f   : > { %v508_v9 = vsel %vm323_vm8, %v505_v39, %v507_v38 }
 0x140   : > { %v367_v18 = vmax.f32 %v366_v51, 0.0  ;;  %v454_v56 = vadd.f32 %v452_v33, %v437_v16  ;;  %v510_v55 = vadd.f32 %v508_v9, %v495_v17  ;;  %v916_v9 = vstv %s1224_s14 }
 0x142   : > { %368 = vst [vmem:[%s2077_s7] sm:$0xff] %v367_v18  ;;  %v457_v45 = vadd.f32 %v456_v28, %v454_v56  ;;  %v529_v40 = vadd.f32 %v2052_v25, %v510_v55  ;;  %v599_v7 = vpop.permute.xlu0 %598  ;;  %v597_v60 = vpop.permute.xlu1 %596  ;;  %v830_v25 = vstv %s2132_s10  ;;  %s1378_s10 = scalar_lea.vmem %s1377_s9, 2048 }
 0x143   : > { %v600_v13 = vsel %vm323_vm8, %v597_v60, %v599_v7  ;;  %v831_v41 = vmul.f32 %v1326_v29, %v830_v25  ;;  %p1380_p5 = scmp.lt.s32.totalorder %s1378_s10, %s1372_s8 }
 0x144   : > { %v458_v61 = vmax.f32 %v457_v45, 0.0  ;;  %v546_v49 = vadd.f32 %v544_v46, %v529_v40  ;;  %v602_v52 = vadd.f32 %v600_v13, %v587_v34 }
 0x145   : > { %v863_v21 = vadd.f32 %v834_v8, %v831_v41  ;;  %p1381_p6 = por %p1380_p5, %p1379_p3 }
 0x146   : > { %1170 = vst [vmem:[%s2077_s7 + $0x8] sm:$0xff] %v458_v61  ;;  %v549_v31 = vadd.f32 %v548_v14, %v546_v49  ;;  %v621_v22 = vadd.f32 %v2057_v3, %v602_v52  ;;  %v691_v36 = vpop.permute.xlu0 %690  ;;  %v689_v37 = vpop.permute.xlu1 %688 }
 0x147   : > { %v692_v58 = vsel %vm323_vm8, %v689_v37, %v691_v36  ;;  %p1382_p7 = pnand %p1381_p6, %p1375_p2 }
 0x148   : > { %v550_v2 = vmax.f32 %v549_v31, 0.0  ;;  %v638_v63 = vadd.f32 %v636_v6, %v621_v22  ;;  %v694_v10 = vadd.f32 %v692_v58, %v679_v50 }
 0x14a   : > { %1181 = vst [vmem:[%s2077_s7 + $0x10] sm:$0xff] %v550_v2  ;;  %v641_v3 = vadd.f32 %v640_v57, %v638_v63  ;;  %v713_v11 = vadd.f32 %v2062_v1, %v694_v10  ;;  %v783_v5 = vpop.permute.xlu0 %782  ;;  %v781_v35 = vpop.permute.xlu1 %780 }
 0x14b   : > { %v784_v44 = vsel %vm323_vm8, %v781_v35, %v783_v5 }
 0x14c   : > { %v642_v24 = vmax.f32 %v641_v3, 0.0  ;;  %v730_v23 = vadd.f32 %v728_v42, %v713_v11  ;;  %v786_v12 = vadd.f32 %v784_v44, %v771_v4 }
 0x14e   : > { %1192 = vst [vmem:[%s2077_s7 + $0x18] sm:$0xff] %v642_v24  ;;  %v733_v20 = vadd.f32 %v732_v43, %v730_v23  ;;  %v805_v1 = vadd.f32 %v2067_v19, %v786_v12  ;;  %v875_v17 = vpop.permute.xlu0 %874  ;;  %v873_v28 = vpop.permute.xlu1 %872 }
 0x14f   : > { %v876_v51 = vsel %vm323_vm8, %v873_v28, %v875_v17 }
 0x150   : > { %v734_v16 = vmax.f32 %v733_v20, 0.0  ;;  %v822_v38 = vadd.f32 %v820_v53, %v805_v1  ;;  %v878_v39 = vadd.f32 %v876_v51, %v863_v21 }
 0x152   : > { %1203 = vst [vmem:[%s2077_s7 + $0x20] sm:$0xff] %v734_v16  ;;  %v825_v30 = vadd.f32 %v824_v27, %v822_v38  ;;  %v911_v19 = vpop.permute.xlu0 %910  ;;  %v897_v32 = vadd.f32 %v2071_v26, %v878_v39  ;;  %v909_v33 = vpop.permute.xlu1 %908 }
 0x153   : > { %v912_v62 = vsel %vm323_vm8, %v909_v33, %v911_v19 }
 0x154   : > { %v826_v0 = vmax.f32 %v825_v30, 0.0  ;;  %v914_v34 = vadd.f32 %v912_v62, %v897_v32 }
 0x156   : > { %1214 = vst [vmem:[%s2077_s7 + $0x28] sm:$0xff] %v826_v0  ;;  %v917_v59 = vadd.f32 %v916_v9, %v914_v34 }
 0x158   : > { %v918_v26 = vmax.f32 %v917_v59, 0.0 }
 0x15a   : > { %1225 = vst [vmem:[%s2077_s7 + $0x30] sm:$0xff] %v918_v26 }
 0x15b   : > { %1385 = shalt.err (!%p1382_p7)
}
 0x15c   : > { %s1386_s5 = scalar_lea.hbm %s2194_s26, 1024  ;;  %s1390_s12 = scalar_lea.hbm %s2251_s4, 2048 }
 0x15d   : > { %p1387_p9 = scmp.ne.s32.totalorder %s2194_s26, %s1386_s5  ;;  %p1391_p4 = scmp.lt.u32.totalorder %s2194_s26, %s2251_s4 }
 0x15e   : > { %p1392_p10 = scmp.lt.u32.totalorder %s1390_s12, %s1386_s5  ;;  %p1394_p13 = scmp.lt.u32.totalorder %s1386_s5, %s2194_s26 }
 0x15f   : > { %p1388_p8 = pnand %p1387_p9, %p2267_p1 }
 0x160   : > { %p1393_p11 = por %p1392_p10, %p1391_p4 }
 0x161   : > { %p1389_p12 = pneg %p1388_p8 }
 0x162   : > { %p1395_p0 = por %p1394_p13, %p1393_p11 }
 0x164   : > { %p1396_p2 = pnand %p1395_p0, %p1389_p12 }
 0x166   : > { %1399 = shalt.err (!%p1396_p2)
}
 0x167   : > { %s1466_s14 = smov 128   ;;  %s1467_s22 = smov 8  }
 0x168   : > { %1248 = dma.vmem_to_hbm [thread:$0]  (%p2267_p1), %s2196_s30, 1024, %s2194_s26, %s2201_s6, %s1466_s14, %s1466_s14, %s1467_s22  }
 0x169 PF: > { %p1270_p3 = scmp.ge.s32.totalorder %s1458_s20, 2  ;;  %s1036_s29 = sand.u32 1, %s1438_s15  }
 0x16a   : > { %p2268_p5 = scmp.ne.s32.totalorder %s2257_s27, 0  ;;  %s1037_s24 = scalar_lea.sflag [#allocation3], %s1036_s29 }
 0x16c   : > { %p1261_p6 = pnand %p1270_p3, %p2268_p5 }
 0x16e   : > { %1433 = dma.done.wait (!%p1261_p6), %s1037_s24, 1024  }
 0x16f   : > { %1435 = vsyncadd (!%p1261_p6), %s1037_s24, 4294966272  ;;  %s19_s20 = sadd.s32 1, %s1458_s20   ;;  %s2269_s15 = smov %s1442_s16 }
 0x170   : > { %p16_p7 = scmp.ge.s32.totalorder %s19_s20, 4   ;;  %s2270_s16 = smov %s1446_s17 }
 0x171   : > { %s2271_s17 = smov %s1546_s28  ;;  %s2272_s18 = smov %s1454_s19 }
 0x172   : > { %s2273_s19 = smov %s2275_s23  ;;  %18 = sbr.rel (!%p16_p7) target bundleno = 6 (0x6), region = 94 }
 0x179   :  { %1042 = vsyncpa [#allocation3], 1 }
 0x17a   :  { %1044 = vsyncpa [#allocation3 + $0x1], 1 }
 0x17b   :  { %1045 = vsyncpa [#allocation4], 1 }
 0x17c   :  { %1047 = vsyncpa [#allocation4 + $0x1], 1 }
 0x17d   :  { %1048 = vsyncpa [#allocation6], 1 }

// kernel: initial_block.2
= control target key start
LH: loop header
LB: loop body
LE: loop exit
PB: predicated region body
PF: predicated region fallthrough
CT: control target
= control target key end

     0   :  { %7 = vsyncpa [#allocation3], 0  ;;  %s1409_s9 = smov 0   ;;  %s1411_s10 = smov 0   ;;  %s2039_s0 = inlined_call_operand.vmem [shape: f32[2,1,4,9,129], index: 0, kind: input, shape index: {}]   ;;  %s2040_s1 = inlined_call_operand.vmem [shape: f32[63], index: 1, kind: input, shape index: {}]   ;;  %s2041_s2 = inlined_call_operand.vmem [shape: f32[2,1,1,16], index: 2, kind: output, shape index: {}]  }
   0x1   :  { %s1413_s11 = smov 0  }
   0x2 LB: > { %s1197_s12 = sadd.s32 4294967295, %s1389_s11   ;;  %s25_s13 = sadd.s32 1, %s1385_s10  ;;  %s1389_s11 = sphi %s1413_s11, %s13_s11   ;;  %s1385_s10 = sphi %s1411_s10, %s2049_s10   ;;  %s1381_s9 = sphi %s1409_s9, %s2048_s9  }
   0x3   : > { %p27_p0 = scmp.ge.s32.totalorder %s25_s13, 2  ;;  %p1199_p1 = scmp.ge.s32.totalorder %s1389_s11, 1 }
   0x4   : > { %p107_p2 = scmp.lt.s32.totalorder %s1389_s11, 3  ;;  %p1434_p4 = scmp.eq.s32.totalorder %s1197_s12, 0 }
   0x5   : > { %s2051_s13 = smov (%p27_p0, %s25_s13), 0  ;;  %s120_s18 = sshll.u32 %s2040_s1, 4  ;;  %s121_s18 = int_to_ptr.vmem [resolvable:$true] %s120_s18 }
   0x6   : > { %p1430_p3 = pnand %p1199_p1, %p107_p2  ;;  %s1348_s19 = scalar_lea.vmem %s121_s18, 16 }
   0x7   : > { %p1349_p7 = scmp.ne.s32.totalorder %s121_s18, %s1348_s19  ;;  %p1356_p11 = scmp.lt.s32.totalorder %s121_s18, %s121_s18 }
   0x8   : > { %p1312_p5 = pneg %p1430_p3  ;;  %p1357_p12 = scmp.lt.s32.totalorder %s1348_s19, %s1348_s19 }
   0xa   : > { %p1313_p6 = pnand %p1434_p4, %p1312_p5  ;;  %p1358_p13 = por %p1357_p12, %p1356_p11 }
   0xc   : > { %p1350_p8 = pneg %p1313_p6 }
   0xe   : > { %p1351_p9 = pnand %p1350_p8, %p1349_p7 }
  0x10   : > { %p1352_p10 = pneg %p1351_p9 }
  0x12   : > { %p1359_p0 = pnand %p1358_p13, %p1352_p10 }
  0x14   : > { %1362 = shalt.err (!%p1359_p0)
}
  0x15   : > { %s1391_s20 = smov [#allocation2]   ;;  %145 = sbr.rel (%p1430_p3) target bundleno = 547 (0x223), region = 28 }
  0x16   : > { %1315 = dma.vmem_to_smem (!%p1313_p6), %s121_s18, 16, %s1391_s20, [#allocation3]  }
  0x1c   : > { %1376 = dma.done.wait (%p1434_p4), [#allocation3], 16  }
  0x1d   : > { %1378 = vsyncadd (%p1434_p4), [#allocation3], 4294967280 }
  0x1e   : > { %151 = sfence }
  0x1f   : > { %p173_p1 = scmp.lt.s32.totalorder %s1381_s9, 1  ;;  %s1213_s21 = sld [smem:[#allocation2 + $0x3]]  ;;  %vm274_vm0 = vcmask 1046528   ;;  %v201_v42 = vlaneseq  ;;  %vm257_vm4 = vcmask 1039360  }
  0x20   : > { %s1215_s22 = sld [smem:[#allocation2 + $0x5]]  ;;  %s1455_s23 = sld [smem:[#allocation2 + $0xc]] }
  0x21   : > { %s2053_s9 = smov (!%p173_p1, %s1381_s9), 1  ;;  %s1218_s25 = sld [smem:[#allocation2 + $0x8]]  ;;  %v202_v51 = vshrl.u32 %v201_v42, 7 }
  0x22   : > { %s1275_s24 = sshll.u32 %s2053_s9, 7  ;;  %s1392_s29 = smov 1  }
  0x23   : > { %s1461_s28 = scalar_lea.vmem %s2039_s0, %s1275_s24  ;;  %s1485_s30 = sld [smem:[#allocation2 + $0xe]]  ;;  %v1010_v62 = vmul.u32 2, %v202_v51 }
  0x24   : > { %v1464_v0 = vld [vmem:[%s1461_s28 + $0x40] sm:$0xff]  ;;  %v1467_v2 = vld [vmem:[%s1461_s28 + $0x48] sm:$0xff]  ;;  %v1478_v8 = vld [vmem:[%s1461_s28 + $0x18] sm:$0x1]  ;;  %s1393_s3 = smov 127   ;;  %s1489_s4 = sld [smem:[#allocation2 + $0x15]] }
  0x25   : > { %v221_v1 = vstv %s1213_s21  ;;  %v1471_v4 = vld [vmem:[%s1461_s28] sm:$0xff]  ;;  %v1475_v7 = vld [vmem:[%s1461_s28 + $0x8] sm:$0xff]  ;;  %v1481_v9 = vld [vmem:[%s1461_s28 + $0x10] sm:$0x1]  ;;  %s1227_s5 = sld [smem:[#allocation2 + $0x11]]  ;;  %s1495_s6 = sld [smem:[#allocation2 + $0x1e]] }
  0x26   : > { %v222_v3 = vmul.f32 %v1464_v0, %v221_v1  ;;  %v227_v5 = vstv %s1215_s22  ;;  %v337_v11 = vstv %s1455_s23  ;;  %s1236_s7 = sld [smem:[#allocation2 + $0x1a]]  ;;  %s1501_s8 = sld [smem:[#allocation2 + $0x27]] }
  0x27   : > { %v228_v6 = vmul.f32 %v1464_v0, %v227_v5  ;;  %v229_v10 = vmul.f32 %v1467_v2, %v227_v5  ;;  %v239_v12 = vstv %s1218_s25  ;;  %v338_v17 = vmul.f32 %v1464_v0, %v337_v11  ;;  %s1245_s12 = sld [smem:[#allocation2 + $0x23]]  ;;  %s1513_s14 = sld [smem:[#allocation2 + $0x30]] }
  0x28   : > { %246 = vrot.lane.b32.xlu0 %v222_v3, %s1392_s29  ;;  %v241_v13 = vmul.f32 %v239_v12, %v1475_v7  ;;  %v243_v14 = vmul.f32 %v239_v12, %v1478_v8  ;;  %v240_v15 = vmul.f32 %v239_v12, %v1471_v4  ;;  %v242_v16 = vmul.f32 %v239_v12, %v1481_v9  ;;  %s1254_s15 = sld [smem:[#allocation2 + $0x2c]]  ;;  %s1532_s16 = sld [smem:[#allocation2 + $0x32]] }
  0x29   : > { %263 = vrot.lane.b32.xlu1 %v228_v6, %s1393_s3  ;;  %v343_v23 = vstv %s1485_s30  ;;  %s1540_s17 = sld [smem:[#allocation2 + $0x39]]  ;;  %s1263_s18 = sld [smem:[#allocation2 + $0x35]]  ;;  %v1011_v12 = vadd.s32 4294967295, %v1010_v62  ;;  %v1657_v62 = vld [vmem:[%s1461_s28 + $0x30] sm:$0x1] }
  0x2a   : > { %v285_v18 = vrot.slane %v240_v15, 1  ;;  %v286_v19 = vrot.slane %v242_v16, 1  ;;  %v288_v20 = vrot.slane %v241_v13, 1  ;;  %v289_v21 = vrot.slane %v243_v14, 1  ;;  %s1561_s19 = sld [smem:[#allocation2 + $0x17]]  ;;  %s1569_s20 = sld [smem:[#allocation2 + $0x3b]] }
  0x2b   : > { %v451_v25 = vstv %s1489_s4  ;;  %v344_v26 = vmul.f32 %v1464_v0, %v343_v23  ;;  %v355_v27 = vstv %s1227_s5  ;;  %v565_v30 = vstv %s1495_s6  ;;  %s1584_s21 = sld [smem:[#allocation2 + $0x20]]  ;;  %s1272_s22 = sld [smem:[#allocation2 + $0x3e]] }
  0x2c   : > { %265 = vrot.lane.b32.xlu0 %v229_v10, %s1393_s3  ;;  %v287_v22 = vsel %vm274_vm0, %v285_v18, %v286_v19  ;;  %v290_v24 = vsel %vm274_vm0, %v288_v20, %v289_v21  ;;  %v356_v28 = vmul.f32 %v355_v27, %v1471_v4  ;;  %v358_v29 = vmul.f32 %v355_v27, %v1481_v9  ;;  %s1251_s23 = sld [smem:[#allocation2 + $0x29]]  ;;  %s1216_s24 = sld [smem:[#allocation2 + $0x6]] }
  0x2d   : > { %291 = vrot.lane.b32.xlu1 %v287_v22, %s1393_s3  ;;  %v1516_v31 = vstv %s1236_s7  ;;  %v357_v32 = vmul.f32 %v355_v27, %v1475_v7  ;;  %v359_v33 = vmul.f32 %v355_v27, %v1478_v8  ;;  %v452_v34 = vmul.f32 %v1464_v0, %v451_v25  ;;  %s1217_s25 = sld [smem:[#allocation2 + $0x7]]  ;;  %s1212_s26 = sld [smem:[#allocation2 + $0x2]] }
  0x2e   : > { %v399_v35 = vrot.slane %v356_v28, 1  ;;  %v400_v36 = vrot.slane %v358_v29, 1  ;;  %v471_v37 = vmul.f32 %v1516_v31, %v1475_v7  ;;  %v473_v41 = vmul.f32 %v1516_v31, %v1478_v8  ;;  %s1214_s27 = sld [smem:[#allocation2 + $0x4]]  ;;  %s1239_s4 = sld [smem:[#allocation2 + $0x1d]] }
  0x2f   : > { %v402_v38 = vrot.slane %v357_v32, 1  ;;  %v403_v39 = vrot.slane %v359_v33, 1  ;;  %v566_v43 = vmul.f32 %v1464_v0, %v565_v30  ;;  %v679_v44 = vstv %s1501_s8  ;;  %s1230_s30 = sld [smem:[#allocation2 + $0x14]]  ;;  %s1248_s5 = sld [smem:[#allocation2 + $0x26]] }
  0x30   : > { %362 = vrot.lane.b32.xlu0 %v338_v17, %s1392_s29  ;;  %v401_v40 = vsel %vm274_vm0, %v399_v35, %v400_v36  ;;  %v516_v45 = vrot.slane %v471_v37, 1  ;;  %v1530_v46 = vstv %s1245_s12  ;;  %v517_v48 = vrot.slane %v473_v41, 1  ;;  %s1681_s6 = sld [smem:[#allocation2 + $0x2f]]  ;;  %s1687_s7 = sld [smem:[#allocation2 + $0x38]] }
  0x31   : > { %378 = vrot.lane.b32.xlu1 %v344_v26, %s1393_s3  ;;  %v404_v47 = vsel %vm274_vm0, %v402_v38, %v403_v39  ;;  %v584_v49 = vmul.f32 %v1530_v46, %v1471_v4  ;;  %v586_v50 = vmul.f32 %v1530_v46, %v1481_v9  ;;  %v680_v52 = vmul.f32 %v1464_v0, %v679_v44  ;;  %s1211_s8 = sld [smem:[#allocation2 + $0x1]]  ;;  %s1225_s12 = sld [smem:[#allocation2 + $0xf]] }
  0x32   : > { %v793_v53 = vstv %s1513_s14  ;;  %v518_v54 = vsel %vm274_vm0, %v516_v45, %v517_v48  ;;  %v697_v55 = vstv %s1254_s15  ;;  %v799_v1 = vstv %s1532_s16  ;;  %s1226_s14 = sld [smem:[#allocation2 + $0x10]]  ;;  %s1779_s16 = sld [smem:[#allocation2 + $0x19]] }
  0x33   : > { %v627_v56 = vrot.slane %v584_v49, 1  ;;  %v628_v57 = vrot.slane %v586_v50, 1  ;;  %v699_v58 = vmul.f32 %v697_v55, %v1475_v7  ;;  %v701_v59 = vmul.f32 %v697_v55, %v1478_v8  ;;  %s1777_s15 = sld [smem:[#allocation2 + $0x18]] }
  0x34   : > { %293 = vrot.lane.b32.xlu0 %v290_v24, %s1393_s3  ;;  %v794_v63 = vmul.f32 %v1464_v0, %v793_v53  ;;  %v698_v5 = vmul.f32 %v697_v55, %v1471_v4  ;;  %v700_v6 = vmul.f32 %v697_v55, %v1481_v9  ;;  %v907_v11 = vstv %s1540_s17  ;;  %s1781_s17 = sld [smem:[#allocation2 + $0xd]] }
  0x35   : > { %405 = vrot.lane.b32.xlu1 %v401_v40, %s1393_s3  ;;  %v744_v60 = vrot.slane %v699_v58, 1  ;;  %v745_v61 = vrot.slane %v701_v59, 1  ;;  %v629_v3 = vsel %vm274_vm0, %v627_v56, %v628_v57  ;;  %v800_v13 = vmul.f32 %v1464_v0, %v799_v1 }
  0x36   : > { %v908_v14 = vmul.f32 %v1464_v0, %v907_v11  ;;  %v741_v15 = vrot.slane %v698_v5, 1  ;;  %v742_v16 = vrot.slane %v700_v6, 1  ;;  %vm1012_vm1 = vcmp.ge.s32.totalorder %v1011_v12, 0 }
  0x37   : > { %v1558_v10 = vsel %vm274_vm0, %v744_v60, %v745_v61  ;;  %vm1013_vm2 = vcmp.lt.s32.totalorder %v1011_v12, 16  ;;  %v1571_v17 = vstv %s1263_s18  ;;  %v345_v19 = vmul.f32 %v1467_v2, %v343_v23  ;;  %v1654_v61 = vld [vmem:[%s1461_s28 + $0x20] sm:$0xff]  ;;  %s1789_s18 = sld [smem:[#allocation2 + $0x9]] }
  0x38   : > { %476 = vrot.lane.b32.xlu0 %v452_v34, %s1392_s29  ;;  %v813_v18 = vmul.f32 %v1571_v17, %v1475_v7  ;;  %v743_v20 = vsel %vm274_vm0, %v741_v15, %v742_v16  ;;  %v815_v21 = vmul.f32 %v1571_v17, %v1478_v8  ;;  %v457_v22 = vstv %s1561_s19  ;;  %vm1586_vm3 = vmand %vm1012_vm1, %vm1013_vm2  ;;  %s1791_s19 = sld [smem:[#allocation2 + $0xa]] }
  0x39   : > { %407 = vrot.lane.b32.xlu1 %v404_v47, %s1393_s3  ;;  %v458_v23 = vmul.f32 %v1464_v0, %v457_v22  ;;  %v1024_v27 = vsel %vm1586_vm3, %v1471_v4, -inf  ;;  %v913_v28 = vstv %s1569_s20  ;;  %v1604_v32 = vstv %s1272_s22  ;;  %s1793_s20 = sld [smem:[#allocation2 + $0x21]]  ;;  %s1801_s22 = sld [smem:[#allocation2 + $0x22]] }
  0x3a   : > { %v858_v25 = vrot.slane %v813_v18, 1  ;;  %v859_v26 = vrot.slane %v815_v21, 1  ;;  %v914_v30 = vmul.f32 %v1464_v0, %v913_v28  ;;  %v459_v33 = vmul.f32 %v1467_v2, %v457_v22 }
  0x3b   : > { %v927_v34 = vmul.f32 %v1604_v32, %v1475_v7  ;;  %v929_v35 = vmul.f32 %v1604_v32, %v1478_v8  ;;  %v571_v36 = vstv %s1584_s21  ;;  %v470_v41 = vmul.f32 %v1516_v31, %v1471_v4  ;;  %s1799_s21 = sld [smem:[#allocation2 + $0x16]] }
  0x3c   : > { %590 = vrot.lane.b32.xlu0 %v566_v43, %s1392_s29  ;;  %v1598_v29 = vsel %vm274_vm0, %v858_v25, %v859_v26  ;;  %v572_v39 = vmul.f32 %v1464_v0, %v571_v36  ;;  %v472_v43 = vmul.f32 %v1516_v31, %v1481_v9  ;;  %v1070_v44 = vrot.slane %v1475_v7, 1 }
  0x3d   : > { %521 = vrot.lane.b32.xlu1 %v518_v54, %s1393_s3  ;;  %v972_v37 = vrot.slane %v927_v34, 1  ;;  %v973_v38 = vrot.slane %v929_v35, 1  ;;  %v1071_v45 = vrot.slane %v1478_v8, 1  ;;  %v573_v48 = vmul.f32 %v1467_v2, %v571_v36 }
  0x3e   : > { %v513_v49 = vrot.slane %v470_v41, 1  ;;  %v514_v50 = vrot.slane %v472_v43, 1  ;;  %v685_v31 = vstv %s1251_s23  ;;  %v585_v53 = vmul.f32 %v1530_v46, %v1475_v7  ;;  %s1810_s23 = sld [smem:[#allocation2 + $0x12]] }
  0x3f   : > { %v1617_v40 = vsel %vm274_vm0, %v972_v37, %v973_v38  ;;  %v1626_v47 = vsel %vm274_vm0, %v1070_v44, %v1071_v45  ;;  %v587_v54 = vmul.f32 %v1530_v46, %v1478_v8  ;;  %v687_v55 = vmul.f32 %v1467_v2, %v685_v31 }
  0x40   : > { %704 = vrot.lane.b32.xlu0 %v680_v52, %s1392_s29  ;;  %v515_v51 = vsel %vm274_vm0, %v513_v49, %v514_v50  ;;  %v686_v52 = vmul.f32 %v1464_v0, %v685_v31  ;;  %v630_v56 = vrot.slane %v585_v53, 1  ;;  %v801_v59 = vmul.f32 %v1467_v2, %v799_v1 }
  0x41   : > { %633 = vrot.lane.b32.xlu1 %v629_v3, %s1393_s3  ;;  %v631_v57 = vrot.slane %v587_v54, 1  ;;  %v1025_v8 = vsel %vm1586_vm3, %v1475_v7, -inf  ;;  %v231_v46 = vstv %s1216_s24  ;;  %v235_v60 = vstv %s1217_s25  ;;  %s1812_s24 = sld [smem:[#allocation2 + $0x13]]  ;;  %s1819_s25 = sld [smem:[#allocation2 + $0x1f]] }
  0x42   : > { %v233_v1 = vmul.f32 %v231_v46, %v1481_v9  ;;  %v236_v3 = vmul.f32 %v1654_v61, %v235_v60  ;;  %v237_v5 = vmul.f32 %v1657_v62, %v235_v60  ;;  %v217_v6 = vstv %s1212_s26  ;;  %s1821_s26 = sld [smem:[#allocation2 + $0x2a]] }
  0x43   : > { %v632_v58 = vsel %vm274_vm0, %v630_v56, %v631_v57  ;;  %v219_v11 = vmul.f32 %v217_v6, %v1475_v7  ;;  %v224_v15 = vstv %s1214_s27  ;;  %s1829_s27 = sld [smem:[#allocation2 + $0x2b]] }
  0x44   : > { %818 = vrot.lane.b32.xlu0 %v794_v63, %s1392_s29  ;;  %v232_v63 = vmul.f32 %v231_v46, %v1471_v4 }
  0x45   : > { %834 = vrot.lane.b32.xlu1 %v800_v13, %s1393_s3  ;;  %v271_v13 = vadd.f32 %v237_v5, %v233_v1 }
  0x46   : > { %v270_v12 = vadd.f32 %v236_v3, %v232_v63 }
  0x47   : > { %v276_v21 = vrot.slane %v271_v13, 1 }
  0x48   : > { %932 = vrot.lane.b32.xlu0 %v908_v14, %s1392_s29  ;;  %s1221_s29 = sld [smem:[#allocation2 + $0xb]]  ;;  %v1666_v14 = vld [vmem:[%s1461_s28 + $0x60] sm:$0xff] }
  0x49   : > { %747 = vrot.lane.b32.xlu1 %v743_v20, %s1393_s3  ;;  %v275_v20 = vrot.slane %v270_v12, 1  ;;  %v225_v25 = vmul.f32 %v1666_v14, %v224_v15 }
  0x4c   : > { %380 = vrot.lane.b32.xlu0 %v345_v19, %s1393_s3 }
  0x4d   : > { %1028 = vrot.lane.b32.xlu1 %v1024_v27, %s1393_s3 }
  0x4e   : > { %v333_v26 = vstv %s1221_s29  ;;  %s1838_s29 = sld [smem:[#allocation2 + $0x28]] }
  0x4f   : > { %v335_v37 = vmul.f32 %v333_v26, %v1475_v7 }
  0x50   : > { %492 = vrot.lane.b32.xlu0 %v458_v23, %s1393_s3 }
  0x51   : > { %948 = vrot.lane.b32.xlu1 %v914_v30, %s1393_s3  ;;  %v277_v30 = vsel %vm274_vm0, %v275_v20, %v276_v21  ;;  %v926_v20 = vmul.f32 %v1604_v32, %v1471_v4  ;;  %v928_v21 = vmul.f32 %v1604_v32, %v1481_v9  ;;  %v1067_v32 = vrot.slane %v1471_v4, 1 }
  0x54   : > { %494 = vrot.lane.b32.xlu0 %v459_v33, %s1393_s3  ;;  %v334_v33 = vmul.f32 %v333_v26, %v1471_v4  ;;  %v970_v26 = vrot.slane %v928_v21, 1 }
  0x58   : > { %606 = vrot.lane.b32.xlu0 %v572_v39, %s1393_s3  ;;  %v447_v39 = vstv %s1230_s30  ;;  %s1847_s30 = sld [smem:[#allocation2 + $0x1b]] }
  0x59   : > { %v448_v44 = vmul.f32 %v447_v39, %v1471_v4  ;;  %v449_v49 = vmul.f32 %v447_v39, %v1475_v7 }
  0x5c   : > { %608 = vrot.lane.b32.xlu0 %v573_v48, %s1393_s3  ;;  %v561_v48 = vstv %s1239_s4  ;;  %s1849_s4 = sld [smem:[#allocation2 + $0x1c]] }
  0x5d   : > { %v562_v31 = vmul.f32 %v561_v48, %v1471_v4 }
  0x60   : > { %519 = vrot.lane.b32.xlu0 %v515_v51, %s1393_s3  ;;  %v675_v51 = vstv %s1248_s5  ;;  %s1858_s5 = sld [smem:[#allocation2 + $0x33]] }
  0x61   : > { %v676_v54 = vmul.f32 %v675_v51, %v1471_v4  ;;  %v677_v63 = vmul.f32 %v675_v51, %v1475_v7 }
  0x64   : > { %720 = vrot.lane.b32.xlu0 %v686_v52, %s1393_s3 }
  0x68   : > { %722 = vrot.lane.b32.xlu0 %v687_v55, %s1393_s3  ;;  %v789_v55 = vstv %s1681_s6  ;;  %s1860_s6 = sld [smem:[#allocation2 + $0x34]] }
  0x69   : > { %v790_v60 = vmul.f32 %v789_v55, %v1471_v4  ;;  %v791_v12 = vmul.f32 %v789_v55, %v1475_v7 }
  0x6c   : > { %635 = vrot.lane.b32.xlu0 %v632_v58, %s1393_s3  ;;  %v812_v58 = vmul.f32 %v1571_v17, %v1471_v4 }
  0x6e   : > { %v855_v3 = vrot.slane %v812_v58, 1 }
  0x70   : > { %836 = vrot.lane.b32.xlu0 %v801_v59, %s1393_s3  ;;  %v814_v59 = vmul.f32 %v1571_v17, %v1481_v9 }
  0x72   : > { %v856_v5 = vrot.slane %v814_v59, 1  ;;  %v347_v59 = vstv %s1225_s12  ;;  %s1893_s12 = sld [smem:[#allocation2 + $0x2e]] }
  0x74   : > { %749 = vrot.lane.b32.xlu0 %v1558_v10, %s1393_s3  ;;  %v218_v10 = vmul.f32 %v217_v6, %v1471_v4  ;;  %v903_v6 = vstv %s1687_s7  ;;  %v857_v15 = vsel %vm274_vm0, %v855_v3, %v856_v5  ;;  %s1870_s7 = sld [smem:[#allocation2 + $0x24]] }
  0x75   : > { %v904_v13 = vmul.f32 %v903_v6, %v1471_v4 }
  0x78   : > { %1030 = vrot.lane.b32.xlu0 %v1025_v8, %s1393_s3  ;;  %v563_v8 = vmul.f32 %v561_v48, %v1475_v7 }
  0x9a   : > { %v247_v16 = vpop.permute.xlu0 %246 }
  0x9b   : > { %v249_v18 = vadd.f32 %v247_v16, %v218_v10  ;;  %v250_v19 = vadd.f32 %v247_v16, %v219_v11  ;;  %v264_v22 = vpop.permute.xlu1 %263 }
  0x9d   : > { %255 = vrot.lane.b32.xlu1 %v250_v19, %s1393_s3  ;;  %253 = vrot.lane.b32.xlu0 %v249_v18, %s1393_s3 }
  0x9e   : > { %v266_v23 = vpop.permute.xlu0 %265 }
  0x9f   : > { %v267_v27 = vsel %vm257_vm4, %v264_v22, %v266_v23  ;;  %v915_v22 = vmul.f32 %v1467_v2, %v913_v28  ;;  %v905_v23 = vmul.f32 %v903_v6, %v1475_v7 }
  0xa0   : > { %v269_v34 = vadd.f32 %v267_v27, %v225_v25  ;;  %v969_v25 = vrot.slane %v926_v20, 1  ;;  %v330_v20 = vstv %s1791_s19  ;;  %s1956_s19 = sld [smem:[#allocation2 + $0x3a]] }
  0xa2   : > { %v1674_v35 = vadd.f32 %v277_v30, %v269_v34  ;;  %v363_v36 = vpop.permute.xlu0 %362  ;;  %v971_v27 = vsel %vm274_vm0, %v969_v25, %v970_v26  ;;  %v1068_v30 = vrot.slane %v1481_v9, 1 }
  0xa3   : > { %v365_v38 = vadd.f32 %v363_v36, %v334_v33  ;;  %v366_v43 = vadd.f32 %v363_v36, %v335_v37  ;;  %v1739_v36 = vpop.permute.xlu1 %291 }
  0xa4   : > { %v1069_v34 = vsel %vm274_vm0, %v1067_v32, %v1068_v30  ;;  %v575_v32 = vstv %s1793_s20 }
  0xa5   : > { %369 = vrot.lane.b32.xlu1 %v365_v38, %s1393_s3 }
  0xa6   : > { %v1678_v41 = vpop.permute.xlu0 %293 }
  0xa7   : > { %v1747_v37 = vpop.permute.xlu1 %378  ;;  %v295_v26 = vsel %vm257_vm4, %v1739_v36, %v1678_v41  ;;  %v454_v36 = vstv %s1799_s21 }
  0xa9   : > { %371 = vrot.lane.b32.xlu1 %v366_v43, %s1393_s3 }
  0xaa   : > { %v477_v45 = vpop.permute.xlu0 %476 }
  0xab   : > { %v479_v50 = vadd.f32 %v477_v45, %v448_v44  ;;  %v480_v53 = vadd.f32 %v477_v45, %v449_v49  ;;  %v1751_v39 = vpop.permute.xlu1 %405 }
  0xad   : > { %483 = vrot.lane.b32.xlu0 %v479_v50, %s1393_s3 }
  0xae   : > { %v591_v52 = vpop.permute.xlu0 %590 }
  0xaf   : > { %v593_v56 = vadd.f32 %v591_v52, %v562_v31  ;;  %v594_v10 = vadd.f32 %v591_v52, %v563_v8  ;;  %v351_v8 = vstv %s1226_s14  ;;  %s1895_s14 = sld [smem:[#allocation2 + $0x31]] }
  0xb0   : > { %v353_v3 = vmul.f32 %v1657_v62, %v351_v8 }
  0xb1   : > { %485 = vrot.lane.b32.xlu0 %v480_v53, %s1393_s3 }
  0xb2   : > { %v705_v57 = vpop.permute.xlu0 %704 }
  0xb3   : > { %v707_v46 = vadd.f32 %v705_v57, %v676_v54  ;;  %v708_v17 = vadd.f32 %v705_v57, %v677_v63  ;;  %v214_v54 = vstv %s1211_s8  ;;  %v349_v63 = vmul.f32 %v347_v59, %v1481_v9  ;;  %s1891_s8 = sld [smem:[#allocation2 + $0x2d]] }
  0xb4   : > { %v215_v57 = vmul.f32 %v1654_v61, %v214_v54  ;;  %v579_v54 = vstv %s1801_s22 }
  0xb5   : > { %597 = vrot.lane.b32.xlu0 %v593_v56, %s1393_s3  ;;  %711 = vrot.lane.b32.xlu1 %v707_v46, %s1393_s3 }
  0xb6   : > { %v819_v1 = vpop.permute.xlu0 %818 }
  0xb7   : > { %v821_v11 = vadd.f32 %v819_v1, %v790_v60  ;;  %v822_v18 = vadd.f32 %v819_v1, %v791_v12  ;;  %v348_v60 = vmul.f32 %v347_v59, %v1471_v4  ;;  %v352_v1 = vmul.f32 %v1654_v61, %v351_v8 }
  0xb8   : > { %v1807_v12 = vand.u32 127, %v201_v42 }
  0xb9   : > { %599 = vrot.lane.b32.xlu0 %v594_v10, %s1393_s3  ;;  %825 = vrot.lane.b32.xlu1 %v821_v11, %s1393_s3  ;;  %v461_v10 = vstv %s1777_s15  ;;  %v465_v11 = vstv %s1779_s16  ;;  %s1922_s15 = sld [smem:[#allocation2 + $0x3c]]  ;;  %s1924_s16 = sld [smem:[#allocation2 + $0x3d]] }
  0xba   : > { %v933_v16 = vpop.permute.xlu0 %932  ;;  %v463_v21 = vmul.f32 %v461_v10, %v1481_v9  ;;  %v462_v25 = vmul.f32 %v461_v10, %v1471_v4  ;;  %vm208_vm5 = vcmp.lt.s32.totalorder %v1807_v12, 8  ;;  %v576_v10 = vmul.f32 %v575_v32, %v1471_v4 }
  0xbb   : > { %v935_v19 = vadd.f32 %v933_v16, %v904_v13  ;;  %v936_v28 = vadd.f32 %v933_v16, %v905_v23  ;;  %v340_v13 = vstv %s1781_s17  ;;  %v385_v16 = vadd.f32 %v352_v1, %v348_v60  ;;  %s1942_s17 = sld [smem:[#allocation2 + $0x36]] }
  0xbc   : > { %v467_v23 = vmul.f32 %v1657_v62, %v465_v11  ;;  %vm322_vm10 = vcmp.eq.s32.totalorder %v1807_v12, 8  ;;  %vm318_vm11 = vcmp.eq.s32.totalorder %v1807_v12, 0  ;;  %vm432_vm12 = vcmp.eq.s32.totalorder %v1807_v12, 1 }
  0xbd   : > { %713 = vrot.lane.b32.xlu0 %v708_v17, %s1393_s3  ;;  %861 = vrot.lane.b32.xlu1 %v857_v15, %s1393_s3  ;;  %vm436_vm13 = vcmp.eq.s32.totalorder %v1807_v12, 9  ;;  %vm546_vm14 = vcmp.eq.s32.totalorder %v1807_v12, 2  ;;  %vm550_vm15 = vcmp.eq.s32.totalorder %v1807_v12, 10  ;;  %vm664_vm1 = vcmp.eq.s32.totalorder %v1807_v12, 11 }
  0xbe   : > { %v1725_v33 = vpop.permute.xlu0 %380  ;;  %v500_v59 = vadd.f32 %v467_v23, %v463_v21  ;;  %vm774_vm2 = vcmp.eq.s32.totalorder %v1807_v12, 4 }
  0xbf   : > { %v382_v41 = vsel %vm257_vm4, %v1747_v37, %v1725_v33  ;;  %v441_v33 = vstv %s1810_s23  ;;  %v444_v37 = vstv %s1812_s24 }
  0xc0   : > { %v504_v21 = vrot.slane %v500_v59, 1  ;;  %v558_v59 = vstv %s1849_s4 }
  0xc1   : > { %827 = vrot.lane.b32.xlu0 %v822_v18, %s1393_s3  ;;  %939 = vrot.lane.b32.xlu1 %v935_v19, %s1393_s3  ;;  %v386_v18 = vadd.f32 %v353_v3, %v349_v63  ;;  %v327_v19 = vstv %s1789_s18  ;;  %s1944_s18 = sld [smem:[#allocation2 + $0x37]] }
  0xc5   : > { %950 = vrot.lane.b32.xlu0 %v915_v22, %s1393_s3  ;;  %1040 = vrot.lane.b32.xlu1 %v1464_v0, %s1393_s3  ;;  %v1733_v0 = vpop.permute.xlu0 %492  ;;  %v466_v22 = vmul.f32 %v1654_v61, %v465_v11  ;;  %v455_v11 = vmul.f32 %v1666_v14, %v454_v36 }
  0xc7   : > { %v499_v8 = vadd.f32 %v466_v22, %v462_v25 }
  0xc9   : > { %863 = vrot.lane.b32.xlu0 %v1598_v29, %s1393_s3  ;;  %975 = vrot.lane.b32.xlu1 %v971_v27, %s1393_s3  ;;  %v1737_v7 = vpop.permute.xlu0 %494  ;;  %v341_v27 = vmul.f32 %v1666_v14, %v340_v13  ;;  %v689_v13 = vstv %s1821_s26  ;;  %v503_v22 = vrot.slane %v499_v8, 1 }
  0xcb   : > { %v384_v63 = vadd.f32 %v382_v41, %v341_v27  ;;  %v1015_v41 = vmul.u32 2, %v1807_v12  ;;  %v505_v8 = vsel %vm274_vm0, %v503_v22, %v504_v21 }
  0xcd   : > { %941 = vrot.lane.b32.xlu0 %v936_v28, %s1393_s3  ;;  %1073 = vrot.lane.b32.xlu1 %v1069_v34, %s1393_s3  ;;  %v1745_v29 = vpop.permute.xlu0 %606  ;;  %v328_v28 = vmul.f32 %v327_v19, %v1471_v4  ;;  %v331_v34 = vmul.f32 %v1654_v61, %v330_v20  ;;  %v442_v19 = vmul.f32 %v441_v33, %v1471_v4  ;;  %v803_v33 = vstv %s1858_s5 }
  0xce   : > { %v445_v20 = vmul.f32 %v1654_v61, %v444_v37  ;;  %v807_v37 = vstv %s1860_s6  ;;  %v804_v22 = vmul.f32 %v803_v33, %v1471_v4 }
  0xcf   : > { %v360_v1 = vadd.f32 %v331_v34, %v328_v28  ;;  %v691_v28 = vmul.f32 %v689_v13, %v1481_v9 }
  0xd0   : > { %v474_v36 = vadd.f32 %v445_v20, %v442_v19  ;;  %v669_v19 = vstv %s1870_s7 }
  0xd1   : > { %1042 = vrot.lane.b32.xlu0 %v1467_v2, %s1393_s3  ;;  %v1749_v38 = vpop.permute.xlu0 %608  ;;  %v1755_v2 = vpop.permute.xlu1 %407 }
  0xd5   : > { %977 = vrot.lane.b32.xlu0 %v1617_v40, %s1393_s3  ;;  %v1753_v43 = vpop.permute.xlu0 %519  ;;  %v1759_v45 = vpop.permute.xlu1 %521 }
  0xd9   : > { %1075 = vrot.lane.b32.xlu0 %v1626_v47, %s1393_s3  ;;  %v1757_v44 = vpop.permute.xlu0 %720  ;;  %v1763_v48 = vpop.permute.xlu1 %633  ;;  %s210_s3 = sld [smem:[#allocation2]] }
  0xdd   : > { %v1761_v40 = vpop.permute.xlu0 %722  ;;  %v1767_v49 = vpop.permute.xlu1 %834 }
  0xdf   : > { %v211_v53 = vstv %s210_s3  ;;  %s1872_s3 = sld [smem:[#allocation2 + $0x25]] }
  0xe0   : > { %v212_v58 = vmul.f32 %v211_v53, %v1471_v4  ;;  %v390_v53 = vrot.slane %v386_v18, 1 }
  0xe1   : > { %v1765_v47 = vpop.permute.xlu0 %635  ;;  %v1771_v51 = vpop.permute.xlu1 %747 }
  0xe2   : > { %v244_v46 = vadd.f32 %v215_v57, %v212_v58 }
  0xe5   : > { %v1769_v50 = vpop.permute.xlu0 %836  ;;  %v1775_v52 = vpop.permute.xlu1 %1028  ;;  %v672_v20 = vstv %s1872_s3 }
  0xe9   : > { %v1773_v31 = vpop.permute.xlu0 %749  ;;  %v1785_v56 = vpop.permute.xlu1 %948 }
  0xed   : > { %v1783_v55 = vpop.permute.xlu0 %1030 }
 0x10f   : > { %v256_v5 = vpop.permute.xlu1 %255  ;;  %v254_v6 = vpop.permute.xlu0 %253 }
 0x110   : > { %v258_v17 = vsel %vm257_vm4, %v254_v6, %v256_v5  ;;  %v580_v5 = vmul.f32 %v1654_v61, %v579_v54  ;;  %v581_v6 = vmul.f32 %v1657_v62, %v579_v54 }
 0x111   : > { %v260_v15 = vadd.f32 %v258_v17, %v244_v46  ;;  %v577_v46 = vmul.f32 %v575_v32, %v1481_v9  ;;  %v568_v17 = vstv %s1819_s25  ;;  %v682_v32 = vstv %s1838_s29 }
 0x112   : > { %v613_v27 = vadd.f32 %v580_v5, %v576_v10  ;;  %v559_v10 = vmul.f32 %v1654_v61, %v558_v59 }
 0x113   : > { %v280_v42 = vadd.f32 %v1674_v35, %v260_v15  ;;  %v389_v35 = vrot.slane %v385_v16, 1  ;;  %v693_v16 = vstv %s1829_s27  ;;  %v614_v23 = vadd.f32 %v581_v6, %v577_v46 }
 0x114   : > { %v694_v34 = vmul.f32 %v1654_v61, %v693_v16  ;;  %v569_v46 = vmul.f32 %v1666_v14, %v568_v17 }
 0x115   : > { %v297_v30 = vadd.f32 %v295_v26, %v280_v42  ;;  %v391_v3 = vsel %vm274_vm0, %v389_v35, %v390_v53  ;;  %v496_v26 = vsel %vm257_vm4, %v1733_v0, %v1737_v7  ;;  %v409_v0 = vsel %vm257_vm4, %v1751_v39, %v1755_v2 }
 0x116   : > { %v393_v25 = vadd.f32 %v391_v3, %v384_v63  ;;  %v695_v7 = vmul.f32 %v1657_v62, %v693_v16  ;;  %v498_v54 = vadd.f32 %v496_v26, %v455_v11  ;;  %v683_v63 = vmul.f32 %v1666_v14, %v682_v32 }
 0x117   : > { %v370_v57 = vpop.permute.xlu1 %369  ;;  %v298_v58 = vsel %vm208_vm5, %v297_v30, 0.0  ;;  %v690_v30 = vmul.f32 %v689_v13, %v1471_v4  ;;  %v1016_v13 = vadd.s32 4294967295, %v1015_v41  ;;  %v610_v16 = vsel %vm257_vm4, %v1745_v29, %v1749_v38 }
 0x118   : > { %299 = vadd.xlane.f32.xlu1 %v298_v58  ;;  %v308_v60 = vmul.f32 %v298_v58, %v298_v58  ;;  %v555_v58 = vstv %s1847_s30  ;;  %v507_v11 = vadd.f32 %v505_v8, %v498_v54  ;;  %v728_v17 = vadd.f32 %v695_v7, %v691_v28 }
 0x119   : > { %v727_v3 = vadd.f32 %v694_v34, %v690_v30  ;;  %v556_v6 = vmul.f32 %v555_v58, %v1471_v4  ;;  %v808_v32 = vmul.f32 %v1654_v61, %v807_v37  ;;  %v809_v29 = vmul.f32 %v1657_v62, %v807_v37 }
 0x11a   : > { %309 = vadd.xlane.f32.xlu0 %v308_v60  ;;  %v618_v60 = vrot.slane %v614_v23, 1  ;;  %v612_v30 = vadd.f32 %v610_v16, %v569_v46  ;;  %v670_v34 = vmul.f32 %v669_v19, %v1471_v4  ;;  %vm1017_vm6 = vcmp.ge.s32.totalorder %v1016_v13, 0 }
 0x11b   : > { %v372_v15 = vpop.permute.xlu1 %371  ;;  %v588_v38 = vadd.f32 %v559_v10, %v556_v6  ;;  %vm1018_vm7 = vcmp.lt.s32.totalorder %v1016_v13, 16  ;;  %v783_v41 = vstv %s1891_s8  ;;  %v796_v54 = vstv %s1895_s14  ;;  %s187_s14 = scalar_lea.vmem %s2041_s2, %s2053_s9 }
 0x11c   : > { %v373_v18 = vsel %vm257_vm4, %v370_v57, %v372_v15  ;;  %vm1931_vm8 = vmand %vm1017_vm6, %vm1018_vm7  ;;  %v797_v6 = vmul.f32 %v1666_v14, %v796_v54  ;;  %v838_v16 = vsel %vm257_vm4, %v1767_v49, %v1769_v50  ;;  %vm1002_vm6 = vcmp.eq.s32.totalorder %v1807_v12, 6 }
 0x11d   : > { %v375_v42 = vadd.f32 %v373_v18, %v360_v1  ;;  %v617_v1 = vrot.slane %v613_v27, 1  ;;  %v523_v27 = vsel %vm257_vm4, %v1753_v43, %v1759_v45  ;;  %v724_v43 = vsel %vm257_vm4, %v1757_v44, %v1761_v40  ;;  %vm1020_vm9 = vmand %vm1586_vm3, %vm1931_vm8 }
 0x11e   : > { %v726_v44 = vadd.f32 %v724_v43, %v683_v63  ;;  %v637_v63 = vsel %vm257_vm4, %v1763_v48, %v1765_v47  ;;  %v1021_v49 = vsel %vm1020_vm9, %v1471_v4, -inf  ;;  %v900_v43 = vstv %s1944_s18 }
 0x11f   : > { %v484_v35 = vpop.permute.xlu0 %483  ;;  %v394_v53 = vadd.f32 %v393_v25, %v375_v42  ;;  %v619_v21 = vsel %vm274_vm0, %v617_v1, %v618_v60  ;;  %v805_v25 = vmul.f32 %v803_v33, %v1481_v9  ;;  %vm1006_vm7 = vcmp.eq.s32.totalorder %v1807_v12, 14 }
 0x120   : > { %v621_v8 = vadd.f32 %v619_v21, %v612_v30  ;;  %vm1104_vm9 = vcmp.eq.s32.totalorder %v1807_v12, 15 }
 0x121   : > { %v411_v57 = vadd.f32 %v409_v0, %v394_v53  ;;  %v731_v53 = vrot.slane %v727_v3, 1  ;;  %v732_v0 = vrot.slane %v728_v17, 1  ;;  %v842_v58 = vadd.f32 %v809_v29, %v805_v25 }
 0x122   : > { %v921_v25 = vstv %s1924_s16 }
 0x123   : > { %v486_v39 = vpop.permute.xlu0 %485  ;;  %v412_v2 = vsel %vm208_vm5, %v411_v57, 0.0  ;;  %v841_v57 = vadd.f32 %v808_v32, %v804_v22  ;;  %v733_v1 = vsel %vm274_vm0, %v731_v53, %v732_v0  ;;  %v846_v13 = vrot.slane %v842_v58, 1  ;;  %v1345_v58 = vld [vmem:[%s1461_s28] sm:$0xff] }
 0x124   : > { %v487_v5 = vsel %vm257_vm4, %v484_v35, %v486_v39  ;;  %413 = vadd.xlane.f32.xlu1 %v412_v2  ;;  %v422_v18 = vmul.f32 %v412_v2, %v412_v2  ;;  %v673_v35 = vmul.f32 %v1654_v61, %v672_v20  ;;  %v784_v39 = vmul.f32 %v783_v41, %v1471_v4 }
 0x125   : > { %v489_v15 = vadd.f32 %v487_v5, %v474_v36  ;;  %v786_v36 = vstv %s1893_s12  ;;  %v845_v10 = vrot.slane %v841_v57, 1  ;;  %v735_v17 = vadd.f32 %v733_v1, %v726_v44 }
 0x126   : > { %v702_v46 = vadd.f32 %v673_v35, %v670_v34  ;;  %v787_v2 = vmul.f32 %v1654_v61, %v786_v36  ;;  %v917_v22 = vstv %s1922_s15  ;;  %v1032_v0 = vsel %vm257_vm4, %v1775_v52, %v1783_v55 }
 0x127   : > { %v598_v42 = vpop.permute.xlu0 %597  ;;  %v508_v26 = vadd.f32 %v507_v11, %v489_v15  ;;  %v712_v23 = vpop.permute.xlu1 %711  ;;  %v918_v29 = vmul.f32 %v917_v22, %v1471_v4 }
 0x128   : > { %423 = vadd.xlane.f32.xlu1 %v422_v18  ;;  %v1022_v18 = vsel %vm1586_vm3, %v1654_v61, -inf  ;;  %v816_v19 = vadd.f32 %v787_v2, %v784_v39  ;;  %v1347_v39 = vld [vmem:[%s1461_s28 + $0x10] sm:$0x1]  ;;  %vm778_vm3 = vcmp.eq.s32.totalorder %v1807_v12, 12 }
 0x129   : > { %v525_v28 = vadd.f32 %v523_v27, %v508_v26  ;;  %v751_v26 = vsel %vm257_vm4, %v1771_v51, %v1773_v31  ;;  %v840_v27 = vadd.f32 %v838_v16, %v797_v6  ;;  %v922_v51 = vmul.f32 %v1654_v61, %v921_v25 }
 0x12a   : > { %v923_v31 = vmul.f32 %v1657_v62, %v921_v25  ;;  %v1023_v30 = vmax.f32 %v1021_v49, %v1022_v18  ;;  %v1048_v2 = vsel %vm1931_vm8, %v1347_v39, -inf  ;;  %v1058_v25 = vrot.slane %v1654_v61, 1 }
 0x12b   : > { %v600_v45 = vpop.permute.xlu0 %599  ;;  %v526_v7 = vsel %vm208_vm5, %v525_v28, 0.0  ;;  %v826_v60 = vpop.permute.xlu1 %825  ;;  %v955_v41 = vadd.f32 %v922_v51, %v918_v29 }
 0x12c   : > { %v601_v59 = vsel %vm257_vm4, %v598_v42, %v600_v45  ;;  %527 = vadd.xlane.f32.xlu0 %v526_v7  ;;  %v536_v37 = vmul.f32 %v526_v7, %v526_v7  ;;  %v910_v7 = vstv %s1956_s19  ;;  %v1034_v54 = vmax.f32 %v1023_v30, %v1032_v0 }
 0x12d   : > { %v603_v40 = vadd.f32 %v601_v59, %v588_v38  ;;  %v919_v38 = vmul.f32 %v917_v22, %v1481_v9  ;;  %v897_v9 = vstv %s1942_s17 }
 0x12e   : > { %v898_v59 = vmul.f32 %v1345_v58, %v897_v9 }
 0x12f   : > { %v714_v3 = vpop.permute.xlu0 %713  ;;  %v622_v5 = vadd.f32 %v621_v8, %v603_v40  ;;  %v862_v15 = vpop.permute.xlu1 %861  ;;  %v956_v36 = vadd.f32 %v923_v31, %v919_v38  ;;  %v901_v8 = vmul.f32 %v1654_v61, %v900_v43  ;;  %v1346_v40 = vld [vmem:[%s1461_s28 + $0x40] sm:$0xff] }
 0x130   : > { %v715_v11 = vsel %vm257_vm4, %v712_v23, %v714_v3  ;;  %537 = vadd.xlane.f32.xlu0 %v536_v37  ;;  %v847_v23 = vsel %vm274_vm0, %v845_v10, %v846_v13  ;;  %v1035_v52 = vsel %vm1931_vm8, %v1346_v40, -inf  ;;  %v1047_v37 = vsel %vm1931_vm8, %v1345_v58, -inf }
 0x131   : > { %v717_v48 = vadd.f32 %v715_v11, %v702_v46  ;;  %v639_v47 = vadd.f32 %v637_v63, %v622_v5  ;;  %v849_v45 = vadd.f32 %v847_v23, %v840_v27  ;;  %v911_v46 = vmul.f32 %v1666_v14, %v910_v7 }
 0x132   : > { %v959_v3 = vrot.slane %v955_v41, 1  ;;  %v960_v5 = vrot.slane %v956_v36, 1  ;;  %v1036_v6 = vmax.f32 %v1034_v54, %v1035_v52  ;;  %v930_v10 = vadd.f32 %v901_v8, %v898_v59 }
 0x133   : > { %v828_v20 = vpop.permute.xlu0 %827  ;;  %v640_v21 = vsel %vm208_vm5, %v639_v47, 0.0  ;;  %v736_v42 = vadd.f32 %v735_v17, %v717_v48  ;;  %v940_v53 = vpop.permute.xlu1 %939  ;;  %v1051_v47 = vrot.slane %v1047_v37, 1  ;;  %vm1100_vm8 = vcmp.eq.s32.totalorder %v1807_v12, 7 }
 0x134   : > { %v829_v50 = vsel %vm257_vm4, %v826_v60, %v828_v20  ;;  %641 = vadd.xlane.f32.xlu1 %v640_v21  ;;  %v650_v24 = vmul.f32 %v640_v21, %v640_v21  ;;  %v961_v33 = vsel %vm274_vm0, %v959_v3, %v960_v5 }
 0x135   : > { %v753_v32 = vadd.f32 %v751_v26, %v736_v42  ;;  %v831_v28 = vadd.f32 %v829_v50, %v816_v19  ;;  %v1037_v19 = vmax.f32 %v1036_v6, %v1666_v14  ;;  %v1059_v42 = vrot.slane %v1657_v62, 1 }
 0x136   : > { %651 = vadd.xlane.f32.xlu0 %v650_v24 }
 0x137   : > { %v951_v34 = vpop.permute.xlu0 %950  ;;  %v754_v35 = vsel %vm208_vm5, %v753_v32, 0.0  ;;  %v850_v44 = vadd.f32 %v849_v45, %v831_v28  ;;  %v1041_v1 = vpop.permute.xlu1 %1040  ;;  %v1060_v32 = vsel %vm274_vm0, %v1058_v25, %v1059_v42 }
 0x138   : > { %755 = vadd.xlane.f32.xlu1 %v754_v35  ;;  %v764_v4 = vmul.f32 %v754_v35, %v754_v35  ;;  %v952_v63 = vsel %vm257_vm4, %v1785_v56, %v951_v34 }
 0x139   : > { %v954_v16 = vadd.f32 %v952_v63, %v911_v46 }
 0x13a   : > { %765 = vadd.xlane.f32.xlu0 %v764_v4 }
 0x13b   : > { %v864_v57 = vpop.permute.xlu0 %863  ;;  %v976_v20 = vpop.permute.xlu1 %975  ;;  %v963_v26 = vadd.f32 %v961_v33, %v954_v16 }
 0x13c   : > { %v865_v55 = vsel %vm257_vm4, %v862_v15, %v864_v57  ;;  %v1052_v15 = vrot.slane %v1048_v2, 1 }
 0x13d   : > { %v867_v60 = vadd.f32 %v865_v55, %v850_v44 }
 0x13e   : > { %v1053_v21 = vsel %vm274_vm0, %v1051_v47, %v1052_v15  ;;  %vm660_vm0 = vcmp.eq.s32.totalorder %v1807_v12, 3 }
 0x13f   : > { %v942_v11 = vpop.permute.xlu0 %941  ;;  %v868_v17 = vsel %vm208_vm5, %v867_v60, 0.0  ;;  %v1074_v14 = vpop.permute.xlu1 %1073 }
 0x140   : > { %v943_v13 = vsel %vm257_vm4, %v940_v53, %v942_v11  ;;  %869 = vadd.xlane.f32.xlu1 %v868_v17  ;;  %v878_v48 = vmul.f32 %v868_v17, %v868_v17 }
 0x141   : > { %v945_v18 = vadd.f32 %v943_v13, %v930_v10 }
 0x142   : > { %879 = vadd.xlane.f32.xlu0 %v878_v48 }
 0x143   : > { %v1043_v56 = vpop.permute.xlu0 %1042  ;;  %v964_v23 = vadd.f32 %v963_v26, %v945_v18 }
 0x144   : > { %v1044_v22 = vsel %vm257_vm4, %v1041_v1, %v1043_v56 }
 0x145   : > { %v1046_v49 = vmax.f32 %v1037_v19, %v1044_v22 }
 0x147   : > { %v1055_v50 = vmax.f32 %v1046_v49, %v1053_v21  ;;  %v978_v24 = vpop.permute.xlu0 %977 }
 0x148   : > { %v979_v27 = vsel %vm257_vm4, %v976_v20, %v978_v24 }
 0x149   : > { %v981_v29 = vadd.f32 %v979_v27, %v964_v23  ;;  %v1062_v31 = vmax.f32 %v1055_v50, %v1060_v32 }
 0x14b   : > { %v1076_v38 = vpop.permute.xlu0 %1075  ;;  %v982_v51 = vsel %vm208_vm5, %v981_v29, 0.0 }
 0x14c   : > { %v1077_v61 = vsel %vm257_vm4, %v1074_v14, %v1076_v38  ;;  %983 = vadd.xlane.f32.xlu1 %v982_v51  ;;  %v992_v62 = vmul.f32 %v982_v51, %v982_v51  ;;  %vm888_vm4 = vcmp.eq.s32.totalorder %v1807_v12, 5 }
 0x14d   : > { %v1079_v30 = vmax.f32 %v1062_v31, %v1077_v61 }
 0x14e   : > { %993 = vadd.xlane.f32.xlu0 %v992_v62 }
 0x14f   : > { %v1080_v28 = vsel %vm208_vm5, %v1079_v30, 0.0  ;;  %vm892_vm5 = vcmp.eq.s32.totalorder %v1807_v12, 13 }
 0x150   : > { %1081 = vadd.xlane.f32.xlu1 %v1080_v28  ;;  %v1090_v34 = vmul.f32 %v1080_v28, %v1080_v28 }
 0x152   : > { %1091 = vadd.xlane.f32.xlu0 %v1090_v34 }
 0x1a5   : > { %v300_v35 = vpop.xlane.xlu1 %299 }
 0x1a6   : > { %v301_v53 = vrot.slane %v300_v35, 4 }
 0x1a7   : > { %v310_v0 = vpop.xlane.xlu0 %309 }
 0x1a8   : > { %v302_v4 = vadd.f32 %v301_v53, %v300_v35  ;;  %v311_v9 = vrot.slane %v310_v0, 4 }
 0x1aa   : > { %v303_v43 = vrot.slane %v302_v4, 2  ;;  %v312_v45 = vadd.f32 %v311_v9, %v310_v0 }
 0x1ac   : > { %v313_v7 = vrot.slane %v312_v45, 2  ;;  %v304_v41 = vadd.f32 %v303_v43, %v302_v4 }
 0x1ae   : > { %v305_v36 = vrot.slane %v304_v41, 1  ;;  %v314_v54 = vadd.f32 %v313_v7, %v312_v45 }
 0x1b0   : > { %v306_v57 = vadd.f32 %v305_v36, %v304_v41  ;;  %v315_v58 = vrot.slane %v314_v54, 1 }
 0x1b1   : > { %v414_v59 = vpop.xlane.xlu1 %413 }
 0x1b2   : > { %v415_v8 = vrot.slane %v414_v59, 4  ;;  %1276 = vpush %v306_v57  ;;  %v316_v44 = vadd.f32 %v315_v58, %v314_v54 }
 0x1b4   : > { %v416_v40 = vadd.f32 %v415_v8, %v414_v59  ;;  %1278 = vpush %v316_v44 }
 0x1b5   : > { %v424_v52 = vpop.xlane.xlu1 %423 }
 0x1b6   : > { %v417_v55 = vrot.slane %v416_v40, 2  ;;  %v425_v46 = vrot.slane %v424_v52, 4 }
 0x1b8   : > { %v426_v60 = vadd.f32 %v425_v46, %v424_v52  ;;  %v418_v1 = vadd.f32 %v417_v55, %v416_v40 }
 0x1b9   : > { %v528_v37 = vpop.xlane.xlu0 %527 }
 0x1ba   : > { %v427_v39 = vrot.slane %v426_v60, 2  ;;  %v529_v2 = vrot.slane %v528_v37, 4  ;;  %v419_v3 = vrot.slane %v418_v1, 1 }
 0x1bc   : > { %v530_v5 = vadd.f32 %v529_v2, %v528_v37  ;;  %v420_v63 = vadd.f32 %v419_v3, %v418_v1  ;;  %v428_v6 = vadd.f32 %v427_v39, %v426_v60 }
 0x1bd   : > { %v538_v10 = vpop.xlane.xlu0 %537 }
 0x1be   : > { %v531_v11 = vrot.slane %v530_v5, 2  ;;  %v539_v17 = vrot.slane %v538_v10, 4  ;;  %1280 = vpush %v420_v63  ;;  %v429_v13 = vrot.slane %v428_v6, 1 }
 0x1c0   : > { %v540_v48 = vadd.f32 %v539_v17, %v538_v10  ;;  %v430_v47 = vadd.f32 %v429_v13, %v428_v6  ;;  %v532_v15 = vadd.f32 %v531_v11, %v530_v5 }
 0x1c1   : > { %v642_v16 = vpop.xlane.xlu1 %641 }
 0x1c2   : > { %v541_v33 = vrot.slane %v540_v48, 2  ;;  %v643_v18 = vrot.slane %v642_v16, 4  ;;  %1282 = vpush %v430_v47  ;;  %v533_v19 = vrot.slane %v532_v15, 1 }
 0x1c3   : > { %v652_v56 = vpop.xlane.xlu0 %651 }
 0x1c4   : > { %v644_v20 = vadd.f32 %v643_v18, %v642_v16  ;;  %v653_v21 = vrot.slane %v652_v56, 4  ;;  %v534_v22 = vadd.f32 %v533_v19, %v532_v15  ;;  %v542_v25 = vadd.f32 %v541_v33, %v540_v48 }
 0x1c5   : > { %v756_v42 = vpop.xlane.xlu1 %755 }
 0x1c6   : > { %v645_v26 = vrot.slane %v644_v20, 2  ;;  %v654_v49 = vadd.f32 %v653_v21, %v652_v56  ;;  %v757_v50 = vrot.slane %v756_v42, 4  ;;  %1284 = vpush %v534_v22  ;;  %v543_v24 = vrot.slane %v542_v25, 1 }
 0x1c7   : > { %v766_v23 = vpop.xlane.xlu0 %765 }
 0x1c8   : > { %v655_v27 = vrot.slane %v654_v49, 2  ;;  %v758_v32 = vadd.f32 %v757_v50, %v756_v42  ;;  %v767_v14 = vrot.slane %v766_v23, 4  ;;  %v544_v29 = vadd.f32 %v543_v24, %v542_v25 }
 0x1c9   : > { %v646_v38 = vadd.f32 %v645_v26, %v644_v20 }
 0x1ca   : > { %v759_v51 = vrot.slane %v758_v32, 2  ;;  %v768_v31 = vadd.f32 %v767_v14, %v766_v23  ;;  %1286 = vpush %v544_v29  ;;  %v656_v61 = vadd.f32 %v655_v27, %v654_v49 }
 0x1cb   : > { %v647_v62 = vrot.slane %v646_v38, 1 }
 0x1cc   : > { %v769_v30 = vrot.slane %v768_v31, 2  ;;  %v657_v28 = vrot.slane %v656_v61, 1  ;;  %v760_v34 = vadd.f32 %v759_v51, %v758_v32 }
 0x1cd   : > { %v870_v35 = vpop.xlane.xlu1 %869  ;;  %v648_v53 = vadd.f32 %v647_v62, %v646_v38 }
 0x1ce   : > { %v871_v0 = vrot.slane %v870_v35, 4  ;;  %v658_v4 = vadd.f32 %v657_v28, %v656_v61  ;;  %v761_v9 = vrot.slane %v760_v34, 1  ;;  %v770_v43 = vadd.f32 %v769_v30, %v768_v31 }
 0x1cf   : > { %1288 = vpush %v648_v53  ;;  %v880_v45 = vpop.xlane.xlu0 %879 }
 0x1d0   : > { %v872_v7 = vadd.f32 %v871_v0, %v870_v35  ;;  %v881_v41 = vrot.slane %v880_v45, 4  ;;  %1290 = vpush %v658_v4  ;;  %v762_v36 = vadd.f32 %v761_v9, %v760_v34  ;;  %v771_v54 = vrot.slane %v770_v43, 1 }
 0x1d2   : > { %v873_v57 = vrot.slane %v872_v7, 2  ;;  %v882_v58 = vadd.f32 %v881_v41, %v880_v45  ;;  %1292 = vpush %v762_v36  ;;  %v772_v59 = vadd.f32 %v771_v54, %v770_v43 }
 0x1d4   : > { %v883_v8 = vrot.slane %v882_v58, 2  ;;  %1294 = vpush %v772_v59  ;;  %v874_v44 = vadd.f32 %v873_v57, %v872_v7 }
 0x1d6   : > { %v875_v40 = vrot.slane %v874_v44, 1  ;;  %v884_v52 = vadd.f32 %v883_v8, %v882_v58 }
 0x1d8   : > { %v876_v55 = vadd.f32 %v875_v40, %v874_v44  ;;  %v885_v46 = vrot.slane %v884_v52, 1 }
 0x1d9   : > { %v984_v60 = vpop.xlane.xlu1 %983 }
 0x1da   : > { %v985_v1 = vrot.slane %v984_v60, 4  ;;  %1296 = vpush %v876_v55  ;;  %v886_v37 = vadd.f32 %v885_v46, %v884_v52 }
 0x1db   : > { %v994_v39 = vpop.xlane.xlu0 %993 }
 0x1dc   : > { %v986_v2 = vadd.f32 %v985_v1, %v984_v60  ;;  %v995_v3 = vrot.slane %v994_v39, 4  ;;  %1298 = vpush %v886_v37 }
 0x1dd   : > { %v1082_v5 = vpop.xlane.xlu1 %1081 }
 0x1de   : > { %v987_v63 = vrot.slane %v986_v2, 2  ;;  %v996_v6 = vadd.f32 %v995_v3, %v994_v39  ;;  %v1083_v10 = vrot.slane %v1082_v5, 4 }
 0x1df   : > { %v1092_v11 = vpop.xlane.xlu0 %1091 }
 0x1e0   : > { %v997_v17 = vrot.slane %v996_v6, 2  ;;  %v1084_v13 = vadd.f32 %v1083_v10, %v1082_v5  ;;  %v1093_v48 = vrot.slane %v1092_v11, 4  ;;  %v988_v47 = vadd.f32 %v987_v63, %v986_v2 }
 0x1e2   : > { %v1085_v15 = vrot.slane %v1084_v13, 2  ;;  %v1094_v16 = vadd.f32 %v1093_v48, %v1092_v11  ;;  %v989_v33 = vrot.slane %v988_v47, 1  ;;  %v998_v18 = vadd.f32 %v997_v17, %v996_v6 }
 0x1e3   : > { %s1277_s28 = spop %1276 }
 0x1e4   : > { %v1086_v19 = vadd.f32 %v1085_v15, %v1084_v13  ;;  %v1095_v56 = vrot.slane %v1094_v16, 2  ;;  %v990_v20 = vadd.f32 %v989_v33, %v988_v47  ;;  %v999_v21 = vrot.slane %v998_v18, 1 }
 0x1e5   : > { %s1279_s20 = spop %1278  ;;  %v319_v23 = vstv %s1277_s28 }
 0x1e6   : > { %v1096_v22 = vadd.f32 %v1095_v56, %v1094_v16  ;;  %1300 = vpush %v990_v20  ;;  %v1087_v25 = vrot.slane %v1086_v19, 1  ;;  %v1000_v42 = vadd.f32 %v999_v21, %v998_v18  ;;  %v323_v24 = vstv %s1279_s20 }
 0x1e7   : > { %v324_v32 = vsel %vm322_vm10, %v323_v24, 0.0  ;;  %v320_v29 = vsel %vm318_vm11, %v319_v23, 0.0  ;;  %vm1108_vm10 = vcmask 122880  }
 0x1e8   : > { %v1088_v26 = vadd.f32 %v1087_v25, %v1086_v19  ;;  %v1097_v49 = vrot.slane %v1096_v22, 1  ;;  %1302 = vpush %v1000_v42  ;;  %v325_v51 = vadd.f32 %v324_v32, %v320_v29 }
 0x1ea   : > { %1304 = vpush %v1088_v26  ;;  %v1098_v50 = vadd.f32 %v1097_v49, %v1096_v22 }
 0x1ec   : > { %1306 = vpush %v1098_v50 }
 0x1ef   : > { %s1281_s21 = spop %1280 }
 0x1f0   : > { %v433_v27 = vstv %s1281_s21 }
 0x1f1   : > { %v434_v38 = vsel %vm432_vm12, %v433_v27, 0.0 }
 0x1f2   : > { %v435_v62 = vadd.f32 %v434_v38, %v325_v51 }
 0x1f3   : > { %s1283_s22 = spop %1282 }
 0x1f4   : > { %v437_v14 = vstv %s1283_s22 }
 0x1f5   : > { %v438_v61 = vsel %vm436_vm13, %v437_v14, 0.0 }
 0x1f6   : > { %v439_v34 = vadd.f32 %v438_v61, %v435_v62 }
 0x1f7   : > { %s1285_s23 = spop %1284 }
 0x1f8   : > { %v547_v31 = vstv %s1285_s23 }
 0x1f9   : > { %v548_v28 = vsel %vm546_vm14, %v547_v31, 0.0 }
 0x1fa   : > { %v549_v0 = vadd.f32 %v548_v28, %v439_v34 }
 0x1fb   : > { %s1287_s24 = spop %1286 }
 0x1fc   : > { %v551_v30 = vstv %s1287_s24 }
 0x1fd   : > { %v552_v35 = vsel %vm550_vm15, %v551_v30, 0.0 }
 0x1fe   : > { %v553_v9 = vadd.f32 %v552_v35, %v549_v0 }
 0x200   : > { %s1289_s25 = spop %1288 }
 0x201   : > { %v661_v53 = vstv %s1289_s25  ;;  %s1291_s26 = spop %1290 }
 0x202   : > { %v662_v4 = vsel %vm660_vm0, %v661_v53, 0.0  ;;  %v665_v43 = vstv %s1291_s26 }
 0x203   : > { %s1293_s27 = spop %1292  ;;  %v663_v45 = vadd.f32 %v662_v4, %v553_v9  ;;  %v666_v7 = vsel %vm664_vm1, %v665_v43, 0.0 }
 0x204   : > { %v775_v41 = vstv %s1293_s27 }
 0x205   : > { %s1295_s29 = spop %1294  ;;  %v667_v36 = vadd.f32 %v666_v7, %v663_v45  ;;  %v776_v54 = vsel %vm774_vm2, %v775_v41, 0.0 }
 0x206   : > { %v779_v57 = vstv %s1295_s29 }
 0x207   : > { %v777_v58 = vadd.f32 %v776_v54, %v667_v36  ;;  %v780_v8 = vsel %vm778_vm3, %v779_v57, 0.0 }
 0x209   : > { %v781_v40 = vadd.f32 %v780_v8, %v777_v58 }
 0x20b   : > { %s1297_s30 = spop %1296 }
 0x20c   : > { %v889_v59 = vstv %s1297_s30 }
 0x20d   : > { %s1299_s4 = spop %1298  ;;  %v890_v44 = vsel %vm888_vm4, %v889_v59, 0.0 }
 0x20e   : > { %v893_v52 = vstv %s1299_s4  ;;  %v891_v55 = vadd.f32 %v890_v44, %v781_v40 }
 0x20f   : > { %v894_v46 = vsel %vm892_vm5, %v893_v52, 0.0 }
 0x210   : > { %v895_v60 = vadd.f32 %v894_v46, %v891_v55 }
 0x217   : > { %s1301_s5 = spop %1300 }
 0x218   : > { %v1003_v1 = vstv %s1301_s5 }
 0x219   : > { %v1004_v37 = vsel %vm1002_vm6, %v1003_v1, 0.0  ;;  %s1303_s6 = spop %1302 }
 0x21a   : > { %v1005_v39 = vadd.f32 %v1004_v37, %v895_v60  ;;  %v1007_v2 = vstv %s1303_s6 }
 0x21b   : > { %s1305_s7 = spop %1304  ;;  %v1008_v3 = vsel %vm1006_vm7, %v1007_v2, 0.0 }
 0x21c   : > { %v1101_v5 = vstv %s1305_s7  ;;  %v1009_v63 = vadd.f32 %v1008_v3, %v1005_v39 }
 0x21d   : > { %v1102_v6 = vsel %vm1100_vm8, %v1101_v5, 0.0  ;;  %s1307_s3 = spop %1306 }
 0x21e   : > { %v1105_v10 = vstv %s1307_s3  ;;  %v1103_v11 = vadd.f32 %v1102_v6, %v1009_v63 }
 0x21f   : > { %v1106_v17 = vsel %vm1104_vm9, %v1105_v10, 0.0 }
 0x220   : > { %v1107_v13 = vadd.f32 %v1106_v17, %v1103_v11 }
 0x222   : > { %1109 = vst.msk [vmem:[%s187_s14] sm:$0x1] %vm1108_vm10, %v1107_v13 }
 0x223 PF: > { %s13_s11 = sadd.s32 1, %s1389_s11   ;;  %s2048_s9 = smov %s1385_s10 }
 0x224   : > { %p10_p2 = scmp.ge.s32.totalorder %s13_s11, 4   ;;  %s2049_s10 = smov %s2051_s13 }
 0x226   :  { %12 = sbr.rel (!%p10_p2) target bundleno = 2 (0x2), region = 66 }
 0x22d   :  { %1133 = vsyncpa [#allocation3], 1 }
 0x22e   :  { %1135 = vsyncpa [#allocation3 + $0x1], 1 }

</bundles_post_ra>
